<compile_context>
chip_gen: v6e
topology: v6e:2x2x1
jax: 0.10.0
libtpu: 0.0.40
codegen_flags: <defaults>
</compile_context>

<pallas_src>
import jax
import jax.numpy as jnp
from jax.experimental import pallas as pl
from jax.experimental.pallas import tpu as pltpu


# ---------------------------------------------------------------------------
# Pallas kernels
# ---------------------------------------------------------------------------
def conv_bn_relu_pool_kernel(p_ref, w_ref, t_ref, o_ref):
    """One batch element, lane-dense layout.

    p_ref : (1, 4, K, N) bf16  im2col patches, 4 = 2x2 pool offsets, N = PH*PW
    w_ref : (Cout, K)    bf16  conv weight with BN scale folded in
    t_ref : (Cout, 1)    f32   folded BN shift = beta + (conv_bias - mean)*scale
    o_ref : (1, Cout, N)       max-pooled, ReLU'd output
    """
    w = w_ref[...]
    # 4 MXU dots against the same resident weights, f32 accumulate, max-pool.
    acc = jnp.dot(w, p_ref[0, 0], preferred_element_type=jnp.float32)
    for i in range(1, 4):  # static unroll over the 2x2 pool window
        acc = jnp.maximum(
            acc, jnp.dot(w, p_ref[0, i], preferred_element_type=jnp.float32))
    # BN shift + ReLU applied once after the pool max (mathematically identical).
    o_ref[0] = jnp.maximum(acc + t_ref[...], 0.0).astype(o_ref.dtype)


def head_kernel(x_ref, d_ref, w1_ref, b1_ref, wd_ref, bd_ref,
                w2a_ref, w2b_ref, b2_ref, o_ref):
    """fc1 -> relu, fnn_fc1 -> relu, concat, fc2 (concat done as split matmul)."""
    h1 = jnp.maximum(
        jnp.dot(x_ref[...], w1_ref[...], preferred_element_type=jnp.float32)
        + b1_ref[...], 0.0)
    hd = jnp.maximum(
        jnp.dot(d_ref[...], wd_ref[...], preferred_element_type=jnp.float32)
        + bd_ref[...], 0.0)
    o_ref[...] = (jnp.dot(h1, w2a_ref[...], preferred_element_type=jnp.float32)
                  + jnp.dot(hd, w2b_ref[...], preferred_element_type=jnp.float32)
                  + b2_ref[...])


# ---------------------------------------------------------------------------
# Host-side im2col (lane-dense layout) and wrappers
# ---------------------------------------------------------------------------
def im2col_pool_nchw(x, ph, pw):
    """x: (B, Cin, H, W) -> patches (B, 4, 9*Cin, PH*PW).

    patches[b, 2*dy+dx, (kh*3+kw)*Cin+ci, p*PW+q]
        = x[b, ci, 2*(2*p+dy)+kh, 2*(2*q+dx)+kw]
    i.e. exactly the conv(k=3,s=2) receptive fields of the conv-output positions
    that survive the floor-mode 2x2 max pool.
    """
    b, cin = x.shape[0], x.shape[1]
    offs = []
    for dy in (0, 1):
        for dx in (0, 1):
            taps = []
            for kh in range(3):
                for kw in range(3):
                    r0 = 2 * dy + kh
                    c0 = 2 * dx + kw
                    sl = x[:, :, r0:r0 + 4 * (ph - 1) + 1:4,
                           c0:c0 + 4 * (pw - 1) + 1:4]       # (B, Cin, PH, PW)
                    taps.append(sl)
            g = jnp.stack(taps, axis=1)                       # (B, 9, Cin, PH, PW)
            offs.append(g.reshape(b, 9 * cin, ph * pw))       # K = (kh,kw,ci)
    return jnp.stack(offs, axis=1)                            # (B, 4, K, N)


def conv_block(x_nchw, w_mat, shift, ph, pw, out_dtype=jnp.bfloat16):
    b, cin = x_nchw.shape[0], x_nchw.shape[1]
    k = 9 * cin
    n = ph * pw
    cout = w_mat.shape[0]
    patches = im2col_pool_nchw(x_nchw, ph, pw)                # (B, 4, K, N) bf16
    out = pl.pallas_call(
        conv_bn_relu_pool_kernel,
        out_shape=jax.ShapeDtypeStruct((b, cout, n), out_dtype),
        grid=(b,),
        in_specs=[
            pl.BlockSpec((1, 4, k, n), lambda i: (i, 0, 0, 0)),
            pl.BlockSpec((cout, k), lambda i: (0, 0)),
            pl.BlockSpec((cout, 1), lambda i: (0, 0)),
        ],
        out_specs=pl.BlockSpec((1, cout, n), lambda i: (i, 0, 0)),
        compiler_params=pltpu.CompilerParams(
            dimension_semantics=("parallel",)),
    )(patches, w_mat, shift)
    return out                                                # (B, Cout, PH*PW)


def fc_head(x_flat, x_demo, w1t, b1, wdt, bd, w2a, w2b, b2):
    b = x_flat.shape[0]
    vmem = pl.BlockSpec(memory_space=pltpu.MemorySpace.VMEM)
    return pl.pallas_call(
        head_kernel,
        out_shape=jax.ShapeDtypeStruct((b, b2.shape[1]), jnp.float32),
        in_specs=[vmem] * 9,
        out_specs=vmem,
    )(x_flat, x_demo, w1t, b1, wdt, bd, w2a, w2b, b2)


# ---------------------------------------------------------------------------
# Parameter construction (deterministic, synthetic) and full forward
# ---------------------------------------------------------------------------
def make_params(key):
    eps = 1e-5
    kc1, kc2, kc3, kf1, kf2, kf3, kf4, kf5, kf6 = jax.random.split(key, 9)

    def conv_layer(k, cin, cout):
        kw, kb, kg, kbt, km, kv = jax.random.split(k, 6)
        w = 0.1 * jax.random.normal(kw, (cout, cin, 3, 3), jnp.float32)   # OIHW
        bconv = 0.05 * jax.random.normal(kb, (cout,), jnp.float32)
        gamma = 1.0 + 0.1 * jax.random.normal(kg, (cout,), jnp.float32)
        beta = 0.05 * jax.random.normal(kbt, (cout,), jnp.float32)
        mean = 0.05 * jax.random.normal(km, (cout,), jnp.float32)
        var = 1.0 + 0.1 * jnp.abs(jax.random.normal(kv, (cout,), jnp.float32))
        scale = gamma / jnp.sqrt(var + eps)                # eval-mode BN fold
        shift = beta + (bconv - mean) * scale
        # (Cout, K) with K flattened as (kh, kw, ci); BN scale folded into rows.
        w_mat = (jnp.transpose(w, (0, 2, 3, 1)).reshape(cout, 9 * cin)
                 * scale[:, None])
        return w_mat.astype(jnp.bfloat16), shift.reshape(cout, 1).astype(jnp.float32)

    params = {
        "c1": conv_layer(kc1, 3, 16),
        "c2": conv_layer(kc2, 16, 32),
        "c3": conv_layer(kc3, 32, 64),
    }

    fc1_w = 0.05 * jax.random.normal(kf1, (32, 576), jnp.float32)   # PyTorch (out,in)
    fc1_b = 0.05 * jax.random.normal(kf2, (32,), jnp.float32)
    fnn_w = 0.5 * jax.random.normal(kf3, (4, 2), jnp.float32)
    fnn_b = 0.05 * jax.random.normal(kf4, (4,), jnp.float32)
    fc2_w = 0.2 * jax.random.normal(kf5, (2, 36), jnp.float32)
    fc2_b = 0.05 * jax.random.normal(kf6, (2,), jnp.float32)

    params["fc"] = dict(
        w1t=fc1_w.T,                        # (576, 32)
        b1=fc1_b.reshape(1, 32),
        wdt=fnn_w.T,                        # (2, 4)
        bd=fnn_b.reshape(1, 4),
        w2a=fc2_w[:, :32].T,                # (32, 2)  -> applies to x_left features
        w2b=fc2_w[:, 32:].T,                # (4, 2)   -> applies to demo features
        b2=fc2_b.reshape(1, 2),
    )
    return params


def net_forward(params, x_left_nchw, x_demo):
    b = x_left_nchw.shape[0]
    x = x_left_nchw.astype(jnp.bfloat16)                             # NCHW, bf16
    x = conv_block(x, *params["c1"], 55, 55)                         # (B, 16, 3025)
    x = conv_block(x.reshape(b, 16, 55, 55), *params["c2"], 13, 13)  # (B, 32, 169)
    x = conv_block(x.reshape(b, 32, 13, 13), *params["c3"], 3, 3,
                   out_dtype=jnp.float32)                            # (B, 64, 9)
    # (B, Cout, H*W) row-major == PyTorch NCHW flatten order.
    x_flat = x.reshape(b, 576)
    fc = params["fc"]
    return fc_head(x_flat, x_demo, fc["w1t"], fc["b1"], fc["wdt"], fc["bd"],
                   fc["w2a"], fc["w2b"], fc["b2"])


if __name__ == "__main__":
    key = jax.random.PRNGKey(0)
    kp, kx, kd = jax.random.split(key, 3)
    params = make_params(kp)
    # 224x224 is the input spatial size implied by fc1 = Linear(3*3*64, 32).
    x_left = jax.random.normal(kx, (2, 3, 224, 224), jnp.float32)
    x_demo = jax.random.normal(kd, (2, 2), jnp.float32)

    fwd = jax.jit(net_forward)
    out = jax.block_until_ready(fwd(params, x_left, x_demo))
    assert out.shape == (2, 2) and bool(jnp.all(jnp.isfinite(out)))
    print("KERNEL_OK")
</pallas_src>

<mosaic_0001>
module attributes {stable_mosaic.version = 11 : i64} {
  func.func @conv_bn_relu_pool_kernel(%arg0: i32, %arg1: memref<1x4x27x3025xbf16, #tpu.memory_space<vmem>>, %arg2: memref<16x27xbf16, #tpu.memory_space<vmem>>, %arg3: memref<16x1xf32, #tpu.memory_space<vmem>>, %arg4: memref<1x16x3025xbf16, #tpu.memory_space<vmem>>) attributes {dimension_semantics = [#tpu.dimension_semantics<parallel>], iteration_bounds = array<i64: 2>, scalar_prefetch = 0 : i64, scratch_operands = 0 : i64, tpu.core_type = #tpu.core_type<tc>, window_params = [{transform_indices = @transform_0, window_bounds = array<i64: 1, 4, 27, 3025>}, {pipeline_mode = #tpu.pipeline_mode<synchronous>, transform_indices = @transform_1, window_bounds = array<i64: 16, 27>}, {pipeline_mode = #tpu.pipeline_mode<synchronous>, transform_indices = @transform_2, window_bounds = array<i64: 16, 1>}, {transform_indices = @transform_3, window_bounds = array<i64: 1, 16, 3025>}]} {
    %c0 = arith.constant 0 : index
    %c0_0 = arith.constant 0 : index
    %0 = vector.load %arg2[%c0, %c0_0] : memref<16x27xbf16, #tpu.memory_space<vmem>>, vector<16x27xbf16>
    %c0_1 = arith.constant 0 : index
    %c0_2 = arith.constant 0 : index
    %c0_3 = arith.constant 0 : index
    %c0_4 = arith.constant 0 : index
    %1 = vector.load %arg1[%c0_1, %c0_2, %c0_3, %c0_4] : memref<1x4x27x3025xbf16, #tpu.memory_space<vmem>>, vector<1x1x27x3025xbf16>
    %2 = vector.shape_cast %1 : vector<1x1x27x3025xbf16> to vector<27x3025xbf16>
    %cst = arith.constant dense<0.000000e+00> : vector<16x3025xf32>
    %3 = tpu.matmul %0, %2, %cst {dimension_numbers = #tpu.dot_dimension_numbers<[1], [0], [0], [1], [0, 0, 1, 1], [], []>} : vector<16x27xbf16>, vector<27x3025xbf16>, vector<16x3025xf32> -> vector<16x3025xf32>
    %c0_5 = arith.constant 0 : index
    %c1 = arith.constant 1 : index
    %c0_6 = arith.constant 0 : index
    %c0_7 = arith.constant 0 : index
    %4 = vector.load %arg1[%c0_5, %c1, %c0_6, %c0_7] : memref<1x4x27x3025xbf16, #tpu.memory_space<vmem>>, vector<1x1x27x3025xbf16>
    %5 = vector.shape_cast %4 : vector<1x1x27x3025xbf16> to vector<27x3025xbf16>
    %cst_8 = arith.constant dense<0.000000e+00> : vector<16x3025xf32>
    %6 = tpu.matmul %0, %5, %cst_8 {dimension_numbers = #tpu.dot_dimension_numbers<[1], [0], [0], [1], [0, 0, 1, 1], [], []>} : vector<16x27xbf16>, vector<27x3025xbf16>, vector<16x3025xf32> -> vector<16x3025xf32>
    %7 = arith.maximumf %3, %6 : vector<16x3025xf32>
    %c0_9 = arith.constant 0 : index
    %c2 = arith.constant 2 : index
    %c0_10 = arith.constant 0 : index
    %c0_11 = arith.constant 0 : index
    %8 = vector.load %arg1[%c0_9, %c2, %c0_10, %c0_11] : memref<1x4x27x3025xbf16, #tpu.memory_space<vmem>>, vector<1x1x27x3025xbf16>
    %9 = vector.shape_cast %8 : vector<1x1x27x3025xbf16> to vector<27x3025xbf16>
    %cst_12 = arith.constant dense<0.000000e+00> : vector<16x3025xf32>
    %10 = tpu.matmul %0, %9, %cst_12 {dimension_numbers = #tpu.dot_dimension_numbers<[1], [0], [0], [1], [0, 0, 1, 1], [], []>} : vector<16x27xbf16>, vector<27x3025xbf16>, vector<16x3025xf32> -> vector<16x3025xf32>
    %11 = arith.maximumf %7, %10 : vector<16x3025xf32>
    %c0_13 = arith.constant 0 : index
    %c3 = arith.constant 3 : index
    %c0_14 = arith.constant 0 : index
    %c0_15 = arith.constant 0 : index
    %12 = vector.load %arg1[%c0_13, %c3, %c0_14, %c0_15] : memref<1x4x27x3025xbf16, #tpu.memory_space<vmem>>, vector<1x1x27x3025xbf16>
    %13 = vector.shape_cast %12 : vector<1x1x27x3025xbf16> to vector<27x3025xbf16>
    %cst_16 = arith.constant dense<0.000000e+00> : vector<16x3025xf32>
    %14 = tpu.matmul %0, %13, %cst_16 {dimension_numbers = #tpu.dot_dimension_numbers<[1], [0], [0], [1], [0, 0, 1, 1], [], []>} : vector<16x27xbf16>, vector<27x3025xbf16>, vector<16x3025xf32> -> vector<16x3025xf32>
    %15 = arith.maximumf %11, %14 : vector<16x3025xf32>
    %c0_17 = arith.constant 0 : index
    %c0_18 = arith.constant 0 : index
    %16 = vector.load %arg3[%c0_17, %c0_18] : memref<16x1xf32, #tpu.memory_space<vmem>>, vector<16x1xf32>
    %17 = vector.broadcast %16 : vector<16x1xf32> to vector<16x3025xf32>
    %18 = arith.addf %15, %17 : vector<16x3025xf32>
    %cst_19 = arith.constant 0.000000e+00 : f32
    %19 = vector.broadcast %cst_19 : f32 to vector<16x3025xf32>
    %20 = arith.maximumf %18, %19 : vector<16x3025xf32>
    %21 = arith.truncf %20 : vector<16x3025xf32> to vector<16x3025xbf16>
    %c0_20 = arith.constant 0 : index
    %c0_21 = arith.constant 0 : index
    %c0_22 = arith.constant 0 : index
    %22 = vector.load %arg4[%c0_20, %c0_21, %c0_22] : memref<1x16x3025xbf16, #tpu.memory_space<vmem>>, vector<1x16x3025xbf16>
    %23 = vector.shape_cast %22 : vector<1x16x3025xbf16> to vector<16x3025xbf16>
    %24 = vector.shape_cast %21 : vector<16x3025xbf16> to vector<1x16x3025xbf16>
    tpu.vector_store %arg4[%c0_20, %c0_21, %c0_22], %24 {strides = array<i32>} : memref<1x16x3025xbf16, #tpu.memory_space<vmem>>, vector<1x16x3025xbf16>,
    return
  }
  func.func @transform_0(%arg0: i32) -> (i32, i32, i32, i32) {
    %c0_i32 = arith.constant 0 : i32
    %c0_i32_0 = arith.constant 0 : i32
    %c0_i32_1 = arith.constant 0 : i32
    %c0_i32_2 = arith.constant 0 : i32
    return %arg0, %c0_i32, %c0_i32_0, %c0_i32_1 : i32, i32, i32, i32
  }
  func.func @transform_1(%arg0: i32) -> (i32, i32) {
    %c0_i32 = arith.constant 0 : i32
    %c0_i32_0 = arith.constant 0 : i32
    %c0_i32_1 = arith.constant 0 : i32
    return %c0_i32, %c0_i32_0 : i32, i32
  }
  func.func @transform_2(%arg0: i32) -> (i32, i32) {
    %c0_i32 = arith.constant 0 : i32
    %c0_i32_0 = arith.constant 0 : i32
    %c0_i32_1 = arith.constant 0 : i32
    return %c0_i32, %c0_i32_0 : i32, i32
  }
  func.func @transform_3(%arg0: i32) -> (i32, i32, i32) {
    %c0_i32 = arith.constant 0 : i32
    %c0_i32_0 = arith.constant 0 : i32
    %c0_i32_1 = arith.constant 0 : i32
    return %arg0, %c0_i32, %c0_i32_0 : i32, i32, i32
  }
}

module attributes {stable_mosaic.version = 11 : i64} {
  func.func @conv_bn_relu_pool_kernel(%arg0: i32, %arg1: memref<1x4x144x169xbf16, #tpu.memory_space<vmem>>, %arg2: memref<32x144xbf16, #tpu.memory_space<vmem>>, %arg3: memref<32x1xf32, #tpu.memory_space<vmem>>, %arg4: memref<1x32x169xbf16, #tpu.memory_space<vmem>>) attributes {dimension_semantics = [#tpu.dimension_semantics<parallel>], iteration_bounds = array<i64: 2>, scalar_prefetch = 0 : i64, scratch_operands = 0 : i64, tpu.core_type = #tpu.core_type<tc>, window_params = [{transform_indices = @transform_0, window_bounds = array<i64: 1, 4, 144, 169>}, {pipeline_mode = #tpu.pipeline_mode<synchronous>, transform_indices = @transform_1, window_bounds = array<i64: 32, 144>}, {pipeline_mode = #tpu.pipeline_mode<synchronous>, transform_indices = @transform_2, window_bounds = array<i64: 32, 1>}, {transform_indices = @transform_3, window_bounds = array<i64: 1, 32, 169>}]} {
    %c0 = arith.constant 0 : index
    %c0_0 = arith.constant 0 : index
    %0 = vector.load %arg2[%c0, %c0_0] : memref<32x144xbf16, #tpu.memory_space<vmem>>, vector<32x144xbf16>
    %c0_1 = arith.constant 0 : index
    %c0_2 = arith.constant 0 : index
    %c0_3 = arith.constant 0 : index
    %c0_4 = arith.constant 0 : index
    %1 = vector.load %arg1[%c0_1, %c0_2, %c0_3, %c0_4] : memref<1x4x144x169xbf16, #tpu.memory_space<vmem>>, vector<1x1x144x169xbf16>
    %2 = vector.shape_cast %1 : vector<1x1x144x169xbf16> to vector<144x169xbf16>
    %cst = arith.constant dense<0.000000e+00> : vector<32x169xf32>
    %3 = tpu.matmul %0, %2, %cst {dimension_numbers = #tpu.dot_dimension_numbers<[1], [0], [0], [1], [0, 0, 1, 1], [], []>} : vector<32x144xbf16>, vector<144x169xbf16>, vector<32x169xf32> -> vector<32x169xf32>
    %c0_5 = arith.constant 0 : index
    %c1 = arith.constant 1 : index
    %c0_6 = arith.constant 0 : index
    %c0_7 = arith.constant 0 : index
    %4 = vector.load %arg1[%c0_5, %c1, %c0_6, %c0_7] : memref<1x4x144x169xbf16, #tpu.memory_space<vmem>>, vector<1x1x144x169xbf16>
    %5 = vector.shape_cast %4 : vector<1x1x144x169xbf16> to vector<144x169xbf16>
    %cst_8 = arith.constant dense<0.000000e+00> : vector<32x169xf32>
    %6 = tpu.matmul %0, %5, %cst_8 {dimension_numbers = #tpu.dot_dimension_numbers<[1], [0], [0], [1], [0, 0, 1, 1], [], []>} : vector<32x144xbf16>, vector<144x169xbf16>, vector<32x169xf32> -> vector<32x169xf32>
    %7 = arith.maximumf %3, %6 : vector<32x169xf32>
    %c0_9 = arith.constant 0 : index
    %c2 = arith.constant 2 : index
    %c0_10 = arith.constant 0 : index
    %c0_11 = arith.constant 0 : index
    %8 = vector.load %arg1[%c0_9, %c2, %c0_10, %c0_11] : memref<1x4x144x169xbf16, #tpu.memory_space<vmem>>, vector<1x1x144x169xbf16>
    %9 = vector.shape_cast %8 : vector<1x1x144x169xbf16> to vector<144x169xbf16>
    %cst_12 = arith.constant dense<0.000000e+00> : vector<32x169xf32>
    %10 = tpu.matmul %0, %9, %cst_12 {dimension_numbers = #tpu.dot_dimension_numbers<[1], [0], [0], [1], [0, 0, 1, 1], [], []>} : vector<32x144xbf16>, vector<144x169xbf16>, vector<32x169xf32> -> vector<32x169xf32>
    %11 = arith.maximumf %7, %10 : vector<32x169xf32>
    %c0_13 = arith.constant 0 : index
    %c3 = arith.constant 3 : index
    %c0_14 = arith.constant 0 : index
    %c0_15 = arith.constant 0 : index
    %12 = vector.load %arg1[%c0_13, %c3, %c0_14, %c0_15] : memref<1x4x144x169xbf16, #tpu.memory_space<vmem>>, vector<1x1x144x169xbf16>
    %13 = vector.shape_cast %12 : vector<1x1x144x169xbf16> to vector<144x169xbf16>
    %cst_16 = arith.constant dense<0.000000e+00> : vector<32x169xf32>
    %14 = tpu.matmul %0, %13, %cst_16 {dimension_numbers = #tpu.dot_dimension_numbers<[1], [0], [0], [1], [0, 0, 1, 1], [], []>} : vector<32x144xbf16>, vector<144x169xbf16>, vector<32x169xf32> -> vector<32x169xf32>
    %15 = arith.maximumf %11, %14 : vector<32x169xf32>
    %c0_17 = arith.constant 0 : index
    %c0_18 = arith.constant 0 : index
    %16 = vector.load %arg3[%c0_17, %c0_18] : memref<32x1xf32, #tpu.memory_space<vmem>>, vector<32x1xf32>
    %17 = vector.broadcast %16 : vector<32x1xf32> to vector<32x169xf32>
    %18 = arith.addf %15, %17 : vector<32x169xf32>
    %cst_19 = arith.constant 0.000000e+00 : f32
    %19 = vector.broadcast %cst_19 : f32 to vector<32x169xf32>
    %20 = arith.maximumf %18, %19 : vector<32x169xf32>
    %21 = arith.truncf %20 : vector<32x169xf32> to vector<32x169xbf16>
    %c0_20 = arith.constant 0 : index
    %c0_21 = arith.constant 0 : index
    %c0_22 = arith.constant 0 : index
    %22 = vector.load %arg4[%c0_20, %c0_21, %c0_22] : memref<1x32x169xbf16, #tpu.memory_space<vmem>>, vector<1x32x169xbf16>
    %23 = vector.shape_cast %22 : vector<1x32x169xbf16> to vector<32x169xbf16>
    %24 = vector.shape_cast %21 : vector<32x169xbf16> to vector<1x32x169xbf16>
    tpu.vector_store %arg4[%c0_20, %c0_21, %c0_22], %24 {strides = array<i32>} : memref<1x32x169xbf16, #tpu.memory_space<vmem>>, vector<1x32x169xbf16>,
    return
  }
  func.func @transform_0(%arg0: i32) -> (i32, i32, i32, i32) {
    %c0_i32 = arith.constant 0 : i32
    %c0_i32_0 = arith.constant 0 : i32
    %c0_i32_1 = arith.constant 0 : i32
    %c0_i32_2 = arith.constant 0 : i32
    return %arg0, %c0_i32, %c0_i32_0, %c0_i32_1 : i32, i32, i32, i32
  }
  func.func @transform_1(%arg0: i32) -> (i32, i32) {
    %c0_i32 = arith.constant 0 : i32
    %c0_i32_0 = arith.constant 0 : i32
    %c0_i32_1 = arith.constant 0 : i32
    return %c0_i32, %c0_i32_0 : i32, i32
  }
  func.func @transform_2(%arg0: i32) -> (i32, i32) {
    %c0_i32 = arith.constant 0 : i32
    %c0_i32_0 = arith.constant 0 : i32
    %c0_i32_1 = arith.constant 0 : i32
    return %c0_i32, %c0_i32_0 : i32, i32
  }
  func.func @transform_3(%arg0: i32) -> (i32, i32, i32) {
    %c0_i32 = arith.constant 0 : i32
    %c0_i32_0 = arith.constant 0 : i32
    %c0_i32_1 = arith.constant 0 : i32
    return %arg0, %c0_i32, %c0_i32_0 : i32, i32, i32
  }
}

module attributes {stable_mosaic.version = 11 : i64} {
  func.func @conv_bn_relu_pool_kernel(%arg0: i32, %arg1: memref<1x4x288x9xbf16, #tpu.memory_space<vmem>>, %arg2: memref<64x288xbf16, #tpu.memory_space<vmem>>, %arg3: memref<64x1xf32, #tpu.memory_space<vmem>>, %arg4: memref<1x64x9xf32, #tpu.memory_space<vmem>>) attributes {dimension_semantics = [#tpu.dimension_semantics<parallel>], iteration_bounds = array<i64: 2>, scalar_prefetch = 0 : i64, scratch_operands = 0 : i64, tpu.core_type = #tpu.core_type<tc>, window_params = [{transform_indices = @transform_0, window_bounds = array<i64: 1, 4, 288, 9>}, {pipeline_mode = #tpu.pipeline_mode<synchronous>, transform_indices = @transform_1, window_bounds = array<i64: 64, 288>}, {pipeline_mode = #tpu.pipeline_mode<synchronous>, transform_indices = @transform_2, window_bounds = array<i64: 64, 1>}, {transform_indices = @transform_3, window_bounds = array<i64: 1, 64, 9>}]} {
    %c0 = arith.constant 0 : index
    %c0_0 = arith.constant 0 : index
    %0 = vector.load %arg2[%c0, %c0_0] : memref<64x288xbf16, #tpu.memory_space<vmem>>, vector<64x288xbf16>
    %c0_1 = arith.constant 0 : index
    %c0_2 = arith.constant 0 : index
    %c0_3 = arith.constant 0 : index
    %c0_4 = arith.constant 0 : index
    %1 = vector.load %arg1[%c0_1, %c0_2, %c0_3, %c0_4] : memref<1x4x288x9xbf16, #tpu.memory_space<vmem>>, vector<1x1x288x9xbf16>
    %2 = vector.shape_cast %1 : vector<1x1x288x9xbf16> to vector<288x9xbf16>
    %cst = arith.constant dense<0.000000e+00> : vector<64x9xf32>
    %3 = tpu.matmul %0, %2, %cst {dimension_numbers = #tpu.dot_dimension_numbers<[1], [0], [0], [1], [0, 0, 1, 1], [], []>} : vector<64x288xbf16>, vector<288x9xbf16>, vector<64x9xf32> -> vector<64x9xf32>
    %c0_5 = arith.constant 0 : index
    %c1 = arith.constant 1 : index
    %c0_6 = arith.constant 0 : index
    %c0_7 = arith.constant 0 : index
    %4 = vector.load %arg1[%c0_5, %c1, %c0_6, %c0_7] : memref<1x4x288x9xbf16, #tpu.memory_space<vmem>>, vector<1x1x288x9xbf16>
    %5 = vector.shape_cast %4 : vector<1x1x288x9xbf16> to vector<288x9xbf16>
    %cst_8 = arith.constant dense<0.000000e+00> : vector<64x9xf32>
    %6 = tpu.matmul %0, %5, %cst_8 {dimension_numbers = #tpu.dot_dimension_numbers<[1], [0], [0], [1], [0, 0, 1, 1], [], []>} : vector<64x288xbf16>, vector<288x9xbf16>, vector<64x9xf32> -> vector<64x9xf32>
    %7 = arith.maximumf %3, %6 : vector<64x9xf32>
    %c0_9 = arith.constant 0 : index
    %c2 = arith.constant 2 : index
    %c0_10 = arith.constant 0 : index
    %c0_11 = arith.constant 0 : index
    %8 = vector.load %arg1[%c0_9, %c2, %c0_10, %c0_11] : memref<1x4x288x9xbf16, #tpu.memory_space<vmem>>, vector<1x1x288x9xbf16>
    %9 = vector.shape_cast %8 : vector<1x1x288x9xbf16> to vector<288x9xbf16>
    %cst_12 = arith.constant dense<0.000000e+00> : vector<64x9xf32>
    %10 = tpu.matmul %0, %9, %cst_12 {dimension_numbers = #tpu.dot_dimension_numbers<[1], [0], [0], [1], [0, 0, 1, 1], [], []>} : vector<64x288xbf16>, vector<288x9xbf16>, vector<64x9xf32> -> vector<64x9xf32>
    %11 = arith.maximumf %7, %10 : vector<64x9xf32>
    %c0_13 = arith.constant 0 : index
    %c3 = arith.constant 3 : index
    %c0_14 = arith.constant 0 : index
    %c0_15 = arith.constant 0 : index
    %12 = vector.load %arg1[%c0_13, %c3, %c0_14, %c0_15] : memref<1x4x288x9xbf16, #tpu.memory_space<vmem>>, vector<1x1x288x9xbf16>
    %13 = vector.shape_cast %12 : vector<1x1x288x9xbf16> to vector<288x9xbf16>
    %cst_16 = arith.constant dense<0.000000e+00> : vector<64x9xf32>
    %14 = tpu.matmul %0, %13, %cst_16 {dimension_numbers = #tpu.dot_dimension_numbers<[1], [0], [0], [1], [0, 0, 1, 1], [], []>} : vector<64x288xbf16>, vector<288x9xbf16>, vector<64x9xf32> -> vector<64x9xf32>
    %15 = arith.maximumf %11, %14 : vector<64x9xf32>
    %c0_17 = arith.constant 0 : index
    %c0_18 = arith.constant 0 : index
    %16 = vector.load %arg3[%c0_17, %c0_18] : memref<64x1xf32, #tpu.memory_space<vmem>>, vector<64x1xf32>
    %17 = vector.broadcast %16 : vector<64x1xf32> to vector<64x9xf32>
    %18 = arith.addf %15, %17 : vector<64x9xf32>
    %cst_19 = arith.constant 0.000000e+00 : f32
    %19 = vector.broadcast %cst_19 : f32 to vector<64x9xf32>
    %20 = arith.maximumf %18, %19 : vector<64x9xf32>
    %c0_20 = arith.constant 0 : index
    %c0_21 = arith.constant 0 : index
    %c0_22 = arith.constant 0 : index
    %21 = vector.load %arg4[%c0_20, %c0_21, %c0_22] : memref<1x64x9xf32, #tpu.memory_space<vmem>>, vector<1x64x9xf32>
    %22 = vector.shape_cast %21 : vector<1x64x9xf32> to vector<64x9xf32>
    %23 = vector.shape_cast %20 : vector<64x9xf32> to vector<1x64x9xf32>
    tpu.vector_store %arg4[%c0_20, %c0_21, %c0_22], %23 {strides = array<i32>} : memref<1x64x9xf32, #tpu.memory_space<vmem>>, vector<1x64x9xf32>,
    return
  }
  func.func @transform_0(%arg0: i32) -> (i32, i32, i32, i32) {
    %c0_i32 = arith.constant 0 : i32
    %c0_i32_0 = arith.constant 0 : i32
    %c0_i32_1 = arith.constant 0 : i32
    %c0_i32_2 = arith.constant 0 : i32
    return %arg0, %c0_i32, %c0_i32_0, %c0_i32_1 : i32, i32, i32, i32
  }
  func.func @transform_1(%arg0: i32) -> (i32, i32) {
    %c0_i32 = arith.constant 0 : i32
    %c0_i32_0 = arith.constant 0 : i32
    %c0_i32_1 = arith.constant 0 : i32
    return %c0_i32, %c0_i32_0 : i32, i32
  }
  func.func @transform_2(%arg0: i32) -> (i32, i32) {
    %c0_i32 = arith.constant 0 : i32
    %c0_i32_0 = arith.constant 0 : i32
    %c0_i32_1 = arith.constant 0 : i32
    return %c0_i32, %c0_i32_0 : i32, i32
  }
  func.func @transform_3(%arg0: i32) -> (i32, i32, i32) {
    %c0_i32 = arith.constant 0 : i32
    %c0_i32_0 = arith.constant 0 : i32
    %c0_i32_1 = arith.constant 0 : i32
    return %arg0, %c0_i32, %c0_i32_0 : i32, i32, i32
  }
}

module attributes {stable_mosaic.version = 11 : i64} {
  func.func @head_kernel(%arg0: memref<2x576xf32, #tpu.memory_space<vmem>>, %arg1: memref<2x2xf32, #tpu.memory_space<vmem>>, %arg2: memref<576x32xf32, #tpu.memory_space<vmem>>, %arg3: memref<1x32xf32, #tpu.memory_space<vmem>>, %arg4: memref<2x4xf32, #tpu.memory_space<vmem>>, %arg5: memref<1x4xf32, #tpu.memory_space<vmem>>, %arg6: memref<32x2xf32, #tpu.memory_space<vmem>>, %arg7: memref<4x2xf32, #tpu.memory_space<vmem>>, %arg8: memref<1x2xf32, #tpu.memory_space<vmem>>, %arg9: memref<2x2xf32, #tpu.memory_space<vmem>>) attributes {dimension_semantics = [], scalar_prefetch = 0 : i64, scratch_operands = 0 : i64, tpu.core_type = #tpu.core_type<tc>} {
    %c0 = arith.constant 0 : index
    %c0_0 = arith.constant 0 : index
    %0 = vector.load %arg0[%c0, %c0_0] : memref<2x576xf32, #tpu.memory_space<vmem>>, vector<2x576xf32>
    %c0_1 = arith.constant 0 : index
    %c0_2 = arith.constant 0 : index
    %1 = vector.load %arg2[%c0_1, %c0_2] : memref<576x32xf32, #tpu.memory_space<vmem>>, vector<576x32xf32>
    %cst = arith.constant dense<0.000000e+00> : vector<2x32xf32>
    %2 = tpu.matmul %0, %1, %cst {dimension_numbers = #tpu.dot_dimension_numbers<[1], [0], [0], [1], [0, 0, 1, 1], [], []>} : vector<2x576xf32>, vector<576x32xf32>, vector<2x32xf32> -> vector<2x32xf32>
    %c0_3 = arith.constant 0 : index
    %c0_4 = arith.constant 0 : index
    %3 = vector.load %arg3[%c0_3, %c0_4] : memref<1x32xf32, #tpu.memory_space<vmem>>, vector<1x32xf32>
    %4 = vector.broadcast %3 : vector<1x32xf32> to vector<2x32xf32>
    %5 = arith.addf %2, %4 : vector<2x32xf32>
    %cst_5 = arith.constant 0.000000e+00 : f32
    %6 = vector.broadcast %cst_5 : f32 to vector<2x32xf32>
    %7 = arith.maximumf %5, %6 : vector<2x32xf32>
    %c0_6 = arith.constant 0 : index
    %c0_7 = arith.constant 0 : index
    %8 = vector.load %arg1[%c0_6, %c0_7] : memref<2x2xf32, #tpu.memory_space<vmem>>, vector<2x2xf32>
    %c0_8 = arith.constant 0 : index
    %c0_9 = arith.constant 0 : index
    %9 = vector.load %arg4[%c0_8, %c0_9] : memref<2x4xf32, #tpu.memory_space<vmem>>, vector<2x4xf32>
    %cst_10 = arith.constant dense<0.000000e+00> : vector<2x4xf32>
    %10 = tpu.matmul %8, %9, %cst_10 {dimension_numbers = #tpu.dot_dimension_numbers<[1], [0], [0], [1], [0, 0, 1, 1], [], []>} : vector<2x2xf32>, vector<2x4xf32>, vector<2x4xf32> -> vector<2x4xf32>
    %c0_11 = arith.constant 0 : index
    %c0_12 = arith.constant 0 : index
    %11 = vector.load %arg5[%c0_11, %c0_12] : memref<1x4xf32, #tpu.memory_space<vmem>>, vector<1x4xf32>
    %12 = vector.broadcast %11 : vector<1x4xf32> to vector<2x4xf32>
    %13 = arith.addf %10, %12 : vector<2x4xf32>
    %cst_13 = arith.constant 0.000000e+00 : f32
    %14 = vector.broadcast %cst_13 : f32 to vector<2x4xf32>
    %15 = arith.maximumf %13, %14 : vector<2x4xf32>
    %c0_14 = arith.constant 0 : index
    %c0_15 = arith.constant 0 : index
    %16 = vector.load %arg6[%c0_14, %c0_15] : memref<32x2xf32, #tpu.memory_space<vmem>>, vector<32x2xf32>
    %cst_16 = arith.constant dense<0.000000e+00> : vector<2x2xf32>
    %17 = tpu.matmul %7, %16, %cst_16 {dimension_numbers = #tpu.dot_dimension_numbers<[1], [0], [0], [1], [0, 0, 1, 1], [], []>} : vector<2x32xf32>, vector<32x2xf32>, vector<2x2xf32> -> vector<2x2xf32>
    %c0_17 = arith.constant 0 : index
    %c0_18 = arith.constant 0 : index
    %18 = vector.load %arg7[%c0_17, %c0_18] : memref<4x2xf32, #tpu.memory_space<vmem>>, vector<4x2xf32>
    %cst_19 = arith.constant dense<0.000000e+00> : vector<2x2xf32>
    %19 = tpu.matmul %15, %18, %cst_19 {dimension_numbers = #tpu.dot_dimension_numbers<[1], [0], [0], [1], [0, 0, 1, 1], [], []>} : vector<2x4xf32>, vector<4x2xf32>, vector<2x2xf32> -> vector<2x2xf32>
    %20 = arith.addf %17, %19 : vector<2x2xf32>
    %c0_20 = arith.constant 0 : index
    %c0_21 = arith.constant 0 : index
    %21 = vector.load %arg8[%c0_20, %c0_21] : memref<1x2xf32, #tpu.memory_space<vmem>>, vector<1x2xf32>
    %22 = vector.broadcast %21 : vector<1x2xf32> to vector<2x2xf32>
    %23 = arith.addf %20, %22 : vector<2x2xf32>
    %c0_22 = arith.constant 0 : index
    %c0_23 = arith.constant 0 : index
    %24 = vector.load %arg9[%c0_22, %c0_23] : memref<2x2xf32, #tpu.memory_space<vmem>>, vector<2x2xf32>
    tpu.vector_store %arg9[%c0_22, %c0_23], %23 {strides = array<i32>} : memref<2x2xf32, #tpu.memory_space<vmem>>, vector<2x2xf32>,
    return
  }
}

</mosaic_0001>

<bundles_post_ra>
// kernel: net_forward.4
= control target key start
LH: loop header
LB: loop body
LE: loop exit
PB: predicated region body
PF: predicated region fallthrough
CT: control target
= control target key end

     0   :  { %s4563_s12 = smov 0   ;;  %s5711_s0 = inlined_call_operand.vmem [shape: bf16[2,4,27,3025], index: 0, kind: input, shape index: {}]   ;;  %s5712_s1 = inlined_call_operand.vmem [shape: bf16[16,27], index: 1, kind: input, shape index: {}]   ;;  %s5713_s2 = inlined_call_operand.vmem [shape: f32[16,1], index: 2, kind: input, shape index: {}]   ;;  %s5714_s3 = inlined_call_operand.vmem [shape: bf16[2,16,3025], index: 3, kind: output, shape index: {}]  }
   0x1 LB: > { %s4076_s13 = sadd.s32 4294967295, %s4539_s12   ;;  %p4080_p0 = scmp.ge.s32.totalorder %s4539_s12, 1  ;;  %s4539_s12 = sphi %s4563_s12, %s13_s12  }
   0x2   : > { %p137_p1 = scmp.lt.s32.totalorder %s4539_s12, 3 }
   0x4   : > { %p138_p2 = pnand %p4080_p0, %p137_p1 }
   0x6   : > { %141 = sbr.rel (%p138_p2) target bundleno = 433 (0x1b1), region = 32 }
   0xb   : > { %p161_p3 = scmp.lt.s32.totalorder %s4076_s13, 1  ;;  %vm447_vm0 = vcmask 1044480   ;;  %v4541_v0 = vmov 0   ;;  %vm448_vm1 = vcmask 1045504   ;;  %v4542_v1 = vmov 65535   ;;  %v4603_v31 = vld [vmem:[%s5712_s1] sm:$0xff]  }
   0xc   : > { %555 = vmatprep.mubr.bf16.mxu0 %v4541_v0  ;;  %598 = vmatprep.mubr.bf16.mxu1 %v4541_v0  ;;  %v449_v2 = vsel %vm447_vm0, 4294967295, %v4542_v1  ;;  %vm443_vm2 = vcmask 220160   ;;  %vm4005_vm3 = vcmask 1043456   ;;  %vm4006_vm4 = vcmask 662532  }
   0xd   : > { %s6009_s13 = smov (!%p161_p3, %s4076_s13), 1  ;;  %4530 = vset.pattern.permute.xlu0 %v4541_v0  ;;  %v4584_v5 = vsel %vm448_vm1, %v449_v2, 0  ;;  %vm4007_vm5 = vmor %vm4006_vm4, %vm4005_vm3 }
   0xe   : > { %s4518_s14 = smul.u32 1536, %s6009_s13 }
   0xf   : > { %s4519_s26 = smul.u32 192, %s6009_s13 }
  0x10   : > { %s4580_s17 = scalar_lea.vmem %s5711_s0, %s4518_s14 }
  0x11   : > { %v198_v3 = vld [vmem:[%s4580_s17 + $0xc0] sm:$0xff]  ;;  %v199_v6 = vld [vmem:[%s4580_s17 + $0xc8] sm:$0xff]  ;;  %v200_v16 = vld [vmem:[%s4580_s17 + $0xd0] sm:$0xff]  ;;  %s5501_s29 = scalar_lea.vmem %s5714_s3, %s4519_s26 }
  0x12   : > { %v210_v4 = vld [vmem:[%s4580_s17 + $0x120] sm:$0x33]  ;;  %v211_v8 = vld [vmem:[%s4580_s17 + $0x128] sm:$0x33]  ;;  %v212_v20 = vld [vmem:[%s4580_s17 + $0x130] sm:$0x33] }
  0x13   : > { %v4109_v7 = vcombine.high %v198_v3, %v210_v4  ;;  %v4108_v9 = vcombine.low %v198_v3, %v210_v4  ;;  %v174_v10 = vld [vmem:[%s4580_s17] sm:$0xff]  ;;  %v4111_v12 = vcombine.high %v199_v6, %v211_v8  ;;  %v4110_v13 = vcombine.low %v199_v6, %v211_v8  ;;  %v175_v14 = vld [vmem:[%s4580_s17 + $0x8] sm:$0xff]  ;;  %v201_v21 = vld [vmem:[%s4580_s17 + $0xd8] sm:$0xff] }
  0x14   : > { %v186_v11 = vld [vmem:[%s4580_s17 + $0x60] sm:$0xff]  ;;  %v187_v15 = vld [vmem:[%s4580_s17 + $0x68] sm:$0xff]  ;;  %v213_v22 = vld [vmem:[%s4580_s17 + $0x138] sm:$0x33]  ;;  %v4113_v26 = vcombine.high %v200_v16, %v212_v20  ;;  %v4112_v29 = vcombine.low %v200_v16, %v212_v20 }
  0x15   : > { %v455_v17 = vand.u32 %v4109_v7, %v4584_v5  ;;  %v452_v18 = vand.u32 %v4108_v9, %v4584_v5  ;;  %v4085_v19 = vcombine.high %v174_v10, %v186_v11  ;;  %v461_v23 = vand.u32 %v4111_v12, %v4584_v5  ;;  %v176_v34 = vld [vmem:[%s4580_s17 + $0x10] sm:$0xff]  ;;  %v177_v37 = vld [vmem:[%s4580_s17 + $0x18] sm:$0xff]  ;;  %v202_v38 = vld [vmem:[%s4580_s17 + $0xe0] sm:$0xff] }
  0x16   : > { %v458_v24 = vand.u32 %v4110_v13, %v4584_v5  ;;  %v4087_v25 = vcombine.high %v175_v14, %v187_v15  ;;  %v4115_v27 = vcombine.high %v201_v21, %v213_v22  ;;  %v4084_v28 = vcombine.low %v174_v10, %v186_v11  ;;  %v188_v35 = vld [vmem:[%s4580_s17 + $0x70] sm:$0xff]  ;;  %v214_v39 = vld [vmem:[%s4580_s17 + $0x140] sm:$0x33]  ;;  %v189_v40 = vld [vmem:[%s4580_s17 + $0x78] sm:$0xff] }
  0x17   : > { %535 = vmatprep.subr.bf16.mxu0 %v455_v17  ;;  %578 = vmatprep.subr.bf16.mxu1 %v461_v23  ;;  %v4086_v30 = vcombine.low %v175_v14, %v187_v15  ;;  %v467_v32 = vand.u32 %v4113_v26, %v4584_v5  ;;  %v4114_v33 = vcombine.low %v201_v21, %v213_v22  ;;  %v203_v41 = vld [vmem:[%s4580_s17 + $0xe8] sm:$0xff]  ;;  %v178_v54 = vld [vmem:[%s4580_s17 + $0x20] sm:$0xff]  ;;  %v204_v58 = vld [vmem:[%s4580_s17 + $0xf0] sm:$0xff] }
  0x18   : > { %536 = vmatpush1.bf16.msra.mxu0 %v452_v18  ;;  %579 = vmatpush1.bf16.msra.mxu1 %v458_v24  ;;  %v473_v36 = vand.u32 %v4115_v27, %v4584_v5  ;;  %v215_v42 = vld [vmem:[%s4580_s17 + $0x148] sm:$0x33]  ;;  %v464_v43 = vand.u32 %v4112_v29, %v4584_v5  ;;  %v4089_v45 = vcombine.high %v176_v34, %v188_v35  ;;  %v190_v55 = vld [vmem:[%s4580_s17 + $0x80] sm:$0xff]  ;;  %v216_v59 = vld [vmem:[%s4580_s17 + $0x150] sm:$0x33] }
  0x19   : > { %537 = vmatprep.subr.bf16.mxu0 %v4085_v19  ;;  %580 = vmatprep.subr.bf16.mxu1 %v4087_v25  ;;  %v470_v44 = vand.u32 %v4114_v33, %v4584_v5  ;;  %v4117_v46 = vcombine.high %v202_v38, %v214_v39  ;;  %v4091_v47 = vcombine.high %v177_v37, %v189_v40  ;;  %v179_v57 = vld [vmem:[%s4580_s17 + $0x28] sm:$0xff]  ;;  %v205_v61 = vld [vmem:[%s4580_s17 + $0xf8] sm:$0xff]  ;;  %v180_v12 = vld [vmem:[%s4580_s17 + $0x30] sm:$0xff] }
  0x1a   : > { %v4119_v48 = vcombine.high %v203_v41, %v215_v42  ;;  %v4088_v49 = vcombine.low %v176_v34, %v188_v35  ;;  %v4116_v50 = vcombine.low %v202_v38, %v214_v39  ;;  %v4090_v51 = vcombine.low %v177_v37, %v189_v40  ;;  %v191_v60 = vld [vmem:[%s4580_s17 + $0x88] sm:$0xff]  ;;  %v217_v62 = vld [vmem:[%s4580_s17 + $0x158] sm:$0x33]  ;;  %v192_v13 = vld [vmem:[%s4580_s17 + $0x90] sm:$0xff] }
  0x1b   : > { %v479_v52 = vand.u32 %v4117_v46, %v4584_v5  ;;  %v4118_v53 = vcombine.low %v203_v41, %v215_v42  ;;  %v4093_v2 = vcombine.high %v178_v54, %v190_v55  ;;  %v4121_v3 = vcombine.high %v204_v58, %v216_v59  ;;  %v181_v15 = vld [vmem:[%s4580_s17 + $0x38] sm:$0xff]  ;;  %v206_v16 = vld [vmem:[%s4580_s17 + $0x100] sm:$0xff]  ;;  %v207_v19 = vld [vmem:[%s4580_s17 + $0x108] sm:$0xff] }
  0x1c   : > { %538 = vmatpush1.bf16.msra.mxu0 %v4084_v28  ;;  %581 = vmatpush1.bf16.msra.mxu1 %v4086_v30  ;;  %v485_v56 = vand.u32 %v4119_v48, %v4584_v5  ;;  %v476_v63 = vand.u32 %v4116_v50, %v4584_v5  ;;  %v4095_v4 = vcombine.high %v179_v57, %v191_v60  ;;  %v218_v17 = vld [vmem:[%s4580_s17 + $0x160] sm:$0x33]  ;;  %v193_v18 = vld [vmem:[%s4580_s17 + $0x98] sm:$0xff]  ;;  %v219_v20 = vld [vmem:[%s4580_s17 + $0x168] sm:$0x33] }
  0x1d   : > { %621 = vmatprep.subr.bf16.mxu0 %v467_v32  ;;  %664 = vmatprep.subr.bf16.mxu1 %v473_v36  ;;  %v482_v1 = vand.u32 %v4118_v53, %v4584_v5  ;;  %v4123_v6 = vcombine.high %v205_v61, %v217_v62  ;;  %v4092_v7 = vcombine.low %v178_v54, %v190_v55  ;;  %v182_v33 = vld [vmem:[%s4580_s17 + $0x40] sm:$0xff]  ;;  %v183_v36 = vld [vmem:[%s4580_s17 + $0x48] sm:$0xff]  ;;  %v208_v37 = vld [vmem:[%s4580_s17 + $0x110] sm:$0xff] }
  0x1e   : > { %v4120_v8 = vcombine.low %v204_v58, %v216_v59  ;;  %v4094_v9 = vcombine.low %v179_v57, %v191_v60  ;;  %v491_v10 = vand.u32 %v4121_v3, %v4584_v5  ;;  %v4122_v11 = vcombine.low %v205_v61, %v217_v62  ;;  %v194_v34 = vld [vmem:[%s4580_s17 + $0xa0] sm:$0xff]  ;;  %v220_v38 = vld [vmem:[%s4580_s17 + $0x170] sm:$0x33]  ;;  %v195_v39 = vld [vmem:[%s4580_s17 + $0xa8] sm:$0xff] }
  0x1f   : > { %4132 = vmatmul.mubr.msk.bf16.vlgmr.msra.gmra.mxu0 %vm443_vm2, %v4603_v31  ;;  %4133 = vmatmul.mubr.msk.bf16.vlgmr.msra.gmra.mxu1 %vm443_vm2, %v4603_v31  ;;  %v497_v14 = vand.u32 %v4123_v6, %v4584_v5  ;;  %v4097_v23 = vcombine.high %v180_v12, %v192_v13  ;;  %v4125_v24 = vcombine.high %v206_v16, %v218_v17  ;;  %v209_v40 = vld [vmem:[%s4580_s17 + $0x118] sm:$0xff]  ;;  %v184_v53 = vld [vmem:[%s4580_s17 + $0x50] sm:$0xff]  ;;  %v4168_v57 = vld [vmem:[%s4580_s17 + $0x240] sm:$0xff] }
  0x20   : > { %622 = vmatpush1.bf16.msra.mxu0 %v464_v43  ;;  %665 = vmatpush1.bf16.msra.mxu1 %v470_v44  ;;  %v488_v21 = vand.u32 %v4120_v8, %v4584_v5  ;;  %v494_v22 = vand.u32 %v4122_v11, %v4584_v5  ;;  %v4099_v25 = vcombine.high %v181_v15, %v193_v18  ;;  %v221_v41 = vld [vmem:[%s4580_s17 + $0x178] sm:$0x33]  ;;  %v196_v54 = vld [vmem:[%s4580_s17 + $0xb0] sm:$0xff]  ;;  %v4180_v58 = vld [vmem:[%s4580_s17 + $0x2a0] sm:$0x33] }
  0x21   : > { %623 = vmatprep.subr.bf16.mxu0 %v4089_v45  ;;  %666 = vmatprep.subr.bf16.mxu1 %v4091_v47  ;;  %v4127_v26 = vcombine.high %v207_v19, %v219_v20  ;;  %v4096_v27 = vcombine.low %v180_v12, %v192_v13  ;;  %v4124_v28 = vcombine.low %v206_v16, %v218_v17  ;;  %v197_v59 = vld [vmem:[%s4580_s17 + $0xb8] sm:$0xff]  ;;  %v4169_v60 = vld [vmem:[%s4580_s17 + $0x248] sm:$0xff]  ;;  %v4144_v11 = vld [vmem:[%s4580_s17 + $0x180] sm:$0xff] }
  0x22   : > { %641 = vmatprep.mubr.bf16.mxu0 %v4541_v0  ;;  %684 = vmatprep.mubr.bf16.mxu1 %v4541_v0  ;;  %v4098_v29 = vcombine.low %v181_v15, %v193_v18  ;;  %v503_v30 = vand.u32 %v4125_v24, %v4584_v5  ;;  %v4126_v32 = vcombine.low %v207_v19, %v219_v20  ;;  %v4181_v61 = vld [vmem:[%s4580_s17 + $0x2a8] sm:$0x33]  ;;  %v4156_v12 = vld [vmem:[%s4580_s17 + $0x1e0] sm:$0xff]  ;;  %v4170_v15 = vld [vmem:[%s4580_s17 + $0x250] sm:$0xff] }
  0x23   : > { %v509_v35 = vand.u32 %v4127_v26, %v4584_v5  ;;  %v500_v42 = vand.u32 %v4124_v28, %v4584_v5  ;;  %v4101_v44 = vcombine.high %v182_v33, %v194_v34  ;;  %v4129_v45 = vcombine.high %v208_v37, %v220_v38  ;;  %v4182_v16 = vld [vmem:[%s4580_s17 + $0x2b0] sm:$0x33]  ;;  %v4157_v17 = vld [vmem:[%s4580_s17 + $0x1e8] sm:$0xff]  ;;  %v4171_v18 = vld [vmem:[%s4580_s17 + $0x258] sm:$0xff] }
  0x24   : > { %624 = vmatpush1.bf16.msra.mxu0 %v4088_v49  ;;  %667 = vmatpush1.bf16.msra.mxu1 %v4090_v51  ;;  %v506_v43 = vand.u32 %v4126_v32, %v4584_v5  ;;  %v4103_v46 = vcombine.high %v183_v36, %v195_v39  ;;  %v4131_v47 = vcombine.high %v209_v40, %v221_v41  ;;  %v4183_v19 = vld [vmem:[%s4580_s17 + $0x2b8] sm:$0x33]  ;;  %v4146_v32 = vld [vmem:[%s4580_s17 + $0x190] sm:$0xff] }
  0x25   : > { %707 = vmatprep.subr.bf16.mxu0 %v479_v52  ;;  %750 = vmatprep.subr.bf16.mxu1 %v485_v56  ;;  %v4100_v48 = vcombine.low %v182_v33, %v194_v34  ;;  %v4128_v49 = vcombine.low %v208_v37, %v220_v38  ;;  %v4102_v50 = vcombine.low %v183_v36, %v195_v39  ;;  %v185_v56 = vld [vmem:[%s4580_s17 + $0x58] sm:$0xff]  ;;  %v4158_v33 = vld [vmem:[%s4580_s17 + $0x1f0] sm:$0xff]  ;;  %v4172_v36 = vld [vmem:[%s4580_s17 + $0x260] sm:$0xff] }
  0x26   : > { %v515_v51 = vand.u32 %v4129_v45, %v4584_v5  ;;  %v4130_v52 = vcombine.low %v209_v40, %v221_v41  ;;  %v521_v55 = vand.u32 %v4131_v47, %v4584_v5  ;;  %v4107_v3 = vcombine.high %v185_v56, %v197_v59  ;;  %v4184_v37 = vld [vmem:[%s4580_s17 + $0x2c0] sm:$0x33]  ;;  %v4159_v38 = vld [vmem:[%s4580_s17 + $0x1f8] sm:$0xff]  ;;  %v4173_v39 = vld [vmem:[%s4580_s17 + $0x268] sm:$0xff] }
  0x27   : > { %4134 = vmatmul.mubr.msk.bf16.vlgmr.msra.gmra.mxu0 %vm443_vm2, %v4603_v31  ;;  %4135 = vmatmul.mubr.msk.bf16.vlgmr.msra.gmra.mxu1 %vm443_vm2, %v4603_v31  ;;  %v512_v62 = vand.u32 %v4128_v49, %v4584_v5  ;;  %v4104_v6 = vcombine.low %v184_v53, %v196_v54  ;;  %v4106_v8 = vcombine.low %v185_v56, %v197_v59  ;;  %v4185_v40 = vld [vmem:[%s4580_s17 + $0x2c8] sm:$0x33]  ;;  %v4174_v56 = vld [vmem:[%s4580_s17 + $0x270] sm:$0xff]  ;;  %v4175_v59 = vld [vmem:[%s4580_s17 + $0x278] sm:$0xff] }
  0x28   : > { %708 = vmatpush1.bf16.msra.mxu0 %v476_v63  ;;  %751 = vmatpush1.bf16.msra.mxu1 %v482_v1  ;;  %v518_v63 = vand.u32 %v4130_v52, %v4584_v5  ;;  %v4105_v1 = vcombine.high %v184_v53, %v196_v54  ;;  %v4192_v26 = vcombine.low %v4144_v11, %v4156_v12  ;;  %v4148_v52 = vld [vmem:[%s4580_s17 + $0x1a0] sm:$0xff] }
  0x29   : > { %709 = vmatprep.subr.bf16.mxu0 %v4093_v2  ;;  %752 = vmatprep.subr.bf16.mxu1 %v4095_v4  ;;  %v4217_v2 = vcombine.high %v4168_v57, %v4180_v58  ;;  %v4219_v4 = vcombine.high %v4169_v60, %v4181_v61  ;;  %v4196_v47 = vcombine.low %v4146_v32, %v4158_v33  ;;  %v4160_v53 = vld [vmem:[%s4580_s17 + $0x200] sm:$0xff] }
  0x2a   : > { %727 = vmatprep.mubr.bf16.mxu0 %v4541_v0  ;;  %770 = vmatprep.mubr.bf16.mxu1 %v4541_v0 }
  0x2b   : > { %v1314_v13 = vand.u32 %v4219_v4, %v4584_v5  ;;  %v4200_v4 = vcombine.low %v4148_v52, %v4160_v53 }
  0x2c   : > { %710 = vmatpush1.bf16.msra.mxu0 %v4092_v7  ;;  %753 = vmatpush1.bf16.msra.mxu1 %v4094_v9  ;;  %v4216_v7 = vcombine.low %v4168_v57, %v4180_v58  ;;  %v1308_v9 = vand.u32 %v4217_v2, %v4584_v5  ;;  %v4186_v57 = vld [vmem:[%s4580_s17 + $0x2d0] sm:$0x33]  ;;  %v4161_v58 = vld [vmem:[%s4580_s17 + $0x208] sm:$0xff] }
  0x2d   : > { %793 = vmatprep.subr.bf16.mxu0 %v491_v10  ;;  %836 = vmatprep.subr.bf16.mxu1 %v497_v14  ;;  %v4218_v10 = vcombine.low %v4169_v60, %v4181_v61  ;;  %v4145_v14 = vld [vmem:[%s4580_s17 + $0x188] sm:$0xff]  ;;  %v4187_v60 = vld [vmem:[%s4580_s17 + $0x2d8] sm:$0x33] }
  0x2e   : > { %v1305_v20 = vand.u32 %v4216_v7, %v4584_v5  ;;  %v4195_v24 = vcombine.high %v4145_v14, %v4157_v17  ;;  %v4194_v28 = vcombine.low %v4145_v14, %v4157_v17  ;;  %v4176_v14 = vld [vmem:[%s4580_s17 + $0x280] sm:$0xff]  ;;  %v4177_v17 = vld [vmem:[%s4580_s17 + $0x288] sm:$0xff] }
  0x2f   : > { %4136 = vmatmul.mubr.msk.bf16.vlgmr.msra.gmra.mxu0 %vm443_vm2, %v4603_v31  ;;  %4137 = vmatmul.mubr.msk.bf16.vlgmr.msra.gmra.mxu1 %vm443_vm2, %v4603_v31 }
  0x30   : > { %794 = vmatpush1.bf16.msra.mxu0 %v488_v21  ;;  %837 = vmatpush1.bf16.msra.mxu1 %v494_v22  ;;  %v1311_v21 = vand.u32 %v4218_v10, %v4584_v5  ;;  %v4193_v22 = vcombine.high %v4144_v11, %v4156_v12  ;;  %v4150_v10 = vld [vmem:[%s4580_s17 + $0x1b0] sm:$0xff] }
  0x31   : > { %795 = vmatprep.subr.bf16.mxu0 %v4097_v23  ;;  %838 = vmatprep.subr.bf16.mxu1 %v4099_v25  ;;  %v4221_v23 = vcombine.high %v4170_v15, %v4182_v16  ;;  %v4223_v25 = vcombine.high %v4171_v18, %v4183_v19  ;;  %v4162_v11 = vld [vmem:[%s4580_s17 + $0x210] sm:$0xff] }
  0x32   : > { %813 = vmatprep.mubr.bf16.mxu0 %v4541_v0  ;;  %856 = vmatprep.mubr.bf16.mxu1 %v4541_v0 }
  0x33   : > { %v1326_v34 = vand.u32 %v4223_v25, %v4584_v5  ;;  %v4204_v25 = vcombine.low %v4150_v10, %v4162_v11 }
  0x34   : > { %796 = vmatpush1.bf16.msra.mxu0 %v4096_v27  ;;  %839 = vmatpush1.bf16.msra.mxu1 %v4098_v29  ;;  %v4220_v27 = vcombine.low %v4170_v15, %v4182_v16  ;;  %v1320_v29 = vand.u32 %v4221_v23, %v4584_v5  ;;  %v4188_v15 = vld [vmem:[%s4580_s17 + $0x2e0] sm:$0x33]  ;;  %v4163_v16 = vld [vmem:[%s4580_s17 + $0x218] sm:$0xff] }
  0x35   : > { %879 = vmatprep.subr.bf16.mxu0 %v503_v30  ;;  %922 = vmatprep.subr.bf16.mxu1 %v509_v35  ;;  %v4222_v30 = vcombine.low %v4171_v18, %v4183_v19  ;;  %v4147_v35 = vld [vmem:[%s4580_s17 + $0x198] sm:$0xff]  ;;  %v4189_v18 = vld [vmem:[%s4580_s17 + $0x2e8] sm:$0x33] }
  0x36   : > { %v1317_v41 = vand.u32 %v4220_v27, %v4584_v5  ;;  %v4199_v45 = vcombine.high %v4147_v35, %v4159_v38  ;;  %v4198_v49 = vcombine.low %v4147_v35, %v4159_v38  ;;  %v4178_v35 = vld [vmem:[%s4580_s17 + $0x290] sm:$0xff]  ;;  %v4179_v38 = vld [vmem:[%s4580_s17 + $0x298] sm:$0xff] }
  0x37   : > { %4138 = vmatmul.mubr.msk.bf16.vlgmr.msra.gmra.mxu0 %vm443_vm2, %v4603_v31  ;;  %4139 = vmatmul.mubr.msk.bf16.vlgmr.msra.gmra.mxu1 %vm443_vm2, %v4603_v31 }
  0x38   : > { %880 = vmatpush1.bf16.msra.mxu0 %v500_v42  ;;  %923 = vmatpush1.bf16.msra.mxu1 %v506_v43  ;;  %v1323_v42 = vand.u32 %v4222_v30, %v4584_v5  ;;  %v4197_v43 = vcombine.high %v4146_v32, %v4158_v33  ;;  %v4152_v30 = vld [vmem:[%s4580_s17 + $0x1c0] sm:$0xff] }
  0x39   : > { %881 = vmatprep.subr.bf16.mxu0 %v4101_v44  ;;  %924 = vmatprep.subr.bf16.mxu1 %v4103_v46  ;;  %v4225_v44 = vcombine.high %v4172_v36, %v4184_v37  ;;  %v4227_v46 = vcombine.high %v4173_v39, %v4185_v40  ;;  %v4164_v32 = vld [vmem:[%s4580_s17 + $0x220] sm:$0xff] }
  0x3a   : > { %899 = vmatprep.mubr.bf16.mxu0 %v4541_v0  ;;  %942 = vmatprep.mubr.bf16.mxu1 %v4541_v0 }
  0x3b   : > { %v1338_v54 = vand.u32 %v4227_v46, %v4584_v5  ;;  %v4208_v46 = vcombine.low %v4152_v30, %v4164_v32 }
  0x3c   : > { %882 = vmatpush1.bf16.msra.mxu0 %v4100_v48  ;;  %925 = vmatpush1.bf16.msra.mxu1 %v4102_v50  ;;  %v4224_v48 = vcombine.low %v4172_v36, %v4184_v37  ;;  %v1332_v50 = vand.u32 %v4225_v44, %v4584_v5  ;;  %v4190_v36 = vld [vmem:[%s4580_s17 + $0x2f0] sm:$0x33]  ;;  %v4165_v37 = vld [vmem:[%s4580_s17 + $0x228] sm:$0xff] }
  0x3d   : > { %965 = vmatprep.subr.bf16.mxu0 %v515_v51  ;;  %1008 = vmatprep.subr.bf16.mxu1 %v521_v55  ;;  %v4226_v51 = vcombine.low %v4173_v39, %v4185_v40  ;;  %v4149_v55 = vld [vmem:[%s4580_s17 + $0x1a8] sm:$0xff]  ;;  %v4191_v39 = vld [vmem:[%s4580_s17 + $0x2f8] sm:$0x33] }
  0x3e   : > { %v1329_v61 = vand.u32 %v4224_v48, %v4584_v5  ;;  %v4203_v2 = vcombine.high %v4149_v55, %v4161_v58  ;;  %v4202_v7 = vcombine.low %v4149_v55, %v4161_v58  ;;  %v4276_v55 = vld [vmem:[%s4580_s17 + $0x3c0] sm:$0xff]  ;;  %v4277_v58 = vld [vmem:[%s4580_s17 + $0x3c8] sm:$0xff] }
  0x3f   : > { %4140 = vmatmul.mubr.msk.bf16.vlgmr.msra.gmra.mxu0 %vm443_vm2, %v4603_v31  ;;  %4141 = vmatmul.mubr.msk.bf16.vlgmr.msra.gmra.mxu1 %vm443_vm2, %v4603_v31 }
  0x40   : > { %966 = vmatpush1.bf16.msra.mxu0 %v512_v62  ;;  %1009 = vmatpush1.bf16.msra.mxu1 %v518_v63  ;;  %v1335_v62 = vand.u32 %v4226_v51, %v4584_v5  ;;  %v4201_v63 = vcombine.high %v4148_v52, %v4160_v53  ;;  %v4154_v51 = vld [vmem:[%s4580_s17 + $0x1d0] sm:$0xff] }
  0x41   : > { %967 = vmatprep.subr.bf16.mxu0 %v4105_v1  ;;  %1010 = vmatprep.subr.bf16.mxu1 %v4107_v3  ;;  %v4229_v1 = vcombine.high %v4174_v56, %v4186_v57  ;;  %v4231_v3 = vcombine.high %v4175_v59, %v4187_v60  ;;  %v4166_v52 = vld [vmem:[%s4580_s17 + $0x230] sm:$0xff] }
  0x42   : > { %985 = vmatprep.mubr.bf16.mxu0 %v4541_v0  ;;  %1028 = vmatprep.mubr.bf16.mxu1 %v4541_v0 }
  0x43   : > { %v1350_v12 = vand.u32 %v4231_v3, %v4584_v5  ;;  %v4212_v3 = vcombine.low %v4154_v51, %v4166_v52 }
  0x44   : > { %968 = vmatpush1.bf16.msra.mxu0 %v4104_v6  ;;  %1011 = vmatpush1.bf16.msra.mxu1 %v4106_v8  ;;  %v4228_v6 = vcombine.low %v4174_v56, %v4186_v57  ;;  %v1344_v8 = vand.u32 %v4229_v1, %v4584_v5  ;;  %v4288_v56 = vld [vmem:[%s4580_s17 + $0x420] sm:$0x33]  ;;  %v4167_v57 = vld [vmem:[%s4580_s17 + $0x238] sm:$0xff] }
  0x45   : > { %1388 = vmatprep.subr.bf16.mxu0 %v1308_v9  ;;  %1431 = vmatprep.subr.bf16.mxu1 %v1314_v13  ;;  %v4230_v9 = vcombine.low %v4175_v59, %v4187_v60  ;;  %v4151_v13 = vld [vmem:[%s4580_s17 + $0x1b8] sm:$0xff]  ;;  %v4289_v59 = vld [vmem:[%s4580_s17 + $0x428] sm:$0x33] }
  0x46   : > { %v1341_v19 = vand.u32 %v4228_v6, %v4584_v5  ;;  %v4207_v23 = vcombine.high %v4151_v13, %v4163_v16  ;;  %v4206_v27 = vcombine.low %v4151_v13, %v4163_v16  ;;  %v4278_v13 = vld [vmem:[%s4580_s17 + $0x3d0] sm:$0xff]  ;;  %v4279_v16 = vld [vmem:[%s4580_s17 + $0x3d8] sm:$0xff] }
  0x47   : > { %4142 = vmatmul.mubr.msk.bf16.vlgmr.msra.gmra.mxu0 %vm443_vm2, %v4603_v31  ;;  %4143 = vmatmul.mubr.msk.bf16.vlgmr.msra.gmra.mxu1 %vm443_vm2, %v4603_v31 }
  0x48   : > { %1389 = vmatpush1.bf16.msra.mxu0 %v1305_v20  ;;  %1432 = vmatpush1.bf16.msra.mxu1 %v1311_v21  ;;  %v1347_v20 = vand.u32 %v4230_v9, %v4584_v5  ;;  %v4205_v21 = vcombine.high %v4150_v10, %v4162_v11  ;;  %v4252_v9 = vld [vmem:[%s4580_s17 + $0x300] sm:$0xff] }
  0x49   : > { %1390 = vmatprep.subr.bf16.mxu0 %v4193_v22  ;;  %1433 = vmatprep.subr.bf16.mxu1 %v4195_v24  ;;  %v4233_v22 = vcombine.high %v4176_v14, %v4188_v15  ;;  %v4235_v24 = vcombine.high %v4177_v17, %v4189_v18  ;;  %v4264_v10 = vld [vmem:[%s4580_s17 + $0x360] sm:$0xff] }
  0x4a   : > { %1408 = vmatprep.mubr.bf16.mxu0 %v4541_v0  ;;  %1451 = vmatprep.mubr.bf16.mxu1 %v4541_v0 }
  0x4b   : > { %v1362_v33 = vand.u32 %v4235_v24, %v4584_v5  ;;  %v3742_v24 = vld [vmem:[%s5713_s2] sm:$0xff] }
  0x4c   : > { %1391 = vmatpush1.bf16.msra.mxu0 %v4192_v26  ;;  %1434 = vmatpush1.bf16.msra.mxu1 %v4194_v28  ;;  %v4232_v26 = vcombine.low %v4176_v14, %v4188_v15  ;;  %v1356_v28 = vand.u32 %v4233_v22, %v4584_v5  ;;  %v4290_v14 = vld [vmem:[%s4580_s17 + $0x430] sm:$0x33]  ;;  %v4265_v15 = vld [vmem:[%s4580_s17 + $0x368] sm:$0xff] }
  0x4d   : > { %1474 = vmatprep.subr.bf16.mxu0 %v1320_v29  ;;  %1517 = vmatprep.subr.bf16.mxu1 %v1326_v34  ;;  %v4234_v29 = vcombine.low %v4177_v17, %v4189_v18  ;;  %v4153_v34 = vld [vmem:[%s4580_s17 + $0x1c8] sm:$0xff]  ;;  %v4291_v17 = vld [vmem:[%s4580_s17 + $0x438] sm:$0x33] }
  0x4e   : > { %v1353_v40 = vand.u32 %v4232_v26, %v4584_v5  ;;  %v4211_v44 = vcombine.high %v4153_v34, %v4165_v37  ;;  %v4210_v48 = vcombine.low %v4153_v34, %v4165_v37  ;;  %3746 = vperm.xlu0 %4530, %v3742_v24   ;;  %v4328_v26 = vcombine.low %v4278_v13, %v4290_v14  ;;  %v3743_v37 = vld [vmem:[%s5713_s2 + $0x8] sm:$0xff] }
  0x4f   : > { %4240 = vmatmul.mubr.msk.bf16.vlgmr.msra.gmra.mxu0 %vm443_vm2, %v4603_v31  ;;  %4241 = vmatmul.mubr.msk.bf16.vlgmr.msra.gmra.mxu1 %vm443_vm2, %v4603_v31 }
  0x50   : > { %1475 = vmatpush1.bf16.msra.mxu0 %v1317_v41  ;;  %1518 = vmatpush1.bf16.msra.mxu1 %v1323_v42  ;;  %v1359_v41 = vand.u32 %v4234_v29, %v4584_v5  ;;  %v4209_v42 = vcombine.high %v4152_v30, %v4164_v32  ;;  %v4330_v29 = vcombine.low %v4279_v16, %v4291_v17  ;;  %v4254_v30 = vld [vmem:[%s4580_s17 + $0x310] sm:$0xff] }
  0x51   : > { %1476 = vmatprep.subr.bf16.mxu0 %v4197_v43  ;;  %1519 = vmatprep.subr.bf16.mxu1 %v4199_v45  ;;  %v4237_v43 = vcombine.high %v4178_v35, %v4190_v36  ;;  %v4239_v45 = vcombine.high %v4179_v38, %v4191_v39  ;;  %v4266_v32 = vld [vmem:[%s4580_s17 + $0x370] sm:$0xff] }
  0x52   : > { %1494 = vmatprep.mubr.bf16.mxu0 %v4541_v0  ;;  %1537 = vmatprep.mubr.bf16.mxu1 %v4541_v0 }
  0x53   : > { %v1374_v53 = vand.u32 %v4239_v45, %v4584_v5  ;;  %3751 = vperm.xlu0 %4530, %v3743_v37   ;;  %v4273_v37 = vld [vmem:[%s4580_s17 + $0x3a8] sm:$0xff] }
  0x54   : > { %1477 = vmatpush1.bf16.msra.mxu0 %v4196_v47  ;;  %1520 = vmatpush1.bf16.msra.mxu1 %v4198_v49  ;;  %v4236_v47 = vcombine.low %v4178_v35, %v4190_v36  ;;  %v1368_v49 = vand.u32 %v4237_v43, %v4584_v5  ;;  %v4280_v35 = vld [vmem:[%s4580_s17 + $0x3e0] sm:$0xff]  ;;  %v4305_v43 = vcombine.high %v4254_v30, %v4266_v32 }
  0x55   : > { %1560 = vmatprep.subr.bf16.mxu0 %v1332_v50  ;;  %1603 = vmatprep.subr.bf16.mxu1 %v1338_v54  ;;  %v4238_v50 = vcombine.low %v4179_v38, %v4191_v39  ;;  %v4155_v54 = vld [vmem:[%s4580_s17 + $0x1d8] sm:$0xff]  ;;  %v4292_v36 = vld [vmem:[%s4580_s17 + $0x440] sm:$0x33]  ;;  %v4281_v39 = vld [vmem:[%s4580_s17 + $0x3e8] sm:$0xff] }
  0x56   : > { %v1365_v60 = vand.u32 %v4236_v47, %v4584_v5  ;;  %v4215_v1 = vcombine.high %v4155_v54, %v4167_v57  ;;  %v4214_v6 = vcombine.low %v4155_v54, %v4167_v57  ;;  %v4267_v38 = vld [vmem:[%s4580_s17 + $0x378] sm:$0xff]  ;;  %v4304_v47 = vcombine.low %v4254_v30, %v4266_v32  ;;  %v4294_v57 = vld [vmem:[%s4580_s17 + $0x450] sm:$0x33]  ;;  %v4260_v30 = vld [vmem:[%s4580_s17 + $0x340] sm:$0xff] }
  0x57   : > { %4242 = vmatmul.mubr.msk.bf16.vlgmr.msra.gmra.mxu0 %vm443_vm2, %v4603_v31  ;;  %4243 = vmatmul.mubr.msk.bf16.vlgmr.msra.gmra.mxu1 %vm443_vm2, %v4603_v31  ;;  %v4272_v32 = vld [vmem:[%s4580_s17 + $0x3a0] sm:$0xff] }
  0x58   : > { %1561 = vmatpush1.bf16.msra.mxu0 %v1329_v61  ;;  %1604 = vmatpush1.bf16.msra.mxu1 %v1335_v62  ;;  %v1371_v61 = vand.u32 %v4238_v50, %v4584_v5  ;;  %v4213_v62 = vcombine.high %v4154_v51, %v4166_v52  ;;  %v4256_v52 = vld [vmem:[%s4580_s17 + $0x320] sm:$0xff] }
  0x59   : > { %1562 = vmatprep.subr.bf16.mxu0 %v4201_v63  ;;  %1605 = vmatprep.subr.bf16.mxu1 %v4203_v2  ;;  %v4325_v63 = vcombine.high %v4276_v55, %v4288_v56  ;;  %v4327_v2 = vcombine.high %v4277_v58, %v4289_v59 }
  0x5a   : > { %1580 = vmatprep.mubr.bf16.mxu0 %v4541_v0  ;;  %1623 = vmatprep.mubr.bf16.mxu1 %v4541_v0 }
  0x5b   : > { %v2215_v11 = vand.u32 %v4327_v2, %v4584_v5 }
  0x5c   : > { %1563 = vmatpush1.bf16.msra.mxu0 %v4200_v4  ;;  %1606 = vmatpush1.bf16.msra.mxu1 %v4202_v7  ;;  %v4324_v4 = vcombine.low %v4276_v55, %v4288_v56  ;;  %v2209_v7 = vand.u32 %v4325_v63, %v4584_v5  ;;  %v4257_v55 = vld [vmem:[%s4580_s17 + $0x328] sm:$0xff]  ;;  %v4282_v56 = vld [vmem:[%s4580_s17 + $0x3f0] sm:$0xff] }
  0x5d   : > { %1646 = vmatprep.subr.bf16.mxu0 %v1344_v8  ;;  %1689 = vmatprep.subr.bf16.mxu1 %v1350_v12  ;;  %v4326_v8 = vcombine.low %v4277_v58, %v4289_v59  ;;  %v4253_v12 = vld [vmem:[%s4580_s17 + $0x308] sm:$0xff]  ;;  %v4283_v59 = vld [vmem:[%s4580_s17 + $0x3f8] sm:$0xff] }
  0x5e   : > { %v2206_v18 = vand.u32 %v4324_v4, %v4584_v5  ;;  %v4303_v22 = vcombine.high %v4253_v12, %v4265_v15  ;;  %v4269_v58 = vld [vmem:[%s4580_s17 + $0x388] sm:$0xff] }
  0x5f   : > { %4244 = vmatmul.mubr.msk.bf16.vlgmr.msra.gmra.mxu0 %vm443_vm2, %v4603_v31  ;;  %4245 = vmatmul.mubr.msk.bf16.vlgmr.msra.gmra.mxu1 %vm443_vm2, %v4603_v31  ;;  %v4311_v2 = vcombine.high %v4257_v55, %v4269_v58 }
  0x60   : > { %1647 = vmatpush1.bf16.msra.mxu0 %v1341_v19  ;;  %1690 = vmatpush1.bf16.msra.mxu1 %v1347_v20  ;;  %v2212_v19 = vand.u32 %v4326_v8, %v4584_v5  ;;  %v4301_v20 = vcombine.high %v4252_v9, %v4264_v10 }
  0x61   : > { %1648 = vmatprep.subr.bf16.mxu0 %v4205_v21  ;;  %1691 = vmatprep.subr.bf16.mxu1 %v4207_v23  ;;  %v4329_v21 = vcombine.high %v4278_v13, %v4290_v14  ;;  %v4331_v23 = vcombine.high %v4279_v16, %v4291_v17  ;;  %v4259_v13 = vld [vmem:[%s4580_s17 + $0x338] sm:$0xff]  ;;  %v4284_v14 = vld [vmem:[%s4580_s17 + $0x400] sm:$0xff]  ;;  %v4285_v17 = vld [vmem:[%s4580_s17 + $0x408] sm:$0xff] }
  0x62   : > { %1666 = vmatprep.mubr.bf16.mxu0 %v4541_v0  ;;  %1709 = vmatprep.mubr.bf16.mxu1 %v4541_v0  ;;  %v4271_v16 = vld [vmem:[%s4580_s17 + $0x398] sm:$0xff] }
  0x63   : > { %v2227_v34 = vand.u32 %v4331_v23, %v4584_v5  ;;  %v4315_v23 = vcombine.high %v4259_v13, %v4271_v16 }
  0x64   : > { %1649 = vmatpush1.bf16.msra.mxu0 %v4204_v25  ;;  %1692 = vmatpush1.bf16.msra.mxu1 %v4206_v27  ;;  %v4300_v25 = vcombine.low %v4252_v9, %v4264_v10  ;;  %v4302_v27 = vcombine.low %v4253_v12, %v4265_v15  ;;  %v4258_v10 = vld [vmem:[%s4580_s17 + $0x330] sm:$0xff]  ;;  %v4296_v15 = vld [vmem:[%s4580_s17 + $0x460] sm:$0x33] }
  0x65   : > { %1732 = vmatprep.subr.bf16.mxu0 %v1356_v28  ;;  %1775 = vmatprep.subr.bf16.mxu1 %v1362_v33  ;;  %v2221_v28 = vand.u32 %v4329_v21, %v4584_v5  ;;  %v4255_v33 = vld [vmem:[%s4580_s17 + $0x318] sm:$0xff] }
  0x66   : > { %v4307_v45 = vcombine.high %v4255_v33, %v4267_v38 }
  0x67   : > { %4246 = vmatmul.mubr.msk.bf16.vlgmr.msra.gmra.mxu0 %vm443_vm2, %v4603_v31  ;;  %4247 = vmatmul.mubr.msk.bf16.vlgmr.msra.gmra.mxu1 %vm443_vm2, %v4603_v31 }
  0x68   : > { %1733 = vmatpush1.bf16.msra.mxu0 %v1353_v40  ;;  %1776 = vmatpush1.bf16.msra.mxu1 %v1359_v41  ;;  %v4293_v40 = vld [vmem:[%s4580_s17 + $0x448] sm:$0x33]  ;;  %v2218_v41 = vand.u32 %v4328_v26, %v4584_v5  ;;  %v4340_v26 = vcombine.low %v4284_v14, %v4296_v15 }
  0x69   : > { %1734 = vmatprep.subr.bf16.mxu0 %v4209_v42  ;;  %1777 = vmatprep.subr.bf16.mxu1 %v4211_v44  ;;  %v2224_v42 = vand.u32 %v4330_v29, %v4584_v5  ;;  %v4333_v44 = vcombine.high %v4280_v35, %v4292_v36  ;;  %v4334_v51 = vcombine.low %v4281_v39, %v4293_v40 }
  0x6a   : > { %1752 = vmatprep.mubr.bf16.mxu0 %v4541_v0  ;;  %1795 = vmatprep.mubr.bf16.mxu1 %v4541_v0 }
  0x6b   : > { %v2233_v50 = vand.u32 %v4333_v44, %v4584_v5 }
  0x6c   : > { %1735 = vmatpush1.bf16.msra.mxu0 %v4208_v46  ;;  %1778 = vmatpush1.bf16.msra.mxu1 %v4210_v48  ;;  %v4335_v46 = vcombine.high %v4281_v39, %v4293_v40  ;;  %v4332_v48 = vcombine.low %v4280_v35, %v4292_v36  ;;  %v4286_v35 = vld [vmem:[%s4580_s17 + $0x410] sm:$0xff]  ;;  %v4299_v39 = vld [vmem:[%s4580_s17 + $0x478] sm:$0x33]  ;;  %v2254_v40 = vand.u32 %v4340_v26, %v4584_v5 }
  0x6d   : > { %1818 = vmatprep.subr.bf16.mxu0 %v1368_v49  ;;  %1861 = vmatprep.subr.bf16.mxu1 %v1374_v53  ;;  %v4306_v49 = vcombine.low %v4255_v33, %v4267_v38  ;;  %v4268_v53 = vld [vmem:[%s4580_s17 + $0x380] sm:$0xff]  ;;  %v4298_v36 = vld [vmem:[%s4580_s17 + $0x470] sm:$0x33]  ;;  %v4287_v38 = vld [vmem:[%s4580_s17 + $0x418] sm:$0xff] }
  0x6e   : > { %v2239_v54 = vand.u32 %v4335_v46, %v4584_v5  ;;  %v4309_v63 = vcombine.high %v4256_v52, %v4268_v53  ;;  %v4308_v4 = vcombine.low %v4256_v52, %v4268_v53  ;;  %v4316_v46 = vcombine.low %v4260_v30, %v4272_v32  ;;  %v4274_v52 = vld [vmem:[%s4580_s17 + $0x3b0] sm:$0xff]  ;;  %v4263_v53 = vld [vmem:[%s4580_s17 + $0x358] sm:$0xff] }
  0x6f   : > { %4248 = vmatmul.mubr.msk.bf16.vlgmr.msra.gmra.mxu0 %vm443_vm2, %v4603_v31  ;;  %4249 = vmatmul.mubr.msk.bf16.vlgmr.msra.gmra.mxu1 %vm443_vm2, %v4603_v31 }
  0x70   : > { %1819 = vmatpush1.bf16.msra.mxu0 %v1365_v60  ;;  %1862 = vmatpush1.bf16.msra.mxu1 %v1371_v61  ;;  %v4295_v60 = vld [vmem:[%s4580_s17 + $0x458] sm:$0x33]  ;;  %v2230_v61 = vand.u32 %v4332_v48, %v4584_v5 }
  0x71   : > { %1820 = vmatprep.subr.bf16.mxu0 %v4213_v62  ;;  %1863 = vmatprep.subr.bf16.mxu1 %v4215_v1  ;;  %v2236_v62 = vand.u32 %v4334_v51, %v4584_v5  ;;  %v4337_v1 = vcombine.high %v4282_v56, %v4294_v57  ;;  %v4338_v9 = vcombine.low %v4283_v59, %v4295_v60  ;;  %v4262_v51 = vld [vmem:[%s4580_s17 + $0x350] sm:$0xff] }
  0x72   : > { %1838 = vmatprep.mubr.bf16.mxu0 %v4541_v0  ;;  %1881 = vmatprep.mubr.bf16.mxu1 %v4541_v0 }
  0x73   : > { %v2245_v8 = vand.u32 %v4337_v1, %v4584_v5 }
  0x74   : > { %1821 = vmatpush1.bf16.msra.mxu0 %v4212_v3  ;;  %1864 = vmatpush1.bf16.msra.mxu1 %v4214_v6  ;;  %v4339_v3 = vcombine.high %v4283_v59, %v4295_v60  ;;  %v4336_v6 = vcombine.low %v4282_v56, %v4294_v57  ;;  %v4275_v56 = vld [vmem:[%s4580_s17 + $0x3b8] sm:$0xff]  ;;  %v4385_v57 = vld [vmem:[%s4580_s17 + $0x548] sm:$0xff] }
  0x75   : > { %2289 = vmatprep.subr.bf16.mxu0 %v2209_v7  ;;  %2332 = vmatprep.subr.bf16.mxu1 %v2215_v11  ;;  %v4310_v7 = vcombine.low %v4257_v55, %v4269_v58  ;;  %v4270_v11 = vld [vmem:[%s4580_s17 + $0x390] sm:$0xff]  ;;  %v4396_v55 = vld [vmem:[%s4580_s17 + $0x5a0] sm:$0x33]  ;;  %v4397_v58 = vld [vmem:[%s4580_s17 + $0x5a8] sm:$0x33] }
  0x76   : > { %v2251_v12 = vand.u32 %v4339_v3, %v4584_v5  ;;  %v4313_v21 = vcombine.high %v4258_v10, %v4270_v11  ;;  %v4435_v1 = vcombine.high %v4385_v57, %v4397_v58  ;;  %v4320_v3 = vcombine.low %v4262_v51, %v4274_v52 }
  0x77   : > { %4250 = vmatmul.mubr.msk.bf16.vlgmr.msra.gmra.mxu0 %vm443_vm2, %v4603_v31  ;;  %4251 = vmatmul.mubr.msk.bf16.vlgmr.msra.gmra.mxu1 %vm443_vm2, %v4603_v31 }
  0x78   : > { %2290 = vmatpush1.bf16.msra.mxu0 %v2206_v18  ;;  %2333 = vmatpush1.bf16.msra.mxu1 %v2212_v19  ;;  %v4297_v18 = vld [vmem:[%s4580_s17 + $0x468] sm:$0x33]  ;;  %v2242_v19 = vand.u32 %v4336_v6, %v4584_v5  ;;  %v4322_v6 = vcombine.low %v4263_v53, %v4275_v56 }
  0x79   : > { %2291 = vmatprep.subr.bf16.mxu0 %v4301_v20  ;;  %2334 = vmatprep.subr.bf16.mxu1 %v4303_v22  ;;  %v2248_v20 = vand.u32 %v4338_v9, %v4584_v5  ;;  %v4341_v22 = vcombine.high %v4284_v14, %v4296_v15  ;;  %v4343_v24 = vcombine.high %v4285_v17, %v4297_v18  ;;  %v4360_v9 = vld [vmem:[%s4580_s17 + $0x480] sm:$0xff]  ;;  %v4398_v14 = vld [vmem:[%s4580_s17 + $0x5b0] sm:$0x33]  ;;  %v4373_v15 = vld [vmem:[%s4580_s17 + $0x4e8] sm:$0xff] }
  0x7a   : > { %2309 = vmatprep.mubr.bf16.mxu0 %v4541_v0  ;;  %2352 = vmatprep.mubr.bf16.mxu1 %v4541_v0  ;;  %v4342_v29 = vcombine.low %v4285_v17, %v4297_v18  ;;  %v4399_v17 = vld [vmem:[%s4580_s17 + $0x5b8] sm:$0x33] }
  0x7b   : > { %v2263_v33 = vand.u32 %v4343_v24, %v4584_v5 }
  0x7c   : > { %2292 = vmatpush1.bf16.msra.mxu0 %v4300_v25  ;;  %2335 = vmatpush1.bf16.msra.mxu1 %v4302_v27  ;;  %v4312_v25 = vcombine.low %v4258_v10, %v4270_v11  ;;  %v4314_v27 = vcombine.low %v4259_v13, %v4271_v16  ;;  %v4372_v10 = vld [vmem:[%s4580_s17 + $0x4e0] sm:$0xff]  ;;  %v3116_v11 = vand.u32 %v4435_v1, %v4584_v5  ;;  %v4386_v13 = vld [vmem:[%s4580_s17 + $0x550] sm:$0xff]  ;;  %v4387_v16 = vld [vmem:[%s4580_s17 + $0x558] sm:$0xff] }
  0x7d   : > { %2375 = vmatprep.subr.bf16.mxu0 %v2221_v28  ;;  %2418 = vmatprep.subr.bf16.mxu1 %v2227_v34  ;;  %v2257_v28 = vand.u32 %v4341_v22, %v4584_v5  ;;  %v4261_v34 = vld [vmem:[%s4580_s17 + $0x348] sm:$0xff]  ;;  %v4408_v24 = vcombine.low %v4360_v9, %v4372_v10 }
  0x7e   : > { %v4319_v44 = vcombine.high %v4261_v34, %v4273_v37  ;;  %v4318_v48 = vcombine.low %v4261_v34, %v4273_v37  ;;  %v4388_v34 = vld [vmem:[%s4580_s17 + $0x560] sm:$0xff]  ;;  %v4389_v37 = vld [vmem:[%s4580_s17 + $0x568] sm:$0xff] }
  0x7f   : > { %4348 = vmatmul.mubr.msk.bf16.vlgmr.msra.gmra.mxu0 %vm443_vm2, %v4603_v31  ;;  %4349 = vmatmul.mubr.msk.bf16.vlgmr.msra.gmra.mxu1 %vm443_vm2, %v4603_v31 }
  0x80   : > { %2376 = vmatpush1.bf16.msra.mxu0 %v2218_v41  ;;  %2419 = vmatpush1.bf16.msra.mxu1 %v2224_v42  ;;  %v2260_v41 = vand.u32 %v4342_v29, %v4584_v5  ;;  %v4317_v42 = vcombine.high %v4260_v30, %v4272_v32  ;;  %v4362_v29 = vld [vmem:[%s4580_s17 + $0x490] sm:$0xff] }
  0x81   : > { %2377 = vmatprep.subr.bf16.mxu0 %v4305_v43  ;;  %2420 = vmatprep.subr.bf16.mxu1 %v4307_v45  ;;  %v4345_v43 = vcombine.high %v4286_v35, %v4298_v36  ;;  %v4347_v45 = vcombine.high %v4287_v38, %v4299_v39  ;;  %v4374_v30 = vld [vmem:[%s4580_s17 + $0x4f0] sm:$0xff] }
  0x82   : > { %2395 = vmatprep.mubr.bf16.mxu0 %v4541_v0  ;;  %2438 = vmatprep.mubr.bf16.mxu1 %v4541_v0 }
  0x84   : > { %2378 = vmatpush1.bf16.msra.mxu0 %v4304_v47  ;;  %2421 = vmatpush1.bf16.msra.mxu1 %v4306_v49  ;;  %v4344_v47 = vcombine.low %v4286_v35, %v4298_v36  ;;  %v2269_v49 = vand.u32 %v4345_v43, %v4584_v5  ;;  %v4400_v35 = vld [vmem:[%s4580_s17 + $0x5c0] sm:$0x33]  ;;  %v4375_v36 = vld [vmem:[%s4580_s17 + $0x4f8] sm:$0xff] }
  0x85   : > { %2461 = vmatprep.subr.bf16.mxu0 %v2233_v50  ;;  %2504 = vmatprep.subr.bf16.mxu1 %v2239_v54  ;;  %v4346_v50 = vcombine.low %v4287_v38, %v4299_v39  ;;  %v4384_v54 = vld [vmem:[%s4580_s17 + $0x540] sm:$0xff]  ;;  %v4401_v38 = vld [vmem:[%s4580_s17 + $0x5c8] sm:$0x33] }
  0x86   : > { %v2266_v59 = vand.u32 %v4344_v47, %v4584_v5 }
  0x87   : > { %4350 = vmatmul.mubr.msk.bf16.vlgmr.msra.gmra.mxu0 %vm443_vm2, %v4603_v31  ;;  %4351 = vmatmul.mubr.msk.bf16.vlgmr.msra.gmra.mxu1 %vm443_vm2, %v4603_v31  ;;  %v2272_v60 = vand.u32 %v4346_v50, %v4584_v5  ;;  %v4364_v50 = vld [vmem:[%s4580_s17 + $0x4a0] sm:$0xff] }
  0x88   : > { %2462 = vmatpush1.bf16.msra.mxu0 %v2230_v61  ;;  %2505 = vmatpush1.bf16.msra.mxu1 %v2236_v62  ;;  %v4321_v61 = vcombine.high %v4262_v51, %v4274_v52  ;;  %v4433_v62 = vcombine.high %v4384_v54, %v4396_v55  ;;  %v4376_v51 = vld [vmem:[%s4580_s17 + $0x500] sm:$0xff] }
  0x89   : > { %2463 = vmatprep.subr.bf16.mxu0 %v4309_v63  ;;  %2506 = vmatprep.subr.bf16.mxu1 %v4311_v2  ;;  %v4323_v63 = vcombine.high %v4263_v53, %v4275_v56  ;;  %v4914_v2 = vld [vmem:[%s5712_s1] sm:$0xff]   ;;  %v4390_v53 = vld [vmem:[%s4580_s17 + $0x570] sm:$0xff]  ;;  %v4391_v56 = vld [vmem:[%s4580_s17 + $0x578] sm:$0xff]  ;;  %v4416_v1 = vcombine.low %v4364_v50, %v4376_v51 }
  0x8a   : > { %2481 = vmatprep.mubr.bf16.mxu0 %v4541_v0  ;;  %2524 = vmatprep.mubr.bf16.mxu1 %v4541_v0 }
  0x8c   : > { %2464 = vmatpush1.bf16.msra.mxu0 %v4308_v4  ;;  %2507 = vmatpush1.bf16.msra.mxu1 %v4310_v7  ;;  %v4432_v4 = vcombine.low %v4384_v54, %v4396_v55  ;;  %v3110_v7 = vand.u32 %v4433_v62, %v4584_v5  ;;  %v4402_v54 = vld [vmem:[%s4580_s17 + $0x5d0] sm:$0x33]  ;;  %v4377_v55 = vld [vmem:[%s4580_s17 + $0x508] sm:$0xff] }
  0x8d   : > { %2547 = vmatprep.subr.bf16.mxu0 %v2245_v8  ;;  %2590 = vmatprep.subr.bf16.mxu1 %v2251_v12  ;;  %v4434_v8 = vcombine.low %v4385_v57, %v4397_v58  ;;  %v4361_v12 = vld [vmem:[%s4580_s17 + $0x488] sm:$0xff]  ;;  %v4403_v57 = vld [vmem:[%s4580_s17 + $0x5d8] sm:$0x33] }
  0x8e   : > { %v3107_v18 = vand.u32 %v4432_v4, %v4584_v5  ;;  %v4411_v22 = vcombine.high %v4361_v12, %v4373_v15  ;;  %v4410_v26 = vcombine.low %v4361_v12, %v4373_v15  ;;  %v4392_v12 = vld [vmem:[%s4580_s17 + $0x580] sm:$0xff]  ;;  %v4393_v15 = vld [vmem:[%s4580_s17 + $0x588] sm:$0xff] }
  0x8f   : > { %4352 = vmatmul.mubr.msk.bf16.vlgmr.msra.gmra.mxu0 %vm443_vm2, %v4603_v31  ;;  %4353 = vmatmul.mubr.msk.bf16.vlgmr.msra.gmra.mxu1 %vm443_vm2, %v4603_v31 }
  0x90   : > { %2548 = vmatpush1.bf16.msra.mxu0 %v2242_v19  ;;  %2591 = vmatpush1.bf16.msra.mxu1 %v2248_v20  ;;  %v3113_v19 = vand.u32 %v4434_v8, %v4584_v5  ;;  %v4409_v20 = vcombine.high %v4360_v9, %v4372_v10  ;;  %v4366_v8 = vld [vmem:[%s4580_s17 + $0x4b0] sm:$0xff] }
  0x91   : > { %2549 = vmatprep.subr.bf16.mxu0 %v4313_v21  ;;  %2592 = vmatprep.subr.bf16.mxu1 %v4315_v23  ;;  %v4437_v21 = vcombine.high %v4386_v13, %v4398_v14  ;;  %v4439_v23 = vcombine.high %v4387_v16, %v4399_v17  ;;  %v4378_v9 = vld [vmem:[%s4580_s17 + $0x510] sm:$0xff] }
  0x92   : > { %2567 = vmatprep.mubr.bf16.mxu0 %v4541_v0  ;;  %2610 = vmatprep.mubr.bf16.mxu1 %v4541_v0 }
  0x93   : > { %v3128_v32 = vand.u32 %v4439_v23, %v4584_v5  ;;  %v4420_v23 = vcombine.low %v4366_v8, %v4378_v9 }
  0x94   : > { %2550 = vmatpush1.bf16.msra.mxu0 %v4312_v25  ;;  %2593 = vmatpush1.bf16.msra.mxu1 %v4314_v27  ;;  %v4436_v25 = vcombine.low %v4386_v13, %v4398_v14  ;;  %v3122_v27 = vand.u32 %v4437_v21, %v4584_v5  ;;  %v4404_v13 = vld [vmem:[%s4580_s17 + $0x5e0] sm:$0x33]  ;;  %v4379_v14 = vld [vmem:[%s4580_s17 + $0x518] sm:$0xff] }
  0x95   : > { %2633 = vmatprep.subr.bf16.mxu0 %v2257_v28  ;;  %2676 = vmatprep.subr.bf16.mxu1 %v2263_v33  ;;  %v4438_v28 = vcombine.low %v4387_v16, %v4399_v17  ;;  %v4363_v33 = vld [vmem:[%s4580_s17 + $0x498] sm:$0xff]  ;;  %v4405_v16 = vld [vmem:[%s4580_s17 + $0x5e8] sm:$0x33] }
  0x96   : > { %v3119_v39 = vand.u32 %v4436_v25, %v4584_v5  ;;  %v4415_v43 = vcombine.high %v4363_v33, %v4375_v36  ;;  %v4414_v47 = vcombine.low %v4363_v33, %v4375_v36  ;;  %v4394_v33 = vld [vmem:[%s4580_s17 + $0x590] sm:$0xff]  ;;  %v4395_v36 = vld [vmem:[%s4580_s17 + $0x598] sm:$0xff] }
  0x97   : > { %4354 = vmatmul.mubr.msk.bf16.vlgmr.msra.gmra.mxu0 %vm443_vm2, %v4603_v31  ;;  %4355 = vmatmul.mubr.msk.bf16.vlgmr.msra.gmra.mxu1 %vm443_vm2, %v4603_v31  ;;  %v2275_v31 = vand.u32 %v4347_v45, %v4584_v5  ;;  %v4412_v45 = vcombine.low %v4362_v29, %v4374_v30 }
  0x98   : > { %2634 = vmatpush1.bf16.msra.mxu0 %v2254_v40  ;;  %2677 = vmatpush1.bf16.msra.mxu1 %v2260_v41  ;;  %v3125_v40 = vand.u32 %v4438_v28, %v4584_v5  ;;  %v4413_v41 = vcombine.high %v4362_v29, %v4374_v30  ;;  %v4368_v28 = vld [vmem:[%s4580_s17 + $0x4c0] sm:$0xff] }
  0x99   : > { %2635 = vmatprep.subr.bf16.mxu0 %v4317_v42  ;;  %2678 = vmatprep.subr.bf16.mxu1 %v4319_v44  ;;  %v4441_v42 = vcombine.high %v4388_v34, %v4400_v35  ;;  %v4443_v44 = vcombine.high %v4389_v37, %v4401_v38  ;;  %v4380_v29 = vld [vmem:[%s4580_s17 + $0x520] sm:$0xff] }
  0x9a   : > { %2653 = vmatprep.mubr.bf16.mxu0 %v4541_v0  ;;  %2696 = vmatprep.mubr.bf16.mxu1 %v4541_v0 }
  0x9b   : > { %v3140_v52 = vand.u32 %v4443_v44, %v4584_v5  ;;  %v4424_v44 = vcombine.low %v4368_v28, %v4380_v29 }
  0x9c   : > { %2636 = vmatpush1.bf16.msra.mxu0 %v4316_v46  ;;  %2679 = vmatpush1.bf16.msra.mxu1 %v4318_v48  ;;  %v4440_v46 = vcombine.low %v4388_v34, %v4400_v35  ;;  %v3134_v48 = vand.u32 %v4441_v42, %v4584_v5  ;;  %v4406_v34 = vld [vmem:[%s4580_s17 + $0x5f0] sm:$0x33]  ;;  %v4381_v35 = vld [vmem:[%s4580_s17 + $0x528] sm:$0xff] }
  0x9d   : > { %2719 = vmatprep.subr.bf16.mxu0 %v2269_v49  ;;  %2762 = vmatprep.subr.bf16.mxu1 %v2275_v31  ;;  %v4442_v49 = vcombine.low %v4389_v37, %v4401_v38  ;;  %v4365_v31 = vld [vmem:[%s4580_s17 + $0x4a8] sm:$0xff]  ;;  %v4407_v37 = vld [vmem:[%s4580_s17 + $0x5f8] sm:$0x33] }
  0x9e   : > { %v3131_v58 = vand.u32 %v4440_v46, %v4584_v5  ;;  %v4419_v62 = vcombine.high %v4365_v31, %v4377_v55  ;;  %v4418_v4 = vcombine.low %v4365_v31, %v4377_v55  ;;  %v4383_v31 = vld [vmem:[%s4580_s17 + $0x538] sm:$0xff] }
  0x9f   : > { %4356 = vmatmul.mubr.msk.bf16.vlgmr.msra.gmra.mxu0 %vm443_vm2, %v4914_v2  ;;  %4357 = vmatmul.mubr.msk.bf16.vlgmr.msra.gmra.mxu1 %vm443_vm2, %v4914_v2 }
  0xa0   : > { %2720 = vmatpush1.bf16.msra.mxu0 %v2266_v59  ;;  %2763 = vmatpush1.bf16.msra.mxu1 %v2272_v60  ;;  %v3137_v59 = vand.u32 %v4442_v49, %v4584_v5  ;;  %v4417_v60 = vcombine.high %v4364_v50, %v4376_v51  ;;  %v4370_v50 = vld [vmem:[%s4580_s17 + $0x4d0] sm:$0xff] }
  0xa1   : > { %2721 = vmatprep.subr.bf16.mxu0 %v4321_v61  ;;  %2764 = vmatprep.subr.bf16.mxu1 %v4323_v63  ;;  %v4445_v61 = vcombine.high %v4390_v53, %v4402_v54  ;;  %v4447_v63 = vcombine.high %v4391_v56, %v4403_v57  ;;  %v4382_v51 = vld [vmem:[%s4580_s17 + $0x530] sm:$0xff] }
  0xa2   : > { %2739 = vmatprep.mubr.bf16.mxu0 %v4541_v0  ;;  %2782 = vmatprep.mubr.bf16.mxu1 %v4541_v0  ;;  %v4429_v55 = vcombine.high %v4370_v50, %v4382_v51 }
  0xa3   : > { %v3152_v10 = vand.u32 %v4447_v63, %v4584_v5 }
  0xa4   : > { %2722 = vmatpush1.bf16.msra.mxu0 %v4320_v3  ;;  %2765 = vmatpush1.bf16.msra.mxu1 %v4322_v6  ;;  %v4444_v3 = vcombine.low %v4390_v53, %v4402_v54  ;;  %v3146_v6 = vand.u32 %v4445_v61, %v4584_v5 }
  0xa5   : > { %3190 = vmatprep.subr.bf16.mxu0 %v3110_v7  ;;  %3233 = vmatprep.subr.bf16.mxu1 %v3116_v11  ;;  %v4446_v7 = vcombine.low %v4391_v56, %v4403_v57  ;;  %v4367_v11 = vld [vmem:[%s4580_s17 + $0x4b8] sm:$0xff]  ;;  %v4428_v57 = vcombine.low %v4370_v50, %v4382_v51 }
  0xa6   : > { %v3143_v17 = vand.u32 %v4444_v3, %v4584_v5  ;;  %v4423_v21 = vcombine.high %v4367_v11, %v4379_v14  ;;  %v4422_v25 = vcombine.low %v4367_v11, %v4379_v14 }
  0xa7   : > { %4358 = vmatmul.mubr.msk.bf16.vlgmr.msra.gmra.mxu0 %vm443_vm2, %v4914_v2  ;;  %4359 = vmatmul.mubr.msk.bf16.vlgmr.msra.gmra.mxu1 %vm443_vm2, %v4914_v2 }
  0xa8   : > { %3191 = vmatpush1.bf16.msra.mxu0 %v3107_v18  ;;  %3234 = vmatpush1.bf16.msra.mxu1 %v3113_v19  ;;  %v3149_v18 = vand.u32 %v4446_v7, %v4584_v5  ;;  %v4421_v19 = vcombine.high %v4366_v8, %v4378_v9 }
  0xa9   : > { %3192 = vmatprep.subr.bf16.mxu0 %v4409_v20  ;;  %3235 = vmatprep.subr.bf16.mxu1 %v4411_v22  ;;  %v4449_v20 = vcombine.high %v4392_v12, %v4404_v13  ;;  %v4451_v22 = vcombine.high %v4393_v15, %v4405_v16 }
  0xaa   : > { %3210 = vmatprep.mubr.bf16.mxu0 %v4541_v0  ;;  %3253 = vmatprep.mubr.bf16.mxu1 %v4541_v0 }
  0xab   : > { %v3164_v30 = vand.u32 %v4451_v22, %v4584_v5 }
  0xac   : > { %3193 = vmatpush1.bf16.msra.mxu0 %v4408_v24  ;;  %3236 = vmatpush1.bf16.msra.mxu1 %v4410_v26  ;;  %v4448_v24 = vcombine.low %v4392_v12, %v4404_v13  ;;  %v3158_v26 = vand.u32 %v4449_v20, %v4584_v5 }
  0xad   : > { %3276 = vmatprep.subr.bf16.mxu0 %v3122_v27  ;;  %3319 = vmatprep.subr.bf16.mxu1 %v3128_v32  ;;  %v4450_v27 = vcombine.low %v4393_v15, %v4405_v16  ;;  %v4369_v32 = vld [vmem:[%s4580_s17 + $0x4c8] sm:$0xff] }
  0xae   : > { %v3155_v38 = vand.u32 %v4448_v24, %v4584_v5  ;;  %v4427_v42 = vcombine.high %v4369_v32, %v4381_v35  ;;  %v4426_v46 = vcombine.low %v4369_v32, %v4381_v35 }
  0xaf   : > { %4456 = vmatmul.mubr.msk.bf16.vlgmr.msra.gmra.mxu0 %vm443_vm2, %v4914_v2  ;;  %4457 = vmatmul.mubr.msk.bf16.vlgmr.msra.gmra.mxu1 %vm443_vm2, %v4914_v2 }
  0xb0   : > { %3277 = vmatpush1.bf16.msra.mxu0 %v3119_v39  ;;  %3320 = vmatpush1.bf16.msra.mxu1 %v3125_v40  ;;  %v3161_v39 = vand.u32 %v4450_v27, %v4584_v5  ;;  %v4425_v40 = vcombine.high %v4368_v28, %v4380_v29 }
  0xb1   : > { %3278 = vmatprep.subr.bf16.mxu0 %v4413_v41  ;;  %3321 = vmatprep.subr.bf16.mxu1 %v4415_v43  ;;  %v4453_v41 = vcombine.high %v4394_v33, %v4406_v34  ;;  %v4455_v43 = vcombine.high %v4395_v36, %v4407_v37 }
  0xb2   : > { %3296 = vmatprep.mubr.bf16.mxu0 %v4541_v0  ;;  %3339 = vmatprep.mubr.bf16.mxu1 %v4541_v0 }
  0xb3   : > { %v3176_v49 = vand.u32 %v4455_v43, %v4584_v5 }
  0xb4   : > { %3279 = vmatpush1.bf16.msra.mxu0 %v4412_v45  ;;  %3322 = vmatpush1.bf16.msra.mxu1 %v4414_v47  ;;  %v4452_v45 = vcombine.low %v4394_v33, %v4406_v34  ;;  %v3170_v47 = vand.u32 %v4453_v41, %v4584_v5 }
  0xb5   : > { %3362 = vmatprep.subr.bf16.mxu0 %v3134_v48  ;;  %3405 = vmatprep.subr.bf16.mxu1 %v3140_v52  ;;  %v4454_v48 = vcombine.low %v4395_v36, %v4407_v37  ;;  %v4371_v52 = vld [vmem:[%s4580_s17 + $0x4d8] sm:$0xff] }
  0xb6   : > { %v3167_v53 = vand.u32 %v4452_v45, %v4584_v5  ;;  %v4431_v56 = vcombine.high %v4371_v52, %v4383_v31 }
  0xb7   : > { %4458 = vmatmul.mubr.msk.bf16.vlgmr.msra.gmra.mxu0 %vm443_vm2, %v4914_v2  ;;  %4459 = vmatmul.mubr.msk.bf16.vlgmr.msra.gmra.mxu1 %vm443_vm2, %v4914_v2  ;;  %v3173_v54 = vand.u32 %v4454_v48, %v4584_v5 }
  0xb8   : > { %3363 = vmatpush1.bf16.msra.mxu0 %v3131_v58  ;;  %3406 = vmatpush1.bf16.msra.mxu1 %v3137_v59  ;;  %v4430_v58 = vcombine.low %v4371_v52, %v4383_v31 }
  0xb9   : > { %3364 = vmatprep.subr.bf16.mxu0 %v4417_v60  ;;  %3407 = vmatprep.subr.bf16.mxu1 %v4419_v62 }
  0xba   : > { %3382 = vmatprep.mubr.bf16.mxu0 %v4541_v0  ;;  %3425 = vmatprep.mubr.bf16.mxu1 %v4541_v0 }
  0xbc   : > { %3365 = vmatpush1.bf16.msra.mxu0 %v4416_v1  ;;  %3408 = vmatpush1.bf16.msra.mxu1 %v4418_v4 }
  0xbd   : > { %3448 = vmatprep.subr.bf16.mxu0 %v3146_v6  ;;  %3491 = vmatprep.subr.bf16.mxu1 %v3152_v10 }
  0xbf   : > { %4460 = vmatmul.mubr.msk.bf16.vlgmr.msra.gmra.mxu0 %vm443_vm2, %v4914_v2  ;;  %4461 = vmatmul.mubr.msk.bf16.vlgmr.msra.gmra.mxu1 %vm443_vm2, %v4914_v2 }
  0xc0   : > { %3449 = vmatpush1.bf16.msra.mxu0 %v3143_v17  ;;  %3492 = vmatpush1.bf16.msra.mxu1 %v3149_v18 }
  0xc1   : > { %3450 = vmatprep.subr.bf16.mxu0 %v4421_v19  ;;  %3493 = vmatprep.subr.bf16.mxu1 %v4423_v21 }
  0xc2   : > { %3468 = vmatprep.mubr.bf16.mxu0 %v4541_v0  ;;  %3511 = vmatprep.mubr.bf16.mxu1 %v4541_v0 }
  0xc4   : > { %3451 = vmatpush1.bf16.msra.mxu0 %v4420_v23  ;;  %3494 = vmatpush1.bf16.msra.mxu1 %v4422_v25 }
  0xc5   : > { %3534 = vmatprep.subr.bf16.mxu0 %v3158_v26  ;;  %3577 = vmatprep.subr.bf16.mxu1 %v3164_v30 }
  0xc7   : > { %4462 = vmatmul.mubr.msk.bf16.vlgmr.msra.gmra.mxu0 %vm443_vm2, %v4914_v2  ;;  %4463 = vmatmul.mubr.msk.bf16.vlgmr.msra.gmra.mxu1 %vm443_vm2, %v4914_v2 }
  0xc8   : > { %3535 = vmatpush1.bf16.msra.mxu0 %v3155_v38  ;;  %3578 = vmatpush1.bf16.msra.mxu1 %v3161_v39 }
  0xc9   : > { %3536 = vmatprep.subr.bf16.mxu0 %v4425_v40  ;;  %3579 = vmatprep.subr.bf16.mxu1 %v4427_v42 }
  0xca   : > { %3554 = vmatprep.mubr.bf16.mxu0 %v4541_v0  ;;  %3597 = vmatprep.mubr.bf16.mxu1 %v4541_v0 }
  0xcc   : > { %3537 = vmatpush1.bf16.msra.mxu0 %v4424_v44  ;;  %3580 = vmatpush1.bf16.msra.mxu1 %v4426_v46 }
  0xcd   : > { %3620 = vmatprep.subr.bf16.mxu0 %v3170_v47  ;;  %3663 = vmatprep.subr.bf16.mxu1 %v3176_v49 }
  0xcf   : > { %4464 = vmatmul.mubr.msk.bf16.vlgmr.msra.gmra.mxu0 %vm443_vm2, %v4914_v2  ;;  %4465 = vmatmul.mubr.msk.bf16.vlgmr.msra.gmra.mxu1 %vm443_vm2, %v4914_v2 }
  0xd0   : > { %3621 = vmatpush1.bf16.msra.mxu0 %v3167_v53  ;;  %3664 = vmatpush1.bf16.msra.mxu1 %v3173_v54 }
  0xd1   : > { %3622 = vmatprep.subr.bf16.mxu0 %v4429_v55  ;;  %3665 = vmatprep.subr.bf16.mxu1 %v4431_v56 }
  0xd2   : > { %3640 = vmatprep.mubr.bf16.mxu0 %v4541_v0  ;;  %3683 = vmatprep.mubr.bf16.mxu1 %v4541_v0 }
  0xd4   : > { %3623 = vmatpush1.bf16.msra.mxu0 %v4428_v57  ;;  %3666 = vmatpush1.bf16.msra.mxu1 %v4430_v58 }
  0xd7   : > { %4466 = vmatmul.mubr.msk.bf16.vlgmr.msra.gmra.mxu0 %vm443_vm2, %v4914_v2  ;;  %4467 = vmatmul.mubr.msk.bf16.vlgmr.msra.gmra.mxu1 %vm443_vm2, %v4914_v2 }
  0xdf   : > { %v5030_v5 = vpop.f32.mrf.mxu0  ;;  %v5032_v59 = vpop.f32.mrf.mxu1 }
  0xe1   : > { %v5034_v60 = vpop.f32.mrf.mxu0  ;;  %v5036_v61 = vpop.f32.mrf.mxu1 }
  0xe3   : > { %v5038_v62 = vpop.f32.mrf.mxu0  ;;  %v5040_v63 = vpop.f32.mrf.mxu1 }
  0xe5   : > { %v5042_v0 = vpop.f32.mrf.mxu0  ;;  %v5044_v1 = vpop.f32.mrf.mxu1 }
  0xe7   : > { %v5046_v3 = vpop.f32.mrf.mxu0  ;;  %v5048_v4 = vpop.f32.mrf.mxu1 }
  0xe9   : > { %v5050_v2 = vpop.f32.mrf.mxu0  ;;  %v5052_v6 = vpop.f32.mrf.mxu1 }
  0xeb   : > { %v5054_v7 = vpop.f32.mrf.mxu0  ;;  %v5056_v8 = vpop.f32.mrf.mxu1 }
  0xed   : > { %v5058_v9 = vpop.f32.mrf.mxu0  ;;  %v5060_v10 = vpop.f32.mrf.mxu1 }
  0xef   : > { %v5062_v11 = vpop.f32.mrf.mxu0  ;;  %v5064_v12 = vpop.f32.mrf.mxu1 }
  0xf1   : > { %v5066_v13 = vpop.f32.mrf.mxu0  ;;  %v5068_v14 = vpop.f32.mrf.mxu1 }
  0xf3   : > { %v5070_v15 = vpop.f32.mrf.mxu0  ;;  %v5072_v16 = vpop.f32.mrf.mxu1 }
  0xf4   : > { %5784 = vst [vmem:[#allocation2_spill] sm:$0xff] %v5070_v15  ;;  %5785 = vst [vmem:[#allocation3_spill] sm:$0xff] %v5072_v16 }
  0xf5   : > { %v5074_v17 = vpop.f32.mrf.mxu0  ;;  %v5076_v18 = vpop.f32.mrf.mxu1 }
  0xf6   : > { %5786 = vst [vmem:[#allocation4_spill] sm:$0xff] %v5074_v17  ;;  %5787 = vst [vmem:[#allocation5_spill] sm:$0xff] %v5076_v18 }
  0xf7   : > { %v5078_v19 = vpop.f32.mrf.mxu0  ;;  %v5080_v20 = vpop.f32.mrf.mxu1 }
  0xf8   : > { %5788 = vst [vmem:[#allocation6_spill] sm:$0xff] %v5078_v19  ;;  %5789 = vst [vmem:[#allocation7_spill] sm:$0xff] %v5080_v20 }
  0xf9   : > { %v5082_v21 = vpop.f32.mrf.mxu0  ;;  %v5084_v22 = vpop.f32.mrf.mxu1 }
  0xfa   : > { %5790 = vst [vmem:[#allocation8_spill] sm:$0xff] %v5082_v21  ;;  %5791 = vst [vmem:[#allocation9_spill] sm:$0xff] %v5084_v22 }
  0xfb   : > { %v5086_v23 = vpop.f32.mrf.mxu0  ;;  %v5088_v24 = vpop.f32.mrf.mxu1 }
  0xfc   : > { %5792 = vst [vmem:[#allocation10_spill] sm:$0xff] %v5086_v23  ;;  %5793 = vst [vmem:[#allocation11_spill] sm:$0xff] %v5088_v24 }
  0xfd   : > { %v5090_v25 = vpop.f32.mrf.mxu0  ;;  %v5092_v26 = vpop.f32.mrf.mxu1 }
  0xfe   : > { %5794 = vst [vmem:[#allocation12_spill] sm:$0xff] %v5090_v25  ;;  %5795 = vst [vmem:[#allocation13_spill] sm:$0xff] %v5092_v26 }
  0xff   : > { %v5094_v27 = vpop.f32.mrf.mxu0  ;;  %v5096_v28 = vpop.f32.mrf.mxu1 }
 0x100   : > { %5796 = vst [vmem:[#allocation14_spill] sm:$0xff] %v5094_v27  ;;  %5797 = vst [vmem:[#allocation15_spill] sm:$0xff] %v5096_v28 }
 0x101   : > { %v5098_v29 = vpop.f32.mrf.mxu0  ;;  %v5100_v30 = vpop.f32.mrf.mxu1 }
 0x102   : > { %5798 = vst [vmem:[#allocation16_spill] sm:$0xff] %v5098_v29  ;;  %5799 = vst [vmem:[#allocation17_spill] sm:$0xff] %v5100_v30 }
 0x103   : > { %v5102_v32 = vpop.f32.mrf.mxu0  ;;  %v5104_v33 = vpop.f32.mrf.mxu1 }
 0x104   : > { %5800 = vst [vmem:[#allocation18_spill] sm:$0xff] %v5102_v32  ;;  %5801 = vst [vmem:[#allocation19_spill] sm:$0xff] %v5104_v33 }
 0x105   : > { %v5106_v34 = vpop.f32.mrf.mxu0  ;;  %v5108_v35 = vpop.f32.mrf.mxu1 }
 0x106   : > { %5802 = vst [vmem:[#allocation20_spill] sm:$0xff] %v5106_v34  ;;  %5803 = vst [vmem:[#allocation21_spill] sm:$0xff] %v5108_v35 }
 0x107   : > { %v5110_v36 = vpop.f32.mrf.mxu0  ;;  %v5112_v37 = vpop.f32.mrf.mxu1 }
 0x108   : > { %5804 = vst [vmem:[#allocation22_spill] sm:$0xff] %v5110_v36  ;;  %5805 = vst [vmem:[#allocation23_spill] sm:$0xff] %v5112_v37 }
 0x109   : > { %v5114_v38 = vpop.f32.mrf.mxu0  ;;  %v5116_v39 = vpop.f32.mrf.mxu1 }
 0x10a   : > { %5806 = vst [vmem:[#allocation24_spill] sm:$0xff] %v5114_v38  ;;  %5807 = vst [vmem:[#allocation25_spill] sm:$0xff] %v5116_v39 }
 0x10b   : > { %v5118_v40 = vpop.f32.mrf.mxu0  ;;  %v5120_v41 = vpop.f32.mrf.mxu1 }
 0x10c   : > { %5808 = vst [vmem:[#allocation26_spill] sm:$0xff] %v5118_v40  ;;  %5809 = vst [vmem:[#allocation27_spill] sm:$0xff] %v5120_v41 }
 0x10d   : > { %v5122_v42 = vpop.f32.mrf.mxu0  ;;  %v5124_v43 = vpop.f32.mrf.mxu1 }
 0x10e   : > { %5810 = vst [vmem:[#allocation28_spill] sm:$0xff] %v5122_v42  ;;  %5811 = vst [vmem:[#allocation29_spill] sm:$0xff] %v5124_v43 }
 0x10f   : > { %v5126_v44 = vpop.f32.mrf.mxu0  ;;  %v5130_v46 = vpop.f32.mrf.mxu1 }
 0x111   : > { %v5134_v48 = vpop.f32.mrf.mxu0  ;;  %v5138_v50 = vpop.f32.mrf.mxu1 }
 0x113   : > { %v5142_v52 = vpop.f32.mrf.mxu0  ;;  %v5146_v53 = vpop.f32.mrf.mxu1 }
 0x115   : > { %v5150_v55 = vpop.f32.mrf.mxu0  ;;  %v5154_v57 = vpop.f32.mrf.mxu1 }
 0x116   : > { %5812 = vst [vmem:[#allocation30_spill] sm:$0xff] %v5154_v57 }
 0x117   : > { %v5158_v51 = vpop.f32.mrf.mxu0  ;;  %v5162_v49 = vpop.f32.mrf.mxu1 }
 0x118   : > { %5813 = vst [vmem:[#allocation31_spill] sm:$0xff] %v5158_v51  ;;  %5814 = vst [vmem:[#allocation32_spill] sm:$0xff] %v5162_v49 }
 0x119   : > { %v5166_v47 = vpop.f32.mrf.mxu0  ;;  %v5170_v45 = vpop.f32.mrf.mxu1 }
 0x11a   : > { %5815 = vst [vmem:[#allocation33_spill] sm:$0xff] %v5166_v47  ;;  %5816 = vst [vmem:[#allocation34_spill] sm:$0xff] %v5170_v45 }
 0x11b   : > { %v5174_v57 = vpop.f32.mrf.mxu0  ;;  %v5178_v51 = vpop.f32.mrf.mxu1 }
 0x11c   : > { %5817 = vst [vmem:[#allocation35_spill] sm:$0xff] %v5174_v57  ;;  %5818 = vst [vmem:[#allocation36_spill] sm:$0xff] %v5178_v51 }
 0x11d   : > { %v5182_v49 = vpop.f32.mrf.mxu0  ;;  %v5186_v47 = vpop.f32.mrf.mxu1 }
 0x11e   : > { %5819 = vst [vmem:[#allocation37_spill] sm:$0xff] %v5182_v49  ;;  %5820 = vst [vmem:[#allocation38_spill] sm:$0xff] %v5186_v47 }
 0x11f   : > { %v5190_v45 = vpop.f32.mrf.mxu0  ;;  %v5194_v57 = vpop.f32.mrf.mxu1 }
 0x120   : > { %5821 = vst [vmem:[#allocation39_spill] sm:$0xff] %v5190_v45  ;;  %5822 = vst [vmem:[#allocation40_spill] sm:$0xff] %v5194_v57 }
 0x121   : > { %v5198_v51 = vpop.f32.mrf.mxu0  ;;  %v5202_v49 = vpop.f32.mrf.mxu1 }
 0x122   : > { %5823 = vst [vmem:[#allocation41_spill] sm:$0xff] %v5198_v51  ;;  %5824 = vst [vmem:[#allocation42_spill] sm:$0xff] %v5202_v49 }
 0x123   : > { %v5206_v47 = vpop.f32.mrf.mxu0  ;;  %v5210_v45 = vpop.f32.mrf.mxu1 }
 0x124   : > { %5825 = vst [vmem:[#allocation43_spill] sm:$0xff] %v5206_v47  ;;  %5826 = vst [vmem:[#allocation44_spill] sm:$0xff] %v5210_v45 }
 0x125   : > { %v5214_v57 = vpop.f32.mrf.mxu0  ;;  %v5218_v51 = vpop.f32.mrf.mxu1 }
 0x126   : > { %5827 = vst [vmem:[#allocation45_spill] sm:$0xff] %v5214_v57  ;;  %5828 = vst [vmem:[#allocation46_spill] sm:$0xff] %v5218_v51 }
 0x127   : > { %v5222_v49 = vpop.f32.mrf.mxu0  ;;  %v5226_v47 = vpop.f32.mrf.mxu1 }
 0x128   : > { %5829 = vst [vmem:[#allocation47_spill] sm:$0xff] %v5222_v49  ;;  %5830 = vst [vmem:[#allocation48_spill] sm:$0xff] %v5226_v47 }
 0x129   : > { %v5230_v45 = vpop.f32.mrf.mxu0  ;;  %v5234_v57 = vpop.f32.mrf.mxu1 }
 0x12a   : > { %5831 = vst [vmem:[#allocation49_spill] sm:$0xff] %v5230_v45  ;;  %5832 = vst [vmem:[#allocation50_spill] sm:$0xff] %v5234_v57 }
 0x12b   : > { %v5238_v51 = vpop.f32.mrf.mxu0  ;;  %v5242_v49 = vpop.f32.mrf.mxu1 }
 0x12c   : > { %5833 = vst [vmem:[#allocation51_spill] sm:$0xff] %v5238_v51  ;;  %5834 = vst [vmem:[#allocation52_spill] sm:$0xff] %v5242_v49 }
 0x12d   : > { %v5246_v47 = vpop.f32.mrf.mxu0  ;;  %v5250_v45 = vpop.f32.mrf.mxu1 }
 0x12e   : > { %5835 = vst [vmem:[#allocation53_spill] sm:$0xff] %v5246_v47  ;;  %5836 = vst [vmem:[#allocation54_spill] sm:$0xff] %v5250_v45 }
 0x12f   : > { %v5254_v57 = vpop.f32.mrf.mxu0  ;;  %v5258_v51 = vpop.f32.mrf.mxu1 }
 0x130   : > { %5837 = vst [vmem:[#allocation55_spill] sm:$0xff] %v5254_v57  ;;  %5838 = vst [vmem:[#allocation56_spill] sm:$0xff] %v5258_v51 }
 0x131   : > { %v5262_v49 = vpop.f32.mrf.mxu0  ;;  %v5266_v47 = vpop.f32.mrf.mxu1 }
 0x132   : > { %5839 = vst [vmem:[#allocation57_spill] sm:$0xff] %v5262_v49  ;;  %5840 = vst [vmem:[#allocation58_spill] sm:$0xff] %v5266_v47 }
 0x133   : > { %v5270_v45 = vpop.f32.mrf.mxu0  ;;  %v5274_v57 = vpop.f32.mrf.mxu1 }
 0x134   : > { %5841 = vst [vmem:[#allocation59_spill] sm:$0xff] %v5270_v45  ;;  %5842 = vst [vmem:[#allocation60_spill] sm:$0xff] %v5274_v57 }
 0x135   : > { %v5278_v51 = vpop.f32.mrf.mxu0  ;;  %v5282_v49 = vpop.f32.mrf.mxu1 }
 0x136   : > { %5843 = vst [vmem:[#allocation61_spill] sm:$0xff] %v5278_v51  ;;  %5844 = vst [vmem:[#allocation62_spill] sm:$0xff] %v5282_v49 }
 0x137   : > { %v5286_v47 = vpop.f32.mrf.mxu0  ;;  %v5290_v45 = vpop.f32.mrf.mxu1 }
 0x138   : > { %5845 = vst [vmem:[#allocation63_spill] sm:$0xff] %v5286_v47  ;;  %5846 = vst [vmem:[#allocation64_spill] sm:$0xff] %v5290_v45 }
 0x139   : > { %v5294_v57 = vpop.f32.mrf.mxu0  ;;  %v5298_v51 = vpop.f32.mrf.mxu1 }
 0x13a   : > { %5847 = vst [vmem:[#allocation65_spill] sm:$0xff] %v5294_v57  ;;  %5848 = vst [vmem:[#allocation66_spill] sm:$0xff] %v5298_v51 }
 0x13b   : > { %v5302_v49 = vpop.f32.mrf.mxu0  ;;  %v5306_v47 = vpop.f32.mrf.mxu1 }
 0x13c   : > { %5849 = vst [vmem:[#allocation67_spill] sm:$0xff] %v5302_v49  ;;  %5850 = vst [vmem:[#allocation68_spill] sm:$0xff] %v5306_v47 }
 0x13d   : > { %v5310_v45 = vpop.f32.mrf.mxu0  ;;  %v5314_v57 = vpop.f32.mrf.mxu1 }
 0x13e   : > { %5851 = vst [vmem:[#allocation69_spill] sm:$0xff] %v5310_v45  ;;  %5852 = vst [vmem:[#allocation70_spill] sm:$0xff] %v5314_v57 }
 0x13f   : > { %v2311_v51 = vpop.f32.mrf.mxu0  ;;  %v2354_v39 = vpop.f32.mrf.mxu1 }
 0x141   : > { %v2313_v38 = vpop.f32.mrf.mxu0  ;;  %v2356_v37 = vpop.f32.mrf.mxu1 }
 0x143   : > { %v2315_v31 = vpop.f32.mrf.mxu0  ;;  %v2358_v49 = vpop.f32.mrf.mxu1 }
 0x145   : > { %v2317_v40 = vpop.f32.mrf.mxu0  ;;  %v2360_v36 = vpop.f32.mrf.mxu1 }
 0x147   : > { %v2397_v35 = vpop.f32.mrf.mxu0  ;;  %v2440_v54 = vpop.f32.mrf.mxu1 }
 0x149   : > { %v2399_v47 = vpop.f32.mrf.mxu0  ;;  %v2442_v41 = vpop.f32.mrf.mxu1 }
 0x14b   : > { %v2401_v34 = vpop.f32.mrf.mxu0  ;;  %v2444_v33 = vpop.f32.mrf.mxu1 }
 0x14d   : > { %v2403_v56 = vpop.f32.mrf.mxu0  ;;  %v2446_v45 = vpop.f32.mrf.mxu1 }
 0x14f   : > { %v2483_v42 = vpop.f32.mrf.mxu0  ;;  %v2526_v32 = vpop.f32.mrf.mxu1 }
 0x151   : > { %v2485_v30 = vpop.f32.mrf.mxu0  ;;  %v2528_v58 = vpop.f32.mrf.mxu1 }
 0x153   : > { %v2487_v57 = vpop.f32.mrf.mxu0  ;;  %v2530_v43 = vpop.f32.mrf.mxu1 }
 0x155   : > { %v2489_v29 = vpop.f32.mrf.mxu0  ;;  %v2532_v28 = vpop.f32.mrf.mxu1 }
 0x157   : > { %v2569_v27 = vpop.f32.mrf.mxu0  ;;  %v2612_v26 = vpop.f32.mrf.mxu1 }
 0x159   : > { %v5318_v25 = vpop.f32.mrf.mxu0  ;;  %v5320_v24 = vpop.f32.mrf.mxu1 }
 0x15a   : > { %5853 = vst [vmem:[#allocation71_spill] sm:$0xff] %v5318_v25  ;;  %5854 = vst [vmem:[#allocation72_spill] sm:$0xff] %v5320_v24 }
 0x15b   : > { %v5322_v23 = vpop.f32.mrf.mxu0  ;;  %v5324_v22 = vpop.f32.mrf.mxu1 }
 0x15c   : > { %5855 = vst [vmem:[#allocation73_spill] sm:$0xff] %v5322_v23  ;;  %5856 = vst [vmem:[#allocation74_spill] sm:$0xff] %v5324_v22 }
 0x15d   : > { %v5326_v21 = vpop.f32.mrf.mxu0  ;;  %v5328_v20 = vpop.f32.mrf.mxu1 }
 0x15e   : > { %5857 = vst [vmem:[#allocation75_spill] sm:$0xff] %v5326_v21  ;;  %5858 = vst [vmem:[#allocation76_spill] sm:$0xff] %v5328_v20 }
 0x15f   : > { %v5330_v19 = vpop.f32.mrf.mxu0  ;;  %v5332_v18 = vpop.f32.mrf.mxu1 }
 0x160   : > { %5859 = vst [vmem:[#allocation77_spill] sm:$0xff] %v5330_v19  ;;  %5860 = vst [vmem:[#allocation78_spill] sm:$0xff] %v5332_v18 }
 0x161   : > { %v5334_v17 = vpop.f32.mrf.mxu0  ;;  %v5336_v16 = vpop.f32.mrf.mxu1 }
 0x162   : > { %5861 = vst [vmem:[#allocation79_spill] sm:$0xff] %v5334_v17  ;;  %5862 = vst [vmem:[#allocation80_spill] sm:$0xff] %v5336_v16  ;;  %v5872_v16 = vmax.f32 %v5030_v5, %v5126_v44  ;;  %v5877_v5 = vmax.f32 %v5040_v63, %v5146_v53  ;;  %v5883_v63 = vld [vmem:[#allocation32_spill] sm:$0xff] }
 0x163   : > { %v5338_v15 = vpop.f32.mrf.mxu0  ;;  %v5340_v25 = vpop.f32.mrf.mxu1 }
 0x164   : > { %5863 = vst [vmem:[#allocation81_spill] sm:$0xff] %v5338_v15  ;;  %5864 = vst [vmem:[#allocation82_spill] sm:$0xff] %v5340_v25  ;;  %v2793_v15 = vmax.f32 %v5872_v16, %v2311_v51  ;;  %v5873_v25 = vmax.f32 %v5032_v59, %v5130_v46  ;;  %v2819_v16 = vmax.f32 %v5877_v5, %v2358_v49  ;;  %v5899_v5 = vld [vmem:[#allocation40_spill] sm:$0xff] }
 0x165   : > { %v5342_v24 = vpop.f32.mrf.mxu0  ;;  %v5344_v23 = vpop.f32.mrf.mxu1 }
 0x166   : > { %5865 = vst [vmem:[#allocation83_spill] sm:$0xff] %v5342_v24  ;;  %5866 = vst [vmem:[#allocation84_spill] sm:$0xff] %v5344_v23  ;;  %v2795_v24 = vmax.f32 %v5873_v25, %v2354_v39  ;;  %v5378_v25 = vpop.permute.xlu0 %3746  ;;  %v5884_v39 = vmax.f32 %v5048_v4, %v5883_v63  ;;  %v5891_v4 = vld [vmem:[#allocation36_spill] sm:$0xff] }
 0x167   : > { %v5346_v22 = vpop.f32.mrf.mxu0  ;;  %v5348_v21 = vpop.f32.mrf.mxu1  ;;  %v5892_v51 = vmax.f32 %v5056_v8, %v5891_v4 }
 0x168   : > { %5867 = vst [vmem:[#allocation85_spill] sm:$0xff] %v5346_v22  ;;  %5868 = vst [vmem:[#allocation86_spill] sm:$0xff] %v5348_v21  ;;  %v5874_v22 = vmax.f32 %v5034_v60, %v5134_v48  ;;  %v5878_v60 = vmax.f32 %v5042_v0, %v5150_v55  ;;  %v5394_v44 = vmax.f32 %v5884_v39, %v2440_v54  ;;  %v5885_v48 = vld [vmem:[#allocation33_spill] sm:$0xff] }
 0x169   : > { %v5350_v20 = vpop.f32.mrf.mxu0  ;;  %v5352_v19 = vpop.f32.mrf.mxu1  ;;  %v5886_v0 = vmax.f32 %v5050_v2, %v5885_v48  ;;  %v5893_v2 = vld [vmem:[#allocation37_spill] sm:$0xff] }
 0x16a   : > { %5869 = vst [vmem:[#allocation87_spill] sm:$0xff] %v5350_v20  ;;  %5870 = vst [vmem:[#allocation88_spill] sm:$0xff] %v5352_v19  ;;  %v2794_v21 = vmax.f32 %v5874_v22, %v2313_v38  ;;  %v5875_v20 = vmax.f32 %v5036_v61, %v5138_v50  ;;  %v2818_v22 = vmax.f32 %v5878_v60, %v2317_v40  ;;  %v5879_v38 = vld [vmem:[#allocation30_spill] sm:$0xff] }
 0x16b   : > { %v5354_v18 = vpop.f32.mrf.mxu0  ;;  %v5362_v17 = vpop.f32.mrf.mxu1  ;;  %v5880_v61 = vmax.f32 %v5044_v1, %v5879_v38  ;;  %v5401_v40 = vmax.f32 %v5886_v0, %v2399_v47  ;;  %v5887_v1 = vld [vmem:[#allocation34_spill] sm:$0xff]  ;;  %v5894_v47 = vmax.f32 %v5058_v9, %v5893_v2  ;;  %v5900_v60 = vmax.f32 %v5064_v12, %v5899_v5  ;;  %v5901_v9 = vld [vmem:[#allocation41_spill] sm:$0xff]  ;;  %v5908_v12 = vld [vmem:[#allocation3_spill] sm:$0xff] }
 0x16c   : > { %5871 = vst [vmem:[#allocation89_spill] sm:$0xff] %v5354_v18  ;;  %v2796_v19 = vmax.f32 %v5875_v20, %v2356_v37  ;;  %v5876_v18 = vmax.f32 %v5038_v62, %v5142_v52  ;;  %v5881_v37 = vld [vmem:[#allocation31_spill] sm:$0xff]  ;;  %v5416_v52 = vmax.f32 %v5892_v51, %v2444_v33  ;;  %v5471_v2 = vpop.permute.xlu0 %3751 }
 0x16d   : > { %v5376_v59 = vpop.f32.mrf.mxu0  ;;  %v2820_v20 = vmax.f32 %v5880_v61, %v2360_v36  ;;  %v5882_v62 = vmax.f32 %v5046_v3, %v5881_v37  ;;  %v5396_v46 = vpop.f32.mrf.mxu1  ;;  %v5888_v36 = vmax.f32 %v5052_v6, %v5887_v1  ;;  %v5889_v3 = vld [vmem:[#allocation35_spill] sm:$0xff]  ;;  %v5421_v53 = vmax.f32 %v5894_v47, %v2403_v56  ;;  %v5895_v6 = vld [vmem:[#allocation38_spill] sm:$0xff] }
 0x16e   : > { %v2817_v23 = vmax.f32 %v5876_v18, %v2315_v31  ;;  %v5436_v38 = vmax.f32 %v5900_v60, %v2526_v32  ;;  %v5902_v56 = vmax.f32 %v5066_v13, %v5901_v9  ;;  %v5909_v32 = vld [vmem:[#allocation44_spill] sm:$0xff]  ;;  %v5918_v47 = vld [vmem:[#allocation47_spill] sm:$0xff]  ;;  %v5925_v9 = vld [vmem:[#allocation49_spill] sm:$0xff] }
 0x16f   : > { %v5389_v18 = vmax.f32 %v5882_v62, %v2397_v35  ;;  %v5406_v49 = vmax.f32 %v5888_v36, %v2442_v41  ;;  %v5890_v35 = vmax.f32 %v5054_v7, %v5889_v3  ;;  %v3212_v31 = vpop.f32.mrf.mxu0  ;;  %v5896_v41 = vmax.f32 %v5060_v10, %v5895_v6  ;;  %v5897_v7 = vld [vmem:[#allocation39_spill] sm:$0xff]  ;;  %v3255_v33 = vpop.f32.mrf.mxu1  ;;  %v5903_v10 = vld [vmem:[#allocation42_spill] sm:$0xff]  ;;  %v5911_v36 = vld [vmem:[#allocation4_spill] sm:$0xff] }
 0x170   : > { %v3694_v8 = vmax.f32 %v2793_v15, %v3212_v31  ;;  %v5441_v61 = vmax.f32 %v5902_v56, %v2485_v30  ;;  %v5905_v62 = vld [vmem:[#allocation2_spill] sm:$0xff]  ;;  %v5906_v15 = vld [vmem:[#allocation43_spill] sm:$0xff]  ;;  %v5910_v48 = vmax.f32 %v5908_v12, %v5909_v32  ;;  %v5924_v60 = vld [vmem:[#allocation8_spill] sm:$0xff] }
 0x171   : > { %v5411_v50 = vmax.f32 %v5890_v35, %v2401_v34  ;;  %v5426_v54 = vmax.f32 %v5896_v41, %v2446_v45  ;;  %v5898_v34 = vmax.f32 %v5062_v11, %v5897_v7  ;;  %v5904_v45 = vmax.f32 %v5068_v14, %v5903_v10  ;;  %v3257_v1 = vpop.f32.mrf.mxu1  ;;  %v5912_v14 = vld [vmem:[#allocation45_spill] sm:$0xff]  ;;  %v5915_v35 = vld [vmem:[#allocation46_spill] sm:$0xff]  ;;  %v5920_v7 = vld [vmem:[#allocation7_spill] sm:$0xff] }
 0x172   : > { %v3696_v11 = vmax.f32 %v2795_v24, %v3255_v33  ;;  %v5907_v63 = vmax.f32 %v5905_v62, %v5906_v15  ;;  %v5456_v0 = vmax.f32 %v5910_v48, %v2530_v43  ;;  %v3754_v30 = vadd.f32 %v5378_v25, %v3694_v8  ;;  %v5914_v24 = vld [vmem:[#allocation5_spill] sm:$0xff] }
 0x173   : > { %v5431_v55 = vmax.f32 %v5898_v34, %v2483_v42  ;;  %v5446_v37 = vmax.f32 %v5904_v45, %v2528_v58  ;;  %v3214_v42 = vpop.f32.mrf.mxu0  ;;  %v5913_v58 = vmax.f32 %v5911_v36, %v5912_v14  ;;  %v5916_v4 = vmax.f32 %v5914_v24, %v5915_v35  ;;  %v3259_v5 = vpop.f32.mrf.mxu1  ;;  %v5927_v45 = vld [vmem:[#allocation72_spill] sm:$0xff]  ;;  %v5932_v35 = vld [vmem:[#allocation10_spill] sm:$0xff] }
 0x174   : > { %v5451_v39 = vmax.f32 %v5907_v63, %v2487_v57  ;;  %v3695_v13 = vmax.f32 %v2794_v21, %v3214_v42  ;;  %v3697_v57 = vmax.f32 %v2796_v19, %v3257_v1  ;;  %v3756_v31 = vadd.f32 %v5378_v25, %v3696_v11  ;;  %v5917_v21 = vld [vmem:[#allocation6_spill] sm:$0xff]  ;;  %v5923_v19 = vld [vmem:[#allocation71_spill] sm:$0xff]  ;;  %v5928_v11 = vld [vmem:[#allocation9_spill] sm:$0xff] }
 0x175   : > { %v5462_v3 = vmax.f32 %v5913_v58, %v2489_v29  ;;  %v5467_v51 = vmax.f32 %v5916_v4, %v2532_v28  ;;  %v3216_v43 = vpop.f32.mrf.mxu0  ;;  %v5919_v6 = vmax.f32 %v5917_v21, %v5918_v47  ;;  %v5921_v29 = vld [vmem:[#allocation48_spill] sm:$0xff]  ;;  %v5926_v56 = vmax.f32 %v5924_v60, %v5925_v9  ;;  %v5929_v42 = vld [vmem:[#allocation50_spill] sm:$0xff] }
 0x176   : > { %v5922_v34 = vmax.f32 %v5920_v7, %v5921_v29  ;;  %v3755_v28 = vadd.f32 %v5378_v25, %v3695_v13  ;;  %v3718_v33 = vmax.f32 %v2817_v23, %v3216_v43  ;;  %v3757_v15 = vadd.f32 %v5378_v25, %v3697_v57  ;;  %v3261_v13 = vpop.f32.mrf.mxu1  ;;  %v5937_v7 = vld [vmem:[#allocation52_spill] sm:$0xff] }
 0x177   : > { %v5476_v41 = vmax.f32 %v5919_v6, %v2569_v27  ;;  %v5488_v10 = vmax.f32 %v5926_v56, %v5923_v19  ;;  %v5930_v27 = vmax.f32 %v5928_v11, %v5929_v42  ;;  %v3218_v63 = vpop.f32.mrf.mxu0  ;;  %v3802_v12 = vmax.f32 %v3754_v30, 0.0  ;;  %v5933_v30 = vld [vmem:[#allocation51_spill] sm:$0xff]  ;;  %v5935_v6 = vld [vmem:[#allocation74_spill] sm:$0xff] }
 0x178   : > { %v5481_v8 = vmax.f32 %v5922_v34, %v2612_v26  ;;  %v3720_v26 = vmax.f32 %v2819_v16, %v3259_v5  ;;  %v3803_v32 = vmax.f32 %v3755_v28, 0.0  ;;  %v3719_v23 = vmax.f32 %v2818_v22, %v3218_v63  ;;  %v5931_v16 = vld [vmem:[#allocation73_spill] sm:$0xff]  ;;  %v3341_v47 = vpop.f32.mrf.mxu1 }
 0x179   : > { %v5494_v62 = vmax.f32 %v5930_v27, %v5927_v45  ;;  %v3778_v48 = vadd.f32 %v5471_v2, %v3718_v33  ;;  %v3804_v1 = vmax.f32 %v3756_v31, 0.0  ;;  %v3805_v36 = vmax.f32 %v3757_v15, 0.0  ;;  %v3298_v24 = vpop.f32.mrf.mxu0  ;;  %v5936_v31 = vld [vmem:[#allocation11_spill] sm:$0xff]  ;;  %v5941_v63 = vld [vmem:[#allocation53_spill] sm:$0xff] }
 0x17a   : > { %v3721_v14 = vmax.f32 %v2820_v20, %v3261_v13  ;;  %v3780_v58 = vadd.f32 %v5471_v2, %v3720_v26  ;;  %v5934_v4 = vmax.f32 %v5932_v35, %v5933_v30  ;;  %v4494_v57 = vpack.c.bf16 %v3803_v32, %v3802_v12  ;;  %v3343_v56 = vpop.f32.mrf.mxu1  ;;  %v5939_v26 = vld [vmem:[#allocation75_spill] sm:$0xff] }
 0x17b   : > { %v3779_v43 = vadd.f32 %v5471_v2, %v3719_v23  ;;  %v3698_v21 = vmax.f32 %v5389_v18, %v3298_v24  ;;  %v5938_v20 = vmax.f32 %v5936_v31, %v5937_v7  ;;  %v4495_v34 = vpack.c.bf16 %v3805_v36, %v3804_v1  ;;  %v3300_v5 = vpop.f32.mrf.mxu0  ;;  %v5943_v1 = vld [vmem:[#allocation76_spill] sm:$0xff]  ;;  %v5944_v36 = vld [vmem:[#allocation13_spill] sm:$0xff] }
 0x17c   : > { %v5508_v22 = vmax.f32 %v5934_v4, %v5931_v16  ;;  %v3781_v28 = vadd.f32 %v5471_v2, %v3721_v14  ;;  %v3700_v33 = vmax.f32 %v5394_v44, %v3341_v47  ;;  %3994 = vst [vmem:[%s5501_s29] sm:$0xff] %v4494_v57  ;;  %v3826_v19 = vmax.f32 %v3778_v48, 0.0  ;;  %v5940_v44 = vld [vmem:[#allocation12_spill] sm:$0xff]  ;;  %v3345_v13 = vpop.f32.mrf.mxu1  ;;  %v5945_v14 = vld [vmem:[#allocation54_spill] sm:$0xff] }
 0x17d   : > { %v5516_v29 = vmax.f32 %v5938_v20, %v5935_v6  ;;  %v3827_v60 = vmax.f32 %v3779_v43, 0.0  ;;  %v3758_v9 = vadd.f32 %v5378_v25, %v3698_v21  ;;  %v3699_v18 = vmax.f32 %v5401_v40, %v3300_v5  ;;  %3995 = vst [vmem:[%s5501_s29 + $0x8] sm:$0xff] %v4495_v34  ;;  %v3302_v15 = vpop.f32.mrf.mxu0  ;;  %v5947_v34 = vld [vmem:[#allocation77_spill] sm:$0xff] }
 0x17e   : > { %v3828_v45 = vmax.f32 %v3780_v58, 0.0  ;;  %v3829_v11 = vmax.f32 %v3781_v28, 0.0  ;;  %v3760_v42 = vadd.f32 %v5378_v25, %v3700_v33  ;;  %v3701_v27 = vmax.f32 %v5406_v49, %v3343_v56  ;;  %v3347_v21 = vpop.f32.mrf.mxu1  ;;  %v5949_v28 = vld [vmem:[#allocation55_spill] sm:$0xff] }
 0x17f   : > { %v5942_v12 = vmax.f32 %v5940_v44, %v5941_v63  ;;  %v4506_v23 = vpack.c.bf16 %v3827_v60, %v3826_v19  ;;  %v3759_v40 = vadd.f32 %v5378_v25, %v3699_v18  ;;  %v3722_v48 = vmax.f32 %v5411_v50, %v3302_v15  ;;  %v3304_v30 = vpop.f32.mrf.mxu0  ;;  %v5951_v18 = vld [vmem:[#allocation78_spill] sm:$0xff]  ;;  %v5952_v56 = vld [vmem:[#allocation15_spill] sm:$0xff] }
 0x180   : > { %v5946_v58 = vmax.f32 %v5944_v36, %v5945_v14  ;;  %v4507_v49 = vpack.c.bf16 %v3829_v11, %v3828_v45  ;;  %v3761_v16 = vadd.f32 %v5378_v25, %v3701_v27  ;;  %v3724_v35 = vmax.f32 %v5416_v52, %v3345_v13  ;;  %v5948_v52 = vld [vmem:[#allocation14_spill] sm:$0xff]  ;;  %v5953_v45 = vld [vmem:[#allocation56_spill] sm:$0xff]  ;;  %v5955_v14 = vld [vmem:[#allocation79_spill] sm:$0xff] }
 0x181   : > { %v5530_v32 = vmax.f32 %v5942_v12, %v5939_v26  ;;  %4009 = vst [vmem:[%s5501_s29 + $0x60] sm:$0xff] %v4506_v23  ;;  %v3806_v4 = vmax.f32 %v3758_v9, 0.0  ;;  %v3807_v57 = vmax.f32 %v3759_v40, 0.0  ;;  %v3782_v43 = vadd.f32 %v5471_v2, %v3722_v48  ;;  %v3384_v20 = vpop.f32.mrf.mxu0  ;;  %v3427_v9 = vpop.f32.mrf.mxu1 }
 0x182   : > { %v5538_v24 = vmax.f32 %v5946_v58, %v5943_v1  ;;  %v3723_v50 = vmax.f32 %v5421_v53, %v3304_v30  ;;  %4010 = vst [vmem:[%s5501_s29 + $0x68] sm:$0xff] %v4507_v49  ;;  %v3808_v47 = vmax.f32 %v3760_v42, 0.0  ;;  %v3809_v6 = vmax.f32 %v3761_v16, 0.0  ;;  %v5957_v58 = vld [vmem:[#allocation57_spill] sm:$0xff] }
 0x183   : > { %v3784_v31 = vadd.f32 %v5471_v2, %v3724_v35  ;;  %v3725_v7 = vmax.f32 %v5426_v54, %v3347_v21  ;;  %v5950_v33 = vmax.f32 %v5948_v52, %v5949_v28  ;;  %v4496_v19 = vpack.c.bf16 %v3807_v57, %v3806_v4  ;;  %v3386_v26 = vpop.f32.mrf.mxu0  ;;  %v3429_v23 = vpop.f32.mrf.mxu1  ;;  %v5959_v57 = vld [vmem:[#allocation80_spill] sm:$0xff] }
 0x184   : > { %v3783_v53 = vadd.f32 %v5471_v2, %v3723_v50  ;;  %v3702_v60 = vmax.f32 %v5431_v55, %v3384_v20  ;;  %v5954_v11 = vmax.f32 %v5952_v56, %v5953_v45  ;;  %v4497_v54 = vpack.c.bf16 %v3809_v6, %v3808_v47  ;;  %v5961_v50 = vld [vmem:[#allocation58_spill] sm:$0xff]  ;;  %v5965_v56 = vld [vmem:[#allocation59_spill] sm:$0xff] }
 0x185   : > { %v5552_v5 = vmax.f32 %v5950_v33, %v5947_v34  ;;  %v3785_v27 = vadd.f32 %v5471_v2, %v3725_v7  ;;  %v3704_v15 = vmax.f32 %v5436_v38, %v3427_v9  ;;  %3996 = vst [vmem:[%s5501_s29 + $0x10] sm:$0xff] %v4496_v19  ;;  %v3830_v44 = vmax.f32 %v3782_v43, 0.0  ;;  %v3388_v36 = vpop.f32.mrf.mxu0  ;;  %v5956_v38 = vld [vmem:[#allocation16_spill] sm:$0xff]  ;;  %v3431_v4 = vpop.f32.mrf.mxu1  ;;  %v5960_v43 = vld [vmem:[#allocation17_spill] sm:$0xff] }
 0x186   : > { %v5560_v42 = vmax.f32 %v5954_v11, %v5951_v18  ;;  %v3831_v63 = vmax.f32 %v3783_v53, 0.0  ;;  %v3762_v12 = vadd.f32 %v5378_v25, %v3702_v60  ;;  %v3703_v55 = vmax.f32 %v5441_v61, %v3386_v26  ;;  %3997 = vst [vmem:[%s5501_s29 + $0x18] sm:$0xff] %v4497_v54  ;;  %v5963_v18 = vld [vmem:[#allocation81_spill] sm:$0xff]  ;;  %v5967_v26 = vld [vmem:[#allocation82_spill] sm:$0xff] }
 0x187   : > { %v3832_v40 = vmax.f32 %v3784_v31, 0.0  ;;  %v3833_v48 = vmax.f32 %v3785_v27, 0.0  ;;  %v3764_v13 = vadd.f32 %v5378_v25, %v3704_v15  ;;  %v3705_v1 = vmax.f32 %v5446_v37, %v3429_v23  ;;  %v3390_v7 = vpop.f32.mrf.mxu0  ;;  %v3433_v28 = vpop.f32.mrf.mxu1 }
 0x188   : > { %v5958_v49 = vmax.f32 %v5956_v38, %v5957_v58  ;;  %v4508_v35 = vpack.c.bf16 %v3831_v63, %v3830_v44  ;;  %v3763_v61 = vadd.f32 %v5378_v25, %v3703_v55  ;;  %v3726_v30 = vmax.f32 %v5451_v39, %v3388_v36  ;;  %v5968_v44 = vld [vmem:[#allocation19_spill] sm:$0xff]  ;;  %v5969_v63 = vld [vmem:[#allocation60_spill] sm:$0xff] }
 0x189   : > { %v5962_v21 = vmax.f32 %v5960_v43, %v5961_v50  ;;  %v4509_v37 = vpack.c.bf16 %v3833_v48, %v3832_v40  ;;  %v3765_v6 = vadd.f32 %v5378_v25, %v3705_v1  ;;  %v3728_v31 = vmax.f32 %v5456_v0, %v3431_v4  ;;  %v3470_v9 = vpop.f32.mrf.mxu0  ;;  %v5964_v0 = vld [vmem:[#allocation18_spill] sm:$0xff]  ;;  %v3513_v15 = vpop.f32.mrf.mxu1  ;;  %v5973_v4 = vld [vmem:[#allocation61_spill] sm:$0xff] }
 0x18a   : > { %v5574_v16 = vmax.f32 %v5958_v49, %v5955_v14  ;;  %4011 = vst [vmem:[%s5501_s29 + $0x70] sm:$0xff] %v4508_v35  ;;  %v3810_v20 = vmax.f32 %v3762_v12, 0.0  ;;  %v3811_v34 = vmax.f32 %v3763_v61, 0.0  ;;  %v3786_v52 = vadd.f32 %v5471_v2, %v3726_v30  ;;  %v5971_v30 = vld [vmem:[#allocation83_spill] sm:$0xff] }
 0x18b   : > { %v5582_v47 = vmax.f32 %v5962_v21, %v5959_v57  ;;  %v3727_v39 = vmax.f32 %v5462_v3, %v3390_v7  ;;  %4012 = vst [vmem:[%s5501_s29 + $0x78] sm:$0xff] %v4509_v37  ;;  %v3812_v33 = vmax.f32 %v3764_v13, 0.0  ;;  %v3813_v19 = vmax.f32 %v3765_v6, 0.0  ;;  %v3472_v48 = vpop.f32.mrf.mxu0  ;;  %v3515_v14 = vpop.f32.mrf.mxu1  ;;  %v5975_v6 = vld [vmem:[#allocation84_spill] sm:$0xff]  ;;  %v5977_v7 = vld [vmem:[#allocation62_spill] sm:$0xff] }
 0x18c   : > { %v3788_v53 = vadd.f32 %v5471_v2, %v3728_v31  ;;  %v3729_v60 = vmax.f32 %v5467_v51, %v3433_v28  ;;  %v5966_v45 = vmax.f32 %v5964_v0, %v5965_v56  ;;  %v4498_v54 = vpack.c.bf16 %v3811_v34, %v3810_v20  ;;  %v5976_v31 = vld [vmem:[#allocation21_spill] sm:$0xff] }
 0x18d   : > { %v3787_v3 = vadd.f32 %v5471_v2, %v3727_v39  ;;  %v3706_v27 = vmax.f32 %v5476_v41, %v3470_v9  ;;  %v5970_v12 = vmax.f32 %v5968_v44, %v5969_v63  ;;  %v4499_v51 = vpack.c.bf16 %v3813_v19, %v3812_v33  ;;  %v3474_v61 = vpop.f32.mrf.mxu0  ;;  %v3517_v37 = vpop.f32.mrf.mxu1 }
 0x18e   : > { %v5596_v11 = vmax.f32 %v5966_v45, %v5963_v18  ;;  %v3789_v23 = vadd.f32 %v5471_v2, %v3729_v60  ;;  %v3708_v40 = vmax.f32 %v5481_v8, %v3513_v15  ;;  %3998 = vst [vmem:[%s5501_s29 + $0x20] sm:$0xff] %v4498_v54  ;;  %v3834_v13 = vmax.f32 %v3786_v52, 0.0  ;;  %v5972_v8 = vld [vmem:[#allocation20_spill] sm:$0xff]  ;;  %v5979_v54 = vld [vmem:[#allocation85_spill] sm:$0xff] }
 0x18f   : > { %v5604_v55 = vmax.f32 %v5970_v12, %v5967_v26  ;;  %v3835_v1 = vmax.f32 %v3787_v3, 0.0  ;;  %v3766_v36 = vadd.f32 %v5378_v25, %v3706_v27  ;;  %v3707_v41 = vmax.f32 %v5488_v10, %v3472_v48  ;;  %3999 = vst [vmem:[%s5501_s29 + $0x28] sm:$0xff] %v4499_v51  ;;  %v3476_v28 = vpop.f32.mrf.mxu0  ;;  %v3519_v60 = vpop.f32.mrf.mxu1  ;;  %v5981_v3 = vld [vmem:[#allocation63_spill] sm:$0xff]  ;;  %v5983_v12 = vld [vmem:[#allocation86_spill] sm:$0xff] }
 0x190   : > { %v3836_v38 = vmax.f32 %v3788_v53, 0.0  ;;  %v3837_v58 = vmax.f32 %v3789_v23, 0.0  ;;  %v3768_v49 = vadd.f32 %v5378_v25, %v3708_v40  ;;  %v3709_v35 = vmax.f32 %v5494_v62, %v3515_v14  ;;  %v5984_v51 = vld [vmem:[#allocation23_spill] sm:$0xff]  ;;  %v5985_v23 = vld [vmem:[#allocation64_spill] sm:$0xff] }
 0x191   : > { %v5974_v57 = vmax.f32 %v5972_v8, %v5973_v4  ;;  %v4510_v50 = vpack.c.bf16 %v3835_v1, %v3834_v13  ;;  %v3767_v10 = vadd.f32 %v5378_v25, %v3707_v41  ;;  %v3730_v21 = vmax.f32 %v5508_v22, %v3474_v61  ;;  %v3556_v45 = vpop.f32.mrf.mxu0  ;;  %v3599_v63 = vpop.f32.mrf.mxu1  ;;  %v5987_v4 = vld [vmem:[#allocation87_spill] sm:$0xff] }
 0x192   : > { %v5978_v20 = vmax.f32 %v5976_v31, %v5977_v7  ;;  %v4511_v62 = vpack.c.bf16 %v3837_v58, %v3836_v38  ;;  %v3769_v52 = vadd.f32 %v5378_v25, %v3709_v35  ;;  %v3732_v39 = vmax.f32 %v5516_v29, %v3517_v37  ;;  %v5980_v29 = vld [vmem:[#allocation22_spill] sm:$0xff]  ;;  %v5991_v31 = vld [vmem:[#allocation88_spill] sm:$0xff]  ;;  %v5992_v7 = vld [vmem:[#allocation25_spill] sm:$0xff] }
 0x193   : > { %v5618_v43 = vmax.f32 %v5974_v57, %v5971_v30  ;;  %4013 = vst [vmem:[%s5501_s29 + $0x80] sm:$0xff] %v4510_v50  ;;  %v3814_v33 = vmax.f32 %v3766_v36, 0.0  ;;  %v3815_v19 = vmax.f32 %v3767_v10, 0.0  ;;  %v3790_v53 = vadd.f32 %v5471_v2, %v3730_v21  ;;  %v3558_v36 = vpop.f32.mrf.mxu0  ;;  %v5989_v57 = vld [vmem:[#allocation65_spill] sm:$0xff] }
 0x194   : > { %v5626_v34 = vmax.f32 %v5978_v20, %v5975_v6  ;;  %v3731_v22 = vmax.f32 %v5530_v32, %v3476_v28  ;;  %4014 = vst [vmem:[%s5501_s29 + $0x88] sm:$0xff] %v4511_v62  ;;  %v3816_v9 = vmax.f32 %v3768_v49, 0.0  ;;  %v3817_v18 = vmax.f32 %v3769_v52, 0.0  ;;  %v5993_v20 = vld [vmem:[#allocation66_spill] sm:$0xff] }
 0x195   : > { %v3792_v0 = vadd.f32 %v5471_v2, %v3732_v39  ;;  %v3733_v56 = vmax.f32 %v5538_v24, %v3519_v60  ;;  %v5982_v27 = vmax.f32 %v5980_v29, %v5981_v3  ;;  %v4500_v26 = vpack.c.bf16 %v3815_v19, %v3814_v33  ;;  %v3560_v8 = vpop.f32.mrf.mxu0  ;;  %v5997_v29 = vld [vmem:[#allocation67_spill] sm:$0xff] }
 0x196   : > { %v3791_v44 = vadd.f32 %v5471_v2, %v3731_v22  ;;  %v3710_v32 = vmax.f32 %v5552_v5, %v3556_v45  ;;  %v5986_v40 = vmax.f32 %v5984_v51, %v5985_v23  ;;  %v4501_v13 = vpack.c.bf16 %v3817_v18, %v3816_v9  ;;  %v3601_v5 = vpop.f32.mrf.mxu1  ;;  %v5995_v45 = vld [vmem:[#allocation89_spill] sm:$0xff] }
 0x197   : > { %v2813_v15 = vmax.f32 %v5982_v27, %v5979_v54  ;;  %v3793_v24 = vadd.f32 %v5471_v2, %v3733_v56  ;;  %v3712_v1 = vmax.f32 %v5560_v42, %v3599_v63  ;;  %4000 = vst [vmem:[%s5501_s29 + $0x30] sm:$0xff] %v4500_v26  ;;  %v3838_v41 = vmax.f32 %v3790_v53, 0.0  ;;  %v5988_v42 = vld [vmem:[#allocation24_spill] sm:$0xff]  ;;  %v3562_v33 = vpop.f32.mrf.mxu0  ;;  %v5996_v54 = vld [vmem:[#allocation26_spill] sm:$0xff]  ;;  %v5999_v63 = vld [vmem:[#allocation27_spill] sm:$0xff] }
 0x198   : > { %v2815_v48 = vmax.f32 %v5986_v40, %v5983_v12  ;;  %v3839_v14 = vmax.f32 %v3791_v44, 0.0  ;;  %v3770_v38 = vadd.f32 %v5378_v25, %v3710_v32  ;;  %v3711_v58 = vmax.f32 %v5574_v16, %v3558_v36  ;;  %4001 = vst [vmem:[%s5501_s29 + $0x38] sm:$0xff] %v4501_v13  ;;  %v3603_v6 = vpop.f32.mrf.mxu1  ;;  %v6000_v12 = vld [vmem:[#allocation68_spill] sm:$0xff] }
 0x199   : > { %v3840_v49 = vmax.f32 %v3792_v0, 0.0  ;;  %v3841_v35 = vmax.f32 %v3793_v24, 0.0  ;;  %v3772_v61 = vadd.f32 %v5378_v25, %v3712_v1  ;;  %v3713_v30 = vmax.f32 %v5582_v47, %v3601_v5 }
 0x19a   : > { %v5990_v50 = vmax.f32 %v5988_v42, %v5989_v57  ;;  %v4512_v21 = vpack.c.bf16 %v3839_v14, %v3838_v41  ;;  %v3771_v37 = vadd.f32 %v5378_v25, %v3711_v58  ;;  %v3734_v16 = vmax.f32 %v5596_v11, %v3560_v8  ;;  %v3605_v60 = vpop.f32.mrf.mxu1 }
 0x19b   : > { %v5994_v62 = vmax.f32 %v5992_v7, %v5993_v20  ;;  %v4513_v39 = vpack.c.bf16 %v3841_v35, %v3840_v49  ;;  %v3773_v47 = vadd.f32 %v5378_v25, %v3713_v30  ;;  %v3736_v28 = vmax.f32 %v5604_v55, %v3603_v6  ;;  %v3642_v55 = vpop.f32.mrf.mxu0  ;;  %v6002_v35 = vld [vmem:[#allocation28_spill] sm:$0xff] }
 0x19c   : > { %v2814_v10 = vmax.f32 %v5990_v50, %v5987_v4  ;;  %4015 = vst [vmem:[%s5501_s29 + $0x90] sm:$0xff] %v4512_v21  ;;  %v3818_v19 = vmax.f32 %v3770_v38, 0.0  ;;  %v3819_v53 = vmax.f32 %v3771_v37, 0.0  ;;  %v3794_v22 = vadd.f32 %v5471_v2, %v3734_v16  ;;  %v3685_v32 = vpop.f32.mrf.mxu1  ;;  %v6005_v50 = vld [vmem:[#allocation29_spill] sm:$0xff] }
 0x19d   : > { %v2816_v52 = vmax.f32 %v5994_v62, %v5991_v31  ;;  %v3735_v11 = vmax.f32 %v5618_v43, %v3562_v33  ;;  %4016 = vst [vmem:[%s5501_s29 + $0x98] sm:$0xff] %v4513_v39  ;;  %v3820_v9 = vmax.f32 %v3772_v61, 0.0  ;;  %v3821_v18 = vmax.f32 %v3773_v47, 0.0  ;;  %v3644_v24 = vpop.f32.mrf.mxu0  ;;  %v6003_v61 = vld [vmem:[#allocation69_spill] sm:$0xff] }
 0x19e   : > { %v3796_v0 = vadd.f32 %v5471_v2, %v3736_v28  ;;  %v3737_v56 = vmax.f32 %v5626_v34, %v3605_v60  ;;  %v5998_v3 = vmax.f32 %v5996_v54, %v5997_v29  ;;  %v4502_v26 = vpack.c.bf16 %v3819_v53, %v3818_v19  ;;  %v3687_v38 = vpop.f32.mrf.mxu1 }
 0x19f   : > { %v3795_v44 = vadd.f32 %v5471_v2, %v3735_v11  ;;  %v3714_v43 = vmax.f32 %v2813_v15, %v3642_v55  ;;  %v6001_v51 = vmax.f32 %v5999_v63, %v6000_v12  ;;  %v4503_v40 = vpack.c.bf16 %v3821_v18, %v3820_v9 }
 0x1a0   : > { %v2837_v27 = vmax.f32 %v5998_v3, %v5995_v45  ;;  %v3797_v34 = vadd.f32 %v5471_v2, %v3737_v56  ;;  %v3716_v13 = vmax.f32 %v2815_v48, %v3685_v32  ;;  %4002 = vst [vmem:[%s5501_s29 + $0x40] sm:$0xff] %v4502_v26  ;;  %v3842_v1 = vmax.f32 %v3794_v22, 0.0  ;;  %v3689_v57 = vpop.f32.mrf.mxu1 }
 0x1a1   : > { %v2839_v23 = vmax.f32 %v6001_v51, %v5362_v17  ;;  %v3843_v36 = vmax.f32 %v3795_v44, 0.0  ;;  %v3774_v41 = vadd.f32 %v5378_v25, %v3714_v43  ;;  %v3715_v14 = vmax.f32 %v2814_v10, %v3644_v24  ;;  %4003 = vst [vmem:[%s5501_s29 + $0x48] sm:$0xff] %v4503_v40  ;;  %v3646_v17 = vpop.f32.mrf.mxu0  ;;  %v6006_v10 = vld [vmem:[#allocation70_spill] sm:$0xff] }
 0x1a2   : > { %v3844_v15 = vmax.f32 %v3796_v0, 0.0  ;;  %v3845_v58 = vmax.f32 %v3797_v34, 0.0  ;;  %v3776_v5 = vadd.f32 %v5378_v25, %v3716_v13  ;;  %v3717_v49 = vmax.f32 %v2816_v52, %v3687_v38  ;;  %v3691_v39 = vpop.f32.mrf.mxu1 }
 0x1a3   : > { %v6004_v48 = vmax.f32 %v6002_v35, %v6003_v61  ;;  %v4514_v8 = vpack.c.bf16 %v3843_v36, %v3842_v1  ;;  %v3775_v4 = vadd.f32 %v5378_v25, %v3715_v14  ;;  %v3738_v42 = vmax.f32 %v2837_v27, %v3646_v17  ;;  %v3648_v7 = vpop.f32.mrf.mxu0 }
 0x1a4   : > { %v6007_v21 = vmax.f32 %v6005_v50, %v6006_v10  ;;  %v4515_v16 = vpack.c.bf16 %v3845_v58, %v3844_v15  ;;  %v3777_v6 = vadd.f32 %v5378_v25, %v3717_v49  ;;  %v3740_v31 = vmax.f32 %v2839_v23, %v3689_v57 }
 0x1a5   : > { %v2838_v30 = vmax.f32 %v6004_v48, %v5376_v59  ;;  %4017 = vst [vmem:[%s5501_s29 + $0xa0] sm:$0xff] %v4514_v8  ;;  %v3822_v20 = vmax.f32 %v3774_v41, 0.0  ;;  %v3823_v59 = vmax.f32 %v3775_v4, 0.0  ;;  %v3798_v62 = vadd.f32 %v5471_v2, %v3738_v42 }
 0x1a6   : > { %v2840_v37 = vmax.f32 %v6007_v21, %v5396_v46  ;;  %4018 = vst [vmem:[%s5501_s29 + $0xa8] sm:$0xff] %v4515_v16  ;;  %v3824_v47 = vmax.f32 %v3776_v5, 0.0  ;;  %v3825_v28 = vmax.f32 %v3777_v6, 0.0  ;;  %v3800_v46 = vadd.f32 %v5471_v2, %v3740_v31 }
 0x1a7   : > { %v3739_v52 = vmax.f32 %v2838_v30, %v3648_v7  ;;  %v4504_v25 = vpack.c.bf16 %v3823_v59, %v3822_v20  ;;  %v3846_v11 = vmax.f32 %v3798_v62, 0.0 }
 0x1a8   : > { %v3741_v33 = vmax.f32 %v2840_v37, %v3691_v39  ;;  %v4505_v53 = vpack.c.bf16 %v3825_v28, %v3824_v47  ;;  %v3848_v9 = vmax.f32 %v3800_v46, 0.0 }
 0x1a9   : > { %v3799_v19 = vadd.f32 %v5471_v2, %v3739_v52  ;;  %4004 = vst [vmem:[%s5501_s29 + $0x50] sm:$0xff] %v4504_v25 }
 0x1aa   : > { %v3801_v22 = vadd.f32 %v5471_v2, %v3741_v33  ;;  %4008 = vst.msk [vmem:[%s5501_s29 + $0x58] sm:$0xff] %vm4007_vm5, %v4505_v53 }
 0x1ab   : > { %v3847_v60 = vmax.f32 %v3799_v19, 0.0 }
 0x1ac   : > { %v3849_v18 = vmax.f32 %v3801_v22, 0.0 }
 0x1ad   : > { %v4516_v0 = vpack.c.bf16 %v3847_v60, %v3846_v11 }
 0x1ae   : > { %v4517_v56 = vpack.c.bf16 %v3849_v18, %v3848_v9 }
 0x1af   : > { %4019 = vst [vmem:[%s5501_s29 + $0xb0] sm:$0xff] %v4516_v0 }
 0x1b0   : > { %4020 = vst.msk [vmem:[%s5501_s29 + $0xb8] sm:$0xff] %vm4007_vm5, %v4517_v56 }
 0x1b1 PF: > { %s13_s12 = sadd.s32 1, %s4539_s12  }
 0x1b2   : > { %p10_p4 = scmp.ge.s32.totalorder %s13_s12, 4  }
 0x1b4   :  { %12 = sbr.rel (!%p10_p4) target bundleno = 1 (0x1), region = 65 }

// kernel: net_forward.5
= control target key start
LH: loop header
LB: loop body
LE: loop exit
PB: predicated region body
PF: predicated region fallthrough
CT: control target
= control target key end

     0   :  { %s1310_s12 = smov 0   ;;  %s1481_s0 = inlined_call_operand.vmem [shape: bf16[2,4,144,169], index: 0, kind: input, shape index: {}]   ;;  %s1482_s1 = inlined_call_operand.vmem [shape: bf16[32,144], index: 1, kind: input, shape index: {}]   ;;  %s1483_s2 = inlined_call_operand.vmem [shape: f32[32,1], index: 2, kind: input, shape index: {}]   ;;  %s1484_s3 = inlined_call_operand.vmem [shape: bf16[2,32,169], index: 3, kind: output, shape index: {}]  }
   0x1 LB: > { %s998_s13 = sadd.s32 4294967295, %s1287_s12   ;;  %p1002_p0 = scmp.ge.s32.totalorder %s1287_s12, 1  ;;  %s1287_s12 = sphi %s1310_s12, %s13_s12  }
   0x2   : > { %p137_p1 = scmp.lt.s32.totalorder %s1287_s12, 3 }
   0x4   : > { %p138_p2 = pnand %p1002_p0, %p137_p1 }
   0x5   : > { %p161_p3 = scmp.lt.s32.totalorder (!%p138_p2), %s998_s13, 1 }
   0x6   : > { %141 = sbr.rel (%p138_p2) target bundleno = 306 (0x132), region = 32 }
   0xb   : > { %v1321_v0 = vld [vmem:[%s1482_s1 + $0x4] ss:$8 sps:$4 sm:$0xff]   ;;  %vm302_vm0 = vcmask 130048   ;;  %s1488_s13 = smov (!%p161_p3, %s998_s13), 1  ;;  %v1289_v2 = vmov 0   ;;  %v874_v3 = vld [vmem:[%s1483_s2 + $0x10] sm:$0xff] }
   0xc   : > { %1028 = vmatprep.mubr.msk.bf16.mxu0 %vm302_vm0, %v1321_v0  ;;  %1066 = vmatprep.mubr.msk.bf16.mxu1 %vm302_vm0, %v1321_v0  ;;  %v872_v1 = vld [vmem:[%s1483_s2] sm:$0xff]  ;;  %s1155_s20 = smul.u32 576, %s1488_s13  ;;  %v873_v4 = vld [vmem:[%s1483_s2 + $0x8] sm:$0xff]  ;;  %v875_v5 = vld [vmem:[%s1483_s2 + $0x18] sm:$0xff]  ;;  %vm936_vm1 = vcmask 1043456   ;;  %vm937_vm2 = vcmask 334852  }
   0xd   : > { %1165 = vset.pattern.permute.xlu0 %v1289_v2  ;;  %1166 = vset.pattern.permute.xlu1 %v1289_v2  ;;  %v1388_v44 = vld [vmem:[%s1482_s1] ss:$8 sps:$4 sm:$0xff]   ;;  %v1397_v49 = vld [vmem:[%s1482_s1 + $0x14] ss:$8 sps:$4 sm:$0xff]   ;;  %v1412_v54 = vld [vmem:[%s1482_s1 + $0x10] ss:$8 sps:$4 sm:$0xff]  }
   0xe   : > { %878 = vperm.xlu0 %1165, %v872_v1   ;;  %888 = vperm.xlu1 %1166, %v874_v3   ;;  %s1345_s27 = scalar_lea.vmem %s1481_s0, %s1155_s20  ;;  %s1150_s7 = sshll.u32 %s1488_s13, 5  ;;  %vm1457_vm3 = vmor %vm937_vm2, %vm936_vm1 }
   0xf   : > { %v1167_v6 = vld [vmem:[%s1345_s27 + $0x74] ss:$8 sps:$4 sm:$0xff]   ;;  %v1169_v7 = vld [vmem:[%s1345_s27 + $0x104] ss:$8 sps:$4 sm:$0xff]   ;;  %v1171_v8 = vld [vmem:[%s1345_s27 + $0x70] ss:$8 sps:$4 sm:$0xff]   ;;  %s1464_s10 = scalar_lea.vmem %s1484_s3, %s1150_s7 }
  0x10   : > { %309 = vmatprep.subr.bf16.mxu0 %v1167_v6  ;;  %v1172_v9 = vld [vmem:[%s1345_s27 + $0x100] ss:$8 sps:$4 sm:$0xff]   ;;  %471 = vmatprep.subr.bf16.mxu1 %v1169_v7  ;;  %v1173_v10 = vld [vmem:[%s1345_s27 + $0x64] ss:$8 sps:$4 sm:$0xff]   ;;  %v1175_v11 = vld [vmem:[%s1345_s27 + $0xf4] ss:$8 sps:$4 sm:$0xff]  }
  0x11   : > { %310 = vmatpush1.bf16.msra.mxu0 %v1171_v8  ;;  %472 = vmatpush1.bf16.msra.mxu1 %v1172_v9  ;;  %v1177_v12 = vld [vmem:[%s1345_s27 + $0x60] ss:$8 sps:$4 sm:$0xff]   ;;  %v1178_v13 = vld [vmem:[%s1345_s27 + $0xf0] ss:$8 sps:$4 sm:$0xff]   ;;  %v1179_v14 = vld [vmem:[%s1345_s27 + $0x54] ss:$8 sps:$4 sm:$0xff]  }
  0x12   : > { %883 = vperm.xlu0 %1165, %v873_v4   ;;  %893 = vperm.xlu1 %1166, %v875_v5   ;;  %v1181_v15 = vld [vmem:[%s1345_s27 + $0xe4] ss:$8 sps:$4 sm:$0xff]   ;;  %v1183_v16 = vld [vmem:[%s1345_s27 + $0x50] ss:$8 sps:$4 sm:$0xff]   ;;  %v1184_v17 = vld [vmem:[%s1345_s27 + $0xe0] ss:$8 sps:$4 sm:$0xff]  }
  0x13   : > { %311 = vmatprep.subr.bf16.mxu0 %v1173_v10  ;;  %473 = vmatprep.subr.bf16.mxu1 %v1175_v11  ;;  %v1185_v18 = vld [vmem:[%s1345_s27 + $0x44] ss:$8 sps:$4 sm:$0xff]   ;;  %v1187_v19 = vld [vmem:[%s1345_s27 + $0xd4] ss:$8 sps:$4 sm:$0xff]   ;;  %v1189_v20 = vld [vmem:[%s1345_s27 + $0x40] ss:$8 sps:$4 sm:$0xff]  }
  0x14   : > { %v1190_v21 = vld [vmem:[%s1345_s27 + $0xd0] ss:$8 sps:$4 sm:$0xff]   ;;  %v1191_v22 = vld [vmem:[%s1345_s27 + $0x34] ss:$8 sps:$4 sm:$0xff]   ;;  %v1193_v23 = vld [vmem:[%s1345_s27 + $0xc4] ss:$8 sps:$4 sm:$0xff]  }
  0x15   : > { %312 = vmatpush1.bf16.msra.mxu0 %v1177_v12  ;;  %474 = vmatpush1.bf16.msra.mxu1 %v1178_v13  ;;  %v1195_v24 = vld [vmem:[%s1345_s27 + $0x30] ss:$8 sps:$4 sm:$0xff]   ;;  %v1196_v25 = vld [vmem:[%s1345_s27 + $0xc0] ss:$8 sps:$4 sm:$0xff]   ;;  %v1197_v26 = vld [vmem:[%s1345_s27 + $0x24] ss:$8 sps:$4 sm:$0xff]  }
  0x16   : > { %313 = vmatprep.subr.bf16.mxu0 %v1179_v14  ;;  %475 = vmatprep.subr.bf16.mxu1 %v1181_v15  ;;  %v1199_v27 = vld [vmem:[%s1345_s27 + $0xb4] ss:$8 sps:$4 sm:$0xff]   ;;  %v1201_v28 = vld [vmem:[%s1345_s27 + $0x20] ss:$8 sps:$4 sm:$0xff]   ;;  %v1202_v29 = vld [vmem:[%s1345_s27 + $0xb0] ss:$8 sps:$4 sm:$0xff]  }
  0x17   : > { %v1203_v30 = vld [vmem:[%s1345_s27 + $0x14] ss:$8 sps:$4 sm:$0xff]   ;;  %v1205_v31 = vld [vmem:[%s1345_s27 + $0xa4] ss:$8 sps:$4 sm:$0xff]   ;;  %v1207_v32 = vld [vmem:[%s1345_s27 + $0x10] ss:$8 sps:$4 sm:$0xff]  }
  0x18   : > { %v1208_v33 = vld [vmem:[%s1345_s27 + $0xa0] ss:$8 sps:$4 sm:$0xff]   ;;  %v1209_v34 = vld [vmem:[%s1345_s27 + $0x4] ss:$8 sps:$4 sm:$0xff]   ;;  %v1211_v35 = vld [vmem:[%s1345_s27 + $0x94] ss:$8 sps:$4 sm:$0xff]  }
  0x19   : > { %314 = vmatpush1.bf16.msra.mxu0 %v1183_v16  ;;  %476 = vmatpush1.bf16.msra.mxu1 %v1184_v17  ;;  %v1213_v36 = vld [vmem:[%s1345_s27] ss:$8 sps:$4 sm:$0xff]   ;;  %v1214_v37 = vld [vmem:[%s1345_s27 + $0x90] ss:$8 sps:$4 sm:$0xff]   ;;  %v1215_v38 = vld [vmem:[%s1345_s27 + $0x84] ss:$8 sps:$4 sm:$0xff]  }
  0x1a   : > { %315 = vmatprep.subr.bf16.mxu0 %v1185_v18  ;;  %477 = vmatprep.subr.bf16.mxu1 %v1187_v19  ;;  %v1217_v39 = vld [vmem:[%s1345_s27 + $0x114] ss:$8 sps:$4 sm:$0xff]   ;;  %v1219_v40 = vld [vmem:[%s1345_s27 + $0x80] ss:$8 sps:$4 sm:$0xff]   ;;  %v1220_v41 = vld [vmem:[%s1345_s27 + $0x110] ss:$8 sps:$4 sm:$0xff]  }
  0x1b   : > { %v1226_v42 = vld [vmem:[%s1345_s27 + $0x194] ss:$8 sps:$4 sm:$0xff]   ;;  %v1229_v43 = vld [vmem:[%s1345_s27 + $0x224] ss:$8 sps:$4 sm:$0xff]   ;;  %v1224_v45 = vld [vmem:[%s1345_s27 + $0x190] ss:$8 sps:$4 sm:$0xff]  }
  0x1c   : > { %v1227_v46 = vld [vmem:[%s1345_s27 + $0x220] ss:$8 sps:$4 sm:$0xff]   ;;  %v1232_v47 = vld [vmem:[%s1345_s27 + $0x184] ss:$8 sps:$4 sm:$0xff]   ;;  %v1235_v48 = vld [vmem:[%s1345_s27 + $0x214] ss:$8 sps:$4 sm:$0xff]  }
  0x1d   : > { %316 = vmatpush1.bf16.msra.mxu0 %v1189_v20  ;;  %478 = vmatpush1.bf16.msra.mxu1 %v1190_v21  ;;  %v1230_v50 = vld [vmem:[%s1345_s27 + $0x180] ss:$8 sps:$4 sm:$0xff]   ;;  %v1233_v51 = vld [vmem:[%s1345_s27 + $0x210] ss:$8 sps:$4 sm:$0xff]   ;;  %v1238_v52 = vld [vmem:[%s1345_s27 + $0x174] ss:$8 sps:$4 sm:$0xff]  }
  0x1e   : > { %317 = vmatprep.subr.bf16.mxu0 %v1191_v22  ;;  %479 = vmatprep.subr.bf16.mxu1 %v1193_v23  ;;  %v1241_v53 = vld [vmem:[%s1345_s27 + $0x204] ss:$8 sps:$4 sm:$0xff]   ;;  %v1236_v55 = vld [vmem:[%s1345_s27 + $0x170] ss:$8 sps:$4 sm:$0xff]   ;;  %v1239_v56 = vld [vmem:[%s1345_s27 + $0x200] ss:$8 sps:$4 sm:$0xff]  }
  0x1f   : > { %v1244_v57 = vld [vmem:[%s1345_s27 + $0x164] ss:$8 sps:$4 sm:$0xff]   ;;  %v1247_v58 = vld [vmem:[%s1345_s27 + $0x1f4] ss:$8 sps:$4 sm:$0xff]   ;;  %v1242_v59 = vld [vmem:[%s1345_s27 + $0x160] ss:$8 sps:$4 sm:$0xff]  }
  0x20   : > { %v1245_v60 = vld [vmem:[%s1345_s27 + $0x1f0] ss:$8 sps:$4 sm:$0xff]   ;;  %v1250_v61 = vld [vmem:[%s1345_s27 + $0x154] ss:$8 sps:$4 sm:$0xff]   ;;  %v1253_v62 = vld [vmem:[%s1345_s27 + $0x1e4] ss:$8 sps:$4 sm:$0xff]  }
  0x21   : > { %318 = vmatpush1.bf16.msra.mxu0 %v1195_v24  ;;  %480 = vmatpush1.bf16.msra.mxu1 %v1196_v25  ;;  %v1248_v63 = vld [vmem:[%s1345_s27 + $0x150] ss:$8 sps:$4 sm:$0xff]   ;;  %v1251_v1 = vld [vmem:[%s1345_s27 + $0x1e0] ss:$8 sps:$4 sm:$0xff]   ;;  %v1256_v2 = vld [vmem:[%s1345_s27 + $0x144] ss:$8 sps:$4 sm:$0xff]  }
  0x22   : > { %319 = vmatprep.subr.bf16.mxu0 %v1197_v26  ;;  %481 = vmatprep.subr.bf16.mxu1 %v1199_v27  ;;  %v1259_v3 = vld [vmem:[%s1345_s27 + $0x1d4] ss:$8 sps:$4 sm:$0xff]   ;;  %v1254_v4 = vld [vmem:[%s1345_s27 + $0x140] ss:$8 sps:$4 sm:$0xff]   ;;  %v1257_v5 = vld [vmem:[%s1345_s27 + $0x1d0] ss:$8 sps:$4 sm:$0xff]  }
  0x23   : > { %v1268_v6 = vld [vmem:[%s1345_s27 + $0x1c4] ss:$8 sps:$4 sm:$0xff]   ;;  %v1263_v7 = vld [vmem:[%s1345_s27 + $0x130] ss:$8 sps:$4 sm:$0xff]   ;;  %v1266_v8 = vld [vmem:[%s1345_s27 + $0x1c0] ss:$8 sps:$4 sm:$0xff]  }
  0x24   : > { %v1271_v9 = vld [vmem:[%s1345_s27 + $0x124] ss:$8 sps:$4 sm:$0xff]   ;;  %v1274_v10 = vld [vmem:[%s1345_s27 + $0x1b4] ss:$8 sps:$4 sm:$0xff]   ;;  %v1269_v11 = vld [vmem:[%s1345_s27 + $0x120] ss:$8 sps:$4 sm:$0xff]  }
  0x25   : > { %320 = vmatpush1.bf16.msra.mxu0 %v1201_v28  ;;  %482 = vmatpush1.bf16.msra.mxu1 %v1202_v29  ;;  %v1272_v12 = vld [vmem:[%s1345_s27 + $0x1b0] ss:$8 sps:$4 sm:$0xff]   ;;  %v1277_v13 = vld [vmem:[%s1345_s27 + $0x1a4] ss:$8 sps:$4 sm:$0xff]   ;;  %v1280_v14 = vld [vmem:[%s1345_s27 + $0x234] ss:$8 sps:$4 sm:$0xff]  }
  0x26   : > { %321 = vmatprep.subr.bf16.mxu0 %v1203_v30  ;;  %483 = vmatprep.subr.bf16.mxu1 %v1205_v31  ;;  %v1275_v15 = vld [vmem:[%s1345_s27 + $0x1a0] ss:$8 sps:$4 sm:$0xff]   ;;  %v1278_v16 = vld [vmem:[%s1345_s27 + $0x230] ss:$8 sps:$4 sm:$0xff]  }
  0x29   : > { %322 = vmatpush1.bf16.msra.mxu0 %v1207_v32  ;;  %484 = vmatpush1.bf16.msra.mxu1 %v1208_v33 }
  0x2a   : > { %323 = vmatprep.subr.bf16.mxu0 %v1209_v34  ;;  %485 = vmatprep.subr.bf16.mxu1 %v1211_v35 }
  0x2d   : > { %324 = vmatpush1.bf16.msra.mxu0 %v1213_v36  ;;  %486 = vmatpush1.bf16.msra.mxu1 %v1214_v37 }
  0x2e   : > { %339 = vmatprep.subr.bf16.mxu0 %v1215_v38  ;;  %501 = vmatprep.subr.bf16.mxu1 %v1217_v39 }
  0x31   : > { %340 = vmatpush2.bf16.msra.mxu0 %v1219_v40  ;;  %502 = vmatpush2.bf16.msra.mxu1 %v1220_v41 }
  0x32   : > { %641 = vmatprep.subr.bf16.mxu0 %v1226_v42  ;;  %811 = vmatprep.subr.bf16.mxu1 %v1229_v43 }
  0x34   : > { %342 = vmatmul.mubr.bf16.vlgmr.msra.gmra.mxu0 %v1388_v44  ;;  %504 = vmatmul.mubr.bf16.vlgmr.msra.gmra.mxu1 %v1388_v44 }
  0x35   : > { %642 = vmatpush1.bf16.msra.mxu0 %v1224_v45  ;;  %812 = vmatpush1.bf16.msra.mxu1 %v1227_v46 }
  0x36   : > { %643 = vmatprep.subr.bf16.mxu0 %v1232_v47  ;;  %813 = vmatprep.subr.bf16.mxu1 %v1235_v48 }
  0x37   : > { %1029 = vmatprep.mubr.msk.bf16.mxu0 %vm302_vm0, %v1397_v49  ;;  %1067 = vmatprep.mubr.msk.bf16.mxu1 %vm302_vm0, %v1397_v49 }
  0x39   : > { %644 = vmatpush1.bf16.msra.mxu0 %v1230_v50  ;;  %814 = vmatpush1.bf16.msra.mxu1 %v1233_v51 }
  0x3a   : > { %645 = vmatprep.subr.bf16.mxu0 %v1238_v52  ;;  %815 = vmatprep.subr.bf16.mxu1 %v1241_v53 }
  0x3c   : > { %352 = vmatmul.mubr.bf16.gmra.mxu0 %v1412_v54  ;;  %514 = vmatmul.mubr.bf16.gmra.mxu1 %v1412_v54 }
  0x3d   : > { %646 = vmatpush1.bf16.msra.mxu0 %v1236_v55  ;;  %816 = vmatpush1.bf16.msra.mxu1 %v1239_v56 }
  0x3e   : > { %647 = vmatprep.subr.bf16.mxu0 %v1244_v57  ;;  %817 = vmatprep.subr.bf16.mxu1 %v1247_v58 }
  0x3f   : > { %1104 = vmatprep.mubr.msk.bf16.mxu0 %vm302_vm0, %v1321_v0  ;;  %1142 = vmatprep.mubr.msk.bf16.mxu1 %vm302_vm0, %v1321_v0  ;;  %v1265_v0 = vld [vmem:[%s1345_s27 + $0x134] ss:$8 sps:$4 sm:$0xff]  }
  0x41   : > { %648 = vmatpush1.bf16.msra.mxu0 %v1242_v59  ;;  %818 = vmatpush1.bf16.msra.mxu1 %v1245_v60 }
  0x42   : > { %649 = vmatprep.subr.bf16.mxu0 %v1250_v61  ;;  %819 = vmatprep.subr.bf16.mxu1 %v1253_v62 }
  0x45   : > { %650 = vmatpush1.bf16.msra.mxu0 %v1248_v63  ;;  %820 = vmatpush1.bf16.msra.mxu1 %v1251_v1 }
  0x46   : > { %651 = vmatprep.subr.bf16.mxu0 %v1256_v2  ;;  %821 = vmatprep.subr.bf16.mxu1 %v1259_v3 }
  0x49   : > { %652 = vmatpush1.bf16.msra.mxu0 %v1254_v4  ;;  %822 = vmatpush1.bf16.msra.mxu1 %v1257_v5 }
  0x4a   : > { %653 = vmatprep.subr.bf16.mxu0 %v1265_v0  ;;  %823 = vmatprep.subr.bf16.mxu1 %v1268_v6 }
  0x4d   : > { %654 = vmatpush1.bf16.msra.mxu0 %v1263_v7  ;;  %824 = vmatpush1.bf16.msra.mxu1 %v1266_v8 }
  0x4e   : > { %655 = vmatprep.subr.bf16.mxu0 %v1271_v9  ;;  %825 = vmatprep.subr.bf16.mxu1 %v1274_v10 }
  0x51   : > { %656 = vmatpush1.bf16.msra.mxu0 %v1269_v11  ;;  %826 = vmatpush1.bf16.msra.mxu1 %v1272_v12 }
  0x52   : > { %671 = vmatprep.subr.bf16.mxu0 %v1277_v13  ;;  %841 = vmatprep.subr.bf16.mxu1 %v1280_v14 }
  0x55   : > { %672 = vmatpush2.bf16.msra.mxu0 %v1275_v15  ;;  %842 = vmatpush2.bf16.msra.mxu1 %v1278_v16 }
  0x58   : > { %674 = vmatmul.mubr.bf16.vlgmr.msra.gmra.mxu0 %v1388_v44  ;;  %844 = vmatmul.mubr.bf16.vlgmr.msra.gmra.mxu1 %v1388_v44 }
  0x59   : > { %1105 = vmatprep.mubr.msk.bf16.mxu0 %vm302_vm0, %v1397_v49  ;;  %1143 = vmatprep.mubr.msk.bf16.mxu1 %vm302_vm0, %v1397_v49 }
  0x60   : > { %684 = vmatmul.mubr.bf16.gmra.mxu0 %v1412_v54  ;;  %854 = vmatmul.mubr.bf16.gmra.mxu1 %v1412_v54 }
  0x89   : > { %v879_v34 = vpop.permute.xlu0 %878  ;;  %v889_v1 = vpop.permute.xlu1 %888 }
  0x8d   : > { %v884_v50 = vpop.permute.xlu0 %883 }
  0xf4   : > { %v343_v17 = vpop.f32.mrf.mxu0  ;;  %v505_v18 = vpop.f32.mrf.mxu1 }
  0xf5   : > { %v524_v33 = vmax.f32 %v343_v17, %v505_v18 }
  0xf6   : > { %v345_v19 = vpop.f32.mrf.mxu0  ;;  %v507_v20 = vpop.f32.mrf.mxu1 }
  0xf7   : > { %v525_v37 = vmax.f32 %v345_v19, %v507_v20 }
  0xf8   : > { %v347_v21 = vpop.f32.mrf.mxu0  ;;  %v509_v22 = vpop.f32.mrf.mxu1 }
  0xf9   : > { %v526_v41 = vmax.f32 %v347_v21, %v509_v22 }
  0xfa   : > { %v349_v23 = vpop.f32.mrf.mxu0  ;;  %v511_v24 = vpop.f32.mrf.mxu1 }
  0xfb   : > { %v527_v46 = vmax.f32 %v349_v23, %v511_v24  ;;  %v894_v23 = vpop.permute.xlu1 %893 }
  0xfc   : > { %v353_v25 = vpop.f32.mrf.mxu0  ;;  %v515_v26 = vpop.f32.mrf.mxu1 }
  0xfd   : > { %v528_v53 = vmax.f32 %v353_v25, %v515_v26 }
  0xfe   : > { %v355_v27 = vpop.f32.mrf.mxu0  ;;  %v517_v28 = vpop.f32.mrf.mxu1 }
  0xff   : > { %v529_v2 = vmax.f32 %v355_v27, %v517_v28 }
 0x100   : > { %v357_v29 = vpop.f32.mrf.mxu0  ;;  %v519_v30 = vpop.f32.mrf.mxu1 }
 0x101   : > { %v530_v0 = vmax.f32 %v357_v29, %v519_v30 }
 0x102   : > { %v359_v31 = vpop.f32.mrf.mxu0  ;;  %v521_v32 = vpop.f32.mrf.mxu1 }
 0x103   : > { %v531_v12 = vmax.f32 %v359_v31, %v521_v32 }
 0x118   : > { %v675_v35 = vpop.f32.mrf.mxu0  ;;  %v845_v36 = vpop.f32.mrf.mxu1 }
 0x119   : > { %v694_v38 = vmax.f32 %v524_v33, %v675_v35 }
 0x11a   : > { %v677_v39 = vpop.f32.mrf.mxu0  ;;  %v847_v40 = vpop.f32.mrf.mxu1 }
 0x11b   : > { %v864_v42 = vmax.f32 %v694_v38, %v845_v36  ;;  %v695_v43 = vmax.f32 %v525_v37, %v677_v39 }
 0x11c   : > { %v679_v44 = vpop.f32.mrf.mxu0  ;;  %v849_v45 = vpop.f32.mrf.mxu1 }
 0x11d   : > { %v865_v47 = vmax.f32 %v695_v43, %v847_v40  ;;  %v896_v48 = vadd.f32 %v879_v34, %v864_v42  ;;  %v696_v49 = vmax.f32 %v526_v41, %v679_v44 }
 0x11e   : > { %v681_v51 = vpop.f32.mrf.mxu0  ;;  %v851_v52 = vpop.f32.mrf.mxu1 }
 0x11f   : > { %v897_v54 = vadd.f32 %v879_v34, %v865_v47  ;;  %v866_v55 = vmax.f32 %v696_v49, %v849_v45  ;;  %v697_v56 = vmax.f32 %v527_v46, %v681_v51  ;;  %v904_v57 = vmax.f32 %v896_v48, 0.0 }
 0x120   : > { %v685_v58 = vpop.f32.mrf.mxu0  ;;  %v855_v59 = vpop.f32.mrf.mxu1 }
 0x121   : > { %v905_v60 = vmax.f32 %v897_v54, 0.0  ;;  %v867_v61 = vmax.f32 %v697_v56, %v851_v52  ;;  %v898_v62 = vadd.f32 %v884_v50, %v866_v55  ;;  %v698_v63 = vmax.f32 %v528_v53, %v685_v58 }
 0x122   : > { %v687_v4 = vpop.f32.mrf.mxu0  ;;  %v857_v5 = vpop.f32.mrf.mxu1 }
 0x123   : > { %v1151_v6 = vpack.c.bf16 %v905_v60, %v904_v57  ;;  %v899_v7 = vadd.f32 %v884_v50, %v867_v61  ;;  %v868_v8 = vmax.f32 %v698_v63, %v855_v59  ;;  %v699_v9 = vmax.f32 %v529_v2, %v687_v4 }
 0x124   : > { %v689_v10 = vpop.f32.mrf.mxu0  ;;  %v859_v11 = vpop.f32.mrf.mxu1  ;;  %v906_v13 = vmax.f32 %v898_v62, 0.0 }
 0x125   : > { %939 = vst.msk [vmem:[%s1464_s10] sm:$0xff] %vm1457_vm3, %v1151_v6  ;;  %v907_v14 = vmax.f32 %v899_v7, 0.0  ;;  %v700_v15 = vmax.f32 %v530_v0, %v689_v10  ;;  %v900_v16 = vadd.f32 %v889_v1, %v868_v8  ;;  %v869_v17 = vmax.f32 %v699_v9, %v857_v5 }
 0x126   : > { %v691_v18 = vpop.f32.mrf.mxu0  ;;  %v861_v24 = vpop.f32.mrf.mxu1 }
 0x127   : > { %v1152_v19 = vpack.c.bf16 %v907_v14, %v906_v13  ;;  %v870_v20 = vmax.f32 %v700_v15, %v859_v11  ;;  %v701_v21 = vmax.f32 %v531_v12, %v691_v18  ;;  %v901_v22 = vadd.f32 %v889_v1, %v869_v17 }
 0x128   : > { %v908_v27 = vmax.f32 %v900_v16, 0.0 }
 0x129   : > { %940 = vst.msk [vmem:[%s1464_s10 + $0x8] sm:$0xff] %vm1457_vm3, %v1152_v19  ;;  %v902_v25 = vadd.f32 %v894_v23, %v870_v20  ;;  %v871_v26 = vmax.f32 %v701_v21, %v861_v24  ;;  %v909_v28 = vmax.f32 %v901_v22, 0.0 }
 0x12b   : > { %v903_v29 = vadd.f32 %v894_v23, %v871_v26  ;;  %v1153_v30 = vpack.c.bf16 %v909_v28, %v908_v27  ;;  %v910_v31 = vmax.f32 %v902_v25, 0.0 }
 0x12d   : > { %v911_v32 = vmax.f32 %v903_v29, 0.0  ;;  %941 = vst.msk [vmem:[%s1464_s10 + $0x10] sm:$0xff] %vm1457_vm3, %v1153_v30 }
 0x12f   : > { %v1154_v33 = vpack.c.bf16 %v911_v32, %v910_v31 }
 0x131   : > { %942 = vst.msk [vmem:[%s1464_s10 + $0x18] sm:$0xff] %vm1457_vm3, %v1154_v33 }
 0x132 PF: > { %s13_s12 = sadd.s32 1, %s1287_s12  }
 0x133   : > { %p10_p4 = scmp.ge.s32.totalorder %s13_s12, 4  }
 0x135   :  { %12 = sbr.rel (!%p10_p4) target bundleno = 1 (0x1), region = 65 }

// kernel: net_forward.6
= control target key start
LH: loop header
LB: loop body
LE: loop exit
PB: predicated region body
PF: predicated region fallthrough
CT: control target
= control target key end

     0   :  { %s2092_s12 = smov 0   ;;  %s2473_s0 = inlined_call_operand.vmem [shape: bf16[2,4,288,9], index: 0, kind: input, shape index: {}]   ;;  %s2474_s1 = inlined_call_operand.vmem [shape: bf16[64,288], index: 1, kind: input, shape index: {}]   ;;  %s2475_s2 = inlined_call_operand.vmem [shape: f32[64,1], index: 2, kind: input, shape index: {}]   ;;  %s2476_s3 = inlined_call_operand.vmem [shape: f32[2,64,9], index: 3, kind: output, shape index: {}]  }
   0x1 LB: > { %s1512_s13 = sadd.s32 4294967295, %s2069_s12   ;;  %p1516_p0 = scmp.ge.s32.totalorder %s2069_s12, 1  ;;  %s2069_s12 = sphi %s2092_s12, %s13_s12  }
   0x2   : > { %p137_p1 = scmp.lt.s32.totalorder %s2069_s12, 3 }
   0x4   : > { %p138_p2 = pnand %p1516_p0, %p137_p1 }
   0x6   : > { %141 = sbr.rel (%p138_p2) target bundleno = 348 (0x15c), region = 32 }
   0xb   : > { %p161_p3 = scmp.lt.s32.totalorder %s1512_s13, 1  ;;  %v2103_v0 = vld [vmem:[%s2474_s1 + $0x4] ss:$12 sps:$4 sm:$0xff]   ;;  %v2071_v1 = vmov 0   ;;  %v2148_v32 = vld [vmem:[%s2474_s1] ss:$12 sps:$4 sm:$0xff]  }
   0xc   : > { %437 = vmatprep.mubr.bf16.mxu0 %v2103_v0  ;;  %712 = vmatprep.mubr.bf16.mxu1 %v2103_v0  ;;  %v2156_v36 = vld [vmem:[%s2474_s1 + $0x1c] ss:$12 sps:$4 sm:$0xff]   ;;  %v2170_v42 = vld [vmem:[%s2474_s1 + $0x18] ss:$12 sps:$4 sm:$0xff]   ;;  %v2175_v43 = vld [vmem:[%s2474_s1 + $0x34] ss:$12 sps:$4 sm:$0xff]  }
   0xd   : > { %s2487_s13 = smov (!%p161_p3, %s1512_s13), 1  ;;  %1974 = vset.pattern.permute.xlu1 %v2071_v1  ;;  %1973 = vset.pattern.permute.xlu0 %v2071_v1  ;;  %v2189_v49 = vld [vmem:[%s2474_s1 + $0x30] ss:$12 sps:$4 sm:$0xff]   ;;  %v2194_v50 = vld [vmem:[%s2474_s1 + $0x4c] ss:$12 sps:$4 sm:$0xff]   ;;  %vm392_vm0 = vcmask 261120  }
   0xe   : > { %s1963_s16 = smul.u32 576, %s2487_s13  ;;  %v2208_v56 = vld [vmem:[%s2474_s1 + $0x48] ss:$12 sps:$4 sm:$0xff]   ;;  %v2227_v62 = vld [vmem:[%s2474_s1 + $0x20] ss:$12 sps:$4 sm:$0xff]   ;;  %vm1448_vm1 = vcmask 72704  }
   0xf   : > { %v2213_v57 = vld [vmem:[%s2474_s1 + $0x8] ss:$12 sps:$4 sm:$0xff]   ;;  %v2233_v1 = vld [vmem:[%s2474_s1 + $0x38] ss:$12 sps:$4 sm:$0xff]  }
  0x10   : > { %s2113_s19 = scalar_lea.vmem %s2473_s0, %s1963_s16 }
  0x11   : > { %v1975_v2 = vld [vmem:[%s2113_s19 + $0x78] sm:$0xff]   ;;  %v1976_v3 = vld [vmem:[%s2113_s19 + $0x108] sm:$0xff]   ;;  %v1979_v6 = vld [vmem:[%s2113_s19 + $0x70] sm:$0xff]  }
  0x12   : > { %1731 = vmatprep.subr.bf16.mxu0 %v1975_v2  ;;  %v1977_v4 = vld [vmem:[%s2113_s19 + $0x38] sm:$0xff]   ;;  %1777 = vmatprep.subr.bf16.mxu1 %v1976_v3  ;;  %v1978_v5 = vld [vmem:[%s2113_s19 + $0xc8] sm:$0xff]   ;;  %v1980_v7 = vld [vmem:[%s2113_s19 + $0x100] sm:$0xff]  }
  0x13   : > { %1732 = vmatpush3.bf16.msra.mxu0 %v1977_v4  ;;  %1778 = vmatpush3.bf16.msra.mxu1 %v1978_v5  ;;  %v1981_v8 = vld [vmem:[%s2113_s19 + $0x30] sm:$0xff]   ;;  %v1982_v9 = vld [vmem:[%s2113_s19 + $0xc0] sm:$0xff]   ;;  %v1983_v10 = vld [vmem:[%s2113_s19 + $0x68] sm:$0xff]  }
  0x14   : > { %1733 = vmatprep.subr.bf16.mxu0 %v1979_v6  ;;  %1779 = vmatprep.subr.bf16.mxu1 %v1980_v7  ;;  %v1984_v11 = vld [vmem:[%s2113_s19 + $0xf8] sm:$0xff]   ;;  %v1985_v12 = vld [vmem:[%s2113_s19 + $0x28] sm:$0xff]   ;;  %v1987_v14 = vld [vmem:[%s2113_s19 + $0x60] sm:$0xff]  }
  0x15   : > { %v1986_v13 = vld [vmem:[%s2113_s19 + $0xb8] sm:$0xff]   ;;  %v1988_v15 = vld [vmem:[%s2113_s19 + $0xf0] sm:$0xff]   ;;  %v1989_v16 = vld [vmem:[%s2113_s19 + $0x20] sm:$0xff]  }
  0x16   : > { %v1990_v17 = vld [vmem:[%s2113_s19 + $0xb0] sm:$0xff]   ;;  %v1991_v18 = vld [vmem:[%s2113_s19 + $0x58] sm:$0xff]   ;;  %v1992_v19 = vld [vmem:[%s2113_s19 + $0xe8] sm:$0xff]  }
  0x17   : > { %1734 = vmatpush3.bf16.msra.mxu0 %v1981_v8  ;;  %1780 = vmatpush3.bf16.msra.mxu1 %v1982_v9  ;;  %v1993_v20 = vld [vmem:[%s2113_s19 + $0x18] sm:$0xff]   ;;  %v1994_v21 = vld [vmem:[%s2113_s19 + $0xa8] sm:$0xff]   ;;  %v1995_v22 = vld [vmem:[%s2113_s19 + $0x50] sm:$0xff]  }
  0x18   : > { %1735 = vmatprep.subr.bf16.mxu0 %v1983_v10  ;;  %1781 = vmatprep.subr.bf16.mxu1 %v1984_v11  ;;  %v1996_v23 = vld [vmem:[%s2113_s19 + $0xe0] sm:$0xff]   ;;  %v1997_v24 = vld [vmem:[%s2113_s19 + $0x10] sm:$0xff]   ;;  %v1999_v26 = vld [vmem:[%s2113_s19 + $0x48] sm:$0xff]  }
  0x19   : > { %v1998_v25 = vld [vmem:[%s2113_s19 + $0xa0] sm:$0xff]   ;;  %v2000_v27 = vld [vmem:[%s2113_s19 + $0xd8] sm:$0xff]   ;;  %v2001_v28 = vld [vmem:[%s2113_s19 + $0x8] sm:$0xff]  }
  0x1a   : > { %v2002_v29 = vld [vmem:[%s2113_s19 + $0x98] sm:$0xff]   ;;  %v2003_v30 = vld [vmem:[%s2113_s19 + $0x40] sm:$0xff]   ;;  %v2004_v31 = vld [vmem:[%s2113_s19 + $0xd0] sm:$0xff]  }
  0x1b   : > { %1736 = vmatpush3.bf16.msra.mxu0 %v1985_v12  ;;  %1782 = vmatpush3.bf16.msra.mxu1 %v1986_v13  ;;  %v2005_v33 = vld [vmem:[%s2113_s19] sm:$0xff]   ;;  %v2006_v34 = vld [vmem:[%s2113_s19 + $0x90] sm:$0xff]   ;;  %v2010_v35 = vld [vmem:[%s2113_s19 + $0x198] sm:$0xff]  }
  0x1c   : > { %1737 = vmatprep.subr.bf16.mxu0 %v1987_v14  ;;  %1783 = vmatprep.subr.bf16.mxu1 %v1988_v15  ;;  %v2011_v37 = vld [vmem:[%s2113_s19 + $0x158] sm:$0xff]   ;;  %v2012_v38 = vld [vmem:[%s2113_s19 + $0x88] sm:$0xff]   ;;  %v2013_v39 = vld [vmem:[%s2113_s19 + $0x190] sm:$0xff]  }
  0x1d   : > { %v2014_v40 = vld [vmem:[%s2113_s19 + $0x150] sm:$0xff]   ;;  %v2018_v41 = vld [vmem:[%s2113_s19 + $0x188] sm:$0xff]   ;;  %v2020_v45 = vld [vmem:[%s2113_s19 + $0x180] sm:$0xff]  }
  0x1e   : > { %v2019_v44 = vld [vmem:[%s2113_s19 + $0x148] sm:$0xff]   ;;  %v2027_v46 = vld [vmem:[%s2113_s19 + $0x80] sm:$0xff]   ;;  %v2025_v48 = vld [vmem:[%s2113_s19 + $0x178] sm:$0xff]  }
  0x1f   : > { %1738 = vmatpush3.bf16.msra.mxu0 %v1989_v16  ;;  %1784 = vmatpush3.bf16.msra.mxu1 %v1990_v17  ;;  %v2021_v47 = vld [vmem:[%s2113_s19 + $0x140] sm:$0xff]   ;;  %v2026_v51 = vld [vmem:[%s2113_s19 + $0x138] sm:$0xff]   ;;  %v2028_v52 = vld [vmem:[%s2113_s19 + $0x170] sm:$0xff]  }
  0x20   : > { %1739 = vmatprep.subr.bf16.mxu0 %v1991_v18  ;;  %1785 = vmatprep.subr.bf16.mxu1 %v1992_v19  ;;  %v2029_v53 = vld [vmem:[%s2113_s19 + $0x130] sm:$0xff]   ;;  %v2041_v54 = vld [vmem:[%s2113_s19 + $0x118] sm:$0xff]   ;;  %v2033_v55 = vld [vmem:[%s2113_s19 + $0x168] sm:$0xff]  }
  0x21   : > { %v2034_v58 = vld [vmem:[%s2113_s19 + $0x128] sm:$0xff]   ;;  %v2035_v59 = vld [vmem:[%s2113_s19 + $0x160] sm:$0xff]   ;;  %v2048_v3 = vld [vmem:[%s2113_s19 + $0x110] sm:$0xff]  }
  0x22   : > { %v2036_v60 = vld [vmem:[%s2113_s19 + $0x120] sm:$0xff]   ;;  %v2039_v61 = vld [vmem:[%s2113_s19 + $0x228] sm:$0xff]   ;;  %v2046_v6 = vld [vmem:[%s2113_s19 + $0x218] sm:$0xff]  }
  0x23   : > { %1740 = vmatpush3.bf16.msra.mxu0 %v1993_v20  ;;  %1786 = vmatpush3.bf16.msra.mxu1 %v1994_v21  ;;  %v2040_v63 = vld [vmem:[%s2113_s19 + $0x1e8] sm:$0xff]   ;;  %v2042_v2 = vld [vmem:[%s2113_s19 + $0x220] sm:$0xff]   ;;  %v2249_v7 = vld [vmem:[%s2474_s1 + $0x50] ss:$12 sps:$4 sm:$0xff]  }
  0x24   : > { %1741 = vmatprep.subr.bf16.mxu0 %v1995_v22  ;;  %1787 = vmatprep.subr.bf16.mxu1 %v1996_v23  ;;  %v2043_v4 = vld [vmem:[%s2113_s19 + $0x1e0] sm:$0xff]   ;;  %v2053_v5 = vld [vmem:[%s2113_s19 + $0x1a8] sm:$0xff]   ;;  %v2047_v8 = vld [vmem:[%s2113_s19 + $0x1d8] sm:$0xff]  }
  0x25   : > { %v2049_v9 = vld [vmem:[%s2113_s19 + $0x210] sm:$0xff]   ;;  %v1384_v11 = vld [vmem:[%s2475_s2] sm:$0xff]  ;;  %v1387_v12 = vld [vmem:[%s2475_s2 + $0x18] sm:$0xff] }
  0x26   : > { %v1386_v10 = vld [vmem:[%s2475_s2 + $0x10] sm:$0xff]  ;;  %v2051_v14 = vld [vmem:[%s2113_s19 + $0x208] sm:$0xff]   ;;  %1394 = vperm.xlu0 %1973, %v1384_v11   ;;  %v2054_v18 = vld [vmem:[%s2113_s19 + $0x200] sm:$0xff]  }
  0x27   : > { %1742 = vmatpush3.bf16.msra.mxu0 %v1997_v24  ;;  %1788 = vmatpush3.bf16.msra.mxu1 %v1998_v25  ;;  %v2050_v13 = vld [vmem:[%s2113_s19 + $0x1d0] sm:$0xff]   ;;  %v1385_v15 = vld [vmem:[%s2475_s2 + $0x8] sm:$0xff]  ;;  %v2058_v19 = vld [vmem:[%s2113_s19 + $0x1a0] sm:$0xff]  }
  0x28   : > { %1743 = vmatprep.subr.bf16.mxu0 %v1999_v26  ;;  %1789 = vmatprep.subr.bf16.mxu1 %v2000_v27  ;;  %v1389_v16 = vld [vmem:[%s2475_s2 + $0x28] sm:$0xff]  ;;  %v1388_v20 = vld [vmem:[%s2475_s2 + $0x20] sm:$0xff]  ;;  %v2061_v22 = vld [vmem:[%s2113_s19 + $0x238] sm:$0xff]  }
  0x29   : > { %1404 = vperm.xlu1 %1974, %v1386_v10   ;;  %v2052_v17 = vld [vmem:[%s2113_s19 + $0x1c8] sm:$0xff]   ;;  %v2055_v21 = vld [vmem:[%s2113_s19 + $0x1c0] sm:$0xff]   ;;  %v1391_v23 = vld [vmem:[%s2475_s2 + $0x38] sm:$0xff] }
  0x2a   : > { %1399 = vperm.xlu0 %1973, %v1385_v15   ;;  %v2056_v24 = vld [vmem:[%s2113_s19 + $0x1f8] sm:$0xff]   ;;  %v1390_v25 = vld [vmem:[%s2475_s2 + $0x30] sm:$0xff] }
  0x2b   : > { %1744 = vmatpush3.bf16.msra.mxu0 %v2001_v28  ;;  %1790 = vmatpush3.bf16.msra.mxu1 %v2002_v29  ;;  %v2057_v26 = vld [vmem:[%s2113_s19 + $0x1b8] sm:$0xff]   ;;  %v2059_v27 = vld [vmem:[%s2113_s19 + $0x1f0] sm:$0xff]  }
  0x2c   : > { %1745 = vmatprep.subr.bf16.mxu0 %v2003_v30  ;;  %1791 = vmatprep.subr.bf16.mxu1 %v2004_v31  ;;  %v2060_v28 = vld [vmem:[%s2113_s19 + $0x1b0] sm:$0xff]  }
  0x2d   : > { %1409 = vperm.xlu1 %1974, %v1387_v12   ;;  %v2062_v29 = vld [vmem:[%s2113_s19 + $0x230] sm:$0xff]   ;;  %s1730_s19 = sshll.u32 %s2487_s13, 6 }
  0x2e   : > { %1414 = vperm.xlu0 %1973, %v1388_v20   ;;  %s2430_s8 = scalar_lea.vmem %s2476_s3, %s1730_s19 }
  0x2f   : > { %1746 = vmatpush3.bf16.msra.mxu0 %v2005_v33  ;;  %1792 = vmatpush3.bf16.msra.mxu1 %v2006_v34 }
  0x30   : > { %1823 = vmatprep.subr.bf16.mxu1 %v2010_v35  ;;  %1915 = vmatprep.subr.bf16.mxu0 %v2012_v38 }
  0x31   : > { %1419 = vperm.xlu1 %1974, %v1389_v16  }
  0x32   : > { %438 = vmatmul.mubr.bf16.vlgmr.msra.gmra.mxu0 %v2148_v32  ;;  %713 = vmatmul.mubr.bf16.vlgmr.msra.gmra.mxu1 %v2148_v32 }
  0x33   : > { %1824 = vmatpush3.bf16.msra.mxu1 %v2011_v37  ;;  %1916 = vmatpush3.bf16.msra.mxu0 %v2012_v38 }
  0x34   : > { %1825 = vmatprep.subr.bf16.mxu1 %v2013_v39  ;;  %445 = vmatprep.mubr.bf16.mxu0 %v2156_v36 }
  0x35   : > { %720 = vmatprep.mubr.bf16.mxu1 %v2156_v36  ;;  %1917 = vmatprep.subr.bf16.mxu0 %v2027_v46 }
  0x36   : > { %1429 = vperm.xlu1 %1974, %v1391_v23   ;;  %1424 = vperm.xlu0 %1973, %v1390_v25  }
  0x37   : > { %1826 = vmatpush3.bf16.msra.mxu1 %v2014_v40  ;;  %1918 = vmatpush3.bf16.msra.mxu0 %v2027_v46 }
  0x38   : > { %1827 = vmatprep.subr.bf16.mxu1 %v2018_v41  ;;  %1927 = vmatprep.subr.bf16.mxu0 %v2041_v54 }
  0x3a   : > { %446 = vmatmul.mubr.bf16.gmra.mxu0 %v2170_v42  ;;  %721 = vmatmul.mubr.bf16.gmra.mxu1 %v2170_v42 }
  0x3b   : > { %453 = vmatprep.mubr.bf16.mxu0 %v2175_v43  ;;  %1828 = vmatpush3.bf16.msra.mxu1 %v2019_v44 }
  0x3c   : > { %728 = vmatprep.mubr.bf16.mxu1 %v2175_v43  ;;  %1829 = vmatprep.subr.bf16.mxu1 %v2020_v45 }
  0x3f   : > { %1830 = vmatpush3.bf16.msra.mxu1 %v2021_v47 }
  0x40   : > { %1831 = vmatprep.subr.bf16.mxu1 %v2025_v48 }
  0x42   : > { %454 = vmatmul.mubr.bf16.gmra.mxu0 %v2189_v49  ;;  %729 = vmatmul.mubr.bf16.gmra.mxu1 %v2189_v49 }
  0x43   : > { %461 = vmatprep.mubr.bf16.mxu0 %v2194_v50  ;;  %1832 = vmatpush3.bf16.msra.mxu1 %v2026_v51 }
  0x44   : > { %736 = vmatprep.mubr.bf16.mxu1 %v2194_v50  ;;  %1833 = vmatprep.subr.bf16.mxu1 %v2028_v52 }
  0x47   : > { %1834 = vmatpush3.bf16.msra.mxu1 %v2029_v53 }
  0x48   : > { %1835 = vmatprep.subr.bf16.mxu1 %v2033_v55 }
  0x4a   : > { %462 = vmatmul.mubr.bf16.gmra.mxu0 %v2208_v56  ;;  %737 = vmatmul.mubr.bf16.gmra.mxu1 %v2208_v56 }
  0x4b   : > { %1919 = vmatprep.mubr.msk.bf16.mxu0 %vm392_vm0, %v2213_v57  ;;  %1836 = vmatpush3.bf16.msra.mxu1 %v2034_v58 }
  0x4c   : > { %995 = vmatprep.mubr.bf16.mxu1 %v2103_v0  ;;  %1837 = vmatprep.subr.bf16.mxu1 %v2035_v59 }
  0x4f   : > { %1838 = vmatpush3.bf16.msra.mxu1 %v2036_v60 }
  0x50   : > { %1869 = vmatprep.subr.bf16.mxu1 %v2039_v61 }
  0x52   : > { %1920 = vmatmul.mubr.msk.bf16.vlgmr.msra.gmra.mxu0 %vm392_vm0, %v2227_v62  ;;  %996 = vmatmul.mubr.bf16.vlgmr.msra.gmra.mxu1 %v2148_v32 }
  0x53   : > { %1928 = vmatpush3.bf16.msra.mxu0 %v2041_v54  ;;  %1870 = vmatpush3.bf16.msra.mxu1 %v2040_v63 }
  0x54   : > { %1923 = vmatprep.mubr.msk.bf16.mxu0 %vm392_vm0, %v2233_v1  ;;  %1871 = vmatprep.subr.bf16.mxu1 %v2042_v2 }
  0x55   : > { %1003 = vmatprep.mubr.bf16.mxu1 %v2156_v36  ;;  %1929 = vmatprep.subr.bf16.mxu0 %v2048_v3 }
  0x57   : > { %1930 = vmatpush3.bf16.msra.mxu0 %v2048_v3  ;;  %1872 = vmatpush3.bf16.msra.mxu1 %v2043_v4 }
  0x58   : > { %1939 = vmatprep.subr.bf16.mxu0 %v2053_v5  ;;  %1873 = vmatprep.subr.bf16.mxu1 %v2046_v6 }
  0x5a   : > { %1924 = vmatmul.mubr.msk.bf16.gmra.mxu0 %vm392_vm0, %v2249_v7  ;;  %1004 = vmatmul.mubr.bf16.gmra.mxu1 %v2170_v42 }
  0x5b   : > { %1931 = vmatprep.mubr.msk.bf16.mxu0 %vm392_vm0, %v2213_v57  ;;  %1874 = vmatpush3.bf16.msra.mxu1 %v2047_v8 }
  0x5c   : > { %1011 = vmatprep.mubr.bf16.mxu1 %v2175_v43  ;;  %1875 = vmatprep.subr.bf16.mxu1 %v2049_v9 }
  0x5f   : > { %1876 = vmatpush3.bf16.msra.mxu1 %v2050_v13 }
  0x60   : > { %1877 = vmatprep.subr.bf16.mxu1 %v2051_v14 }
  0x62   : > { %1932 = vmatmul.mubr.msk.bf16.vlgmr.msra.gmra.mxu0 %vm392_vm0, %v2227_v62  ;;  %1012 = vmatmul.mubr.bf16.gmra.mxu1 %v2189_v49 }
  0x63   : > { %1940 = vmatpush3.bf16.msra.mxu0 %v2053_v5  ;;  %1878 = vmatpush3.bf16.msra.mxu1 %v2052_v17 }
  0x64   : > { %1935 = vmatprep.mubr.msk.bf16.mxu0 %vm392_vm0, %v2233_v1  ;;  %1879 = vmatprep.subr.bf16.mxu1 %v2054_v18 }
  0x65   : > { %1019 = vmatprep.mubr.bf16.mxu1 %v2194_v50  ;;  %1941 = vmatprep.subr.bf16.mxu0 %v2058_v19 }
  0x67   : > { %1942 = vmatpush3.bf16.msra.mxu0 %v2058_v19  ;;  %1880 = vmatpush3.bf16.msra.mxu1 %v2055_v21 }
  0x68   : > { %1951 = vmatprep.subr.bf16.mxu0 %v2061_v22  ;;  %1881 = vmatprep.subr.bf16.mxu1 %v2056_v24 }
  0x6a   : > { %1936 = vmatmul.mubr.msk.bf16.gmra.mxu0 %vm392_vm0, %v2249_v7  ;;  %1020 = vmatmul.mubr.bf16.gmra.mxu1 %v2208_v56 }
  0x6b   : > { %1943 = vmatprep.mubr.msk.bf16.mxu0 %vm392_vm0, %v2213_v57  ;;  %1882 = vmatpush3.bf16.msra.mxu1 %v2057_v26 }
  0x6c   : > { %1278 = vmatprep.mubr.bf16.mxu1 %v2103_v0  ;;  %1883 = vmatprep.subr.bf16.mxu1 %v2059_v27 }
  0x6f   : > { %1884 = vmatpush3.bf16.msra.mxu1 %v2060_v28 }
  0x72   : > { %1944 = vmatmul.mubr.msk.bf16.vlgmr.msra.gmra.mxu0 %vm392_vm0, %v2227_v62  ;;  %1279 = vmatmul.mubr.bf16.vlgmr.msra.gmra.mxu1 %v2148_v32 }
  0x73   : > { %1952 = vmatpush3.bf16.msra.mxu0 %v2061_v22  ;;  %1947 = vmatprep.mubr.msk.bf16.mxu0 %vm392_vm0, %v2233_v1 }
  0x74   : > { %1286 = vmatprep.mubr.bf16.mxu1 %v2156_v36  ;;  %1953 = vmatprep.subr.bf16.mxu0 %v2062_v29 }
  0x77   : > { %1954 = vmatpush3.bf16.msra.mxu0 %v2062_v29 }
  0x7a   : > { %1948 = vmatmul.mubr.msk.bf16.gmra.mxu0 %vm392_vm0, %v2249_v7  ;;  %1287 = vmatmul.mubr.bf16.gmra.mxu1 %v2170_v42 }
  0x7b   : > { %1955 = vmatprep.mubr.msk.bf16.mxu0 %vm392_vm0, %v2213_v57  ;;  %1294 = vmatprep.mubr.bf16.mxu1 %v2175_v43 }
  0x82   : > { %1956 = vmatmul.mubr.msk.bf16.vlgmr.msra.gmra.mxu0 %vm392_vm0, %v2227_v62  ;;  %1295 = vmatmul.mubr.bf16.gmra.mxu1 %v2189_v49 }
  0x83   : > { %1959 = vmatprep.mubr.msk.bf16.mxu0 %vm392_vm0, %v2233_v1  ;;  %1302 = vmatprep.mubr.bf16.mxu1 %v2194_v50 }
  0x8a   : > { %1960 = vmatmul.mubr.msk.bf16.gmra.mxu0 %vm392_vm0, %v2249_v7  ;;  %1303 = vmatmul.mubr.bf16.gmra.mxu1 %v2208_v56 }
  0xf2   : > { %v1747_v0 = vpop.f32.mrf.mxu0  ;;  %v1793_v30 = vpop.f32.mrf.mxu1 }
  0xf4   : > { %v1748_v31 = vpop.f32.mrf.mxu0  ;;  %v1794_v33 = vpop.f32.mrf.mxu1 }
  0xf5   : > { %v1749_v32 = vadd.f32 %v1748_v31, %v1747_v0  ;;  %v1795_v34 = vadd.f32 %v1794_v33, %v1793_v30 }
  0xf6   : > { %v1750_v35 = vpop.f32.mrf.mxu0  ;;  %v1796_v36 = vpop.f32.mrf.mxu1 }
  0xf8   : > { %v1751_v37 = vpop.f32.mrf.mxu0  ;;  %v1797_v39 = vpop.f32.mrf.mxu1 }
  0xf9   : > { %v2328_v38 = vadd.f32 %v1751_v37, %v1750_v35  ;;  %v2330_v40 = vadd.f32 %v1797_v39, %v1796_v36 }
  0xfa   : > { %v1753_v41 = vpop.f32.mrf.mxu0  ;;  %v1799_v42 = vpop.f32.mrf.mxu1 }
  0xfc   : > { %v1754_v43 = vpop.f32.mrf.mxu0  ;;  %v1800_v45 = vpop.f32.mrf.mxu1 }
  0xfd   : > { %v1755_v44 = vadd.f32 %v1754_v43, %v1753_v41  ;;  %v1801_v23 = vadd.f32 %v1800_v45, %v1799_v42 }
  0xfe   : > { %v1756_v46 = vpop.f32.mrf.mxu0  ;;  %v1802_v47 = vpop.f32.mrf.mxu1 }
 0x100   : > { %v1757_v48 = vpop.f32.mrf.mxu0  ;;  %v1803_v50 = vpop.f32.mrf.mxu1 }
 0x101   : > { %v1758_v49 = vadd.f32 %v1757_v48, %v1756_v46  ;;  %v1804_v0 = vadd.f32 %v1803_v50, %v1802_v47 }
 0x102   : > { %v1759_v51 = vpop.f32.mrf.mxu0  ;;  %v1805_v52 = vpop.f32.mrf.mxu1 }
 0x104   : > { %v1760_v53 = vpop.f32.mrf.mxu0  ;;  %v1806_v55 = vpop.f32.mrf.mxu1 }
 0x105   : > { %v1761_v54 = vadd.f32 %v1760_v53, %v1759_v51  ;;  %v1807_v56 = vadd.f32 %v1806_v55, %v1805_v52 }
 0x106   : > { %v1762_v57 = vpop.f32.mrf.mxu0  ;;  %v1808_v58 = vpop.f32.mrf.mxu1 }
 0x108   : > { %v1763_v59 = vpop.f32.mrf.mxu0  ;;  %v1809_v61 = vpop.f32.mrf.mxu1 }
 0x109   : > { %v1764_v60 = vadd.f32 %v1763_v59, %v1762_v57  ;;  %v1810_v62 = vadd.f32 %v1809_v61, %v1808_v58 }
 0x10a   : > { %v2332_v63 = vpop.f32.mrf.mxu0  ;;  %v2334_v1 = vpop.f32.mrf.mxu1 }
 0x10c   : > { %v2336_v2 = vpop.f32.mrf.mxu0  ;;  %v2338_v3 = vpop.f32.mrf.mxu1 }
 0x10e   : > { %v2340_v4 = vpop.f32.mrf.mxu0  ;;  %v2342_v5 = vpop.f32.mrf.mxu1 }
 0x110   : > { %v2344_v6 = vpop.f32.mrf.mxu0  ;;  %v2346_v7 = vpop.f32.mrf.mxu1 }
 0x112   : > { %v1921_v8 = vpop.f32.mrf.mxu0  ;;  %v2348_v9 = vpop.f32.mrf.mxu1 }
 0x113   : > { %v513_v26 = vadd.f32 %v1921_v8, %v1755_v44 }
 0x114   : > { %v504_v10 = vpop.f32.mrf.mxu0  ;;  %v2350_v11 = vpop.f32.mrf.mxu1 }
 0x115   : > { %v2362_v30 = vadd.f32 %v1749_v32, %v504_v10 }
 0x116   : > { %v1922_v12 = vpop.f32.mrf.mxu0  ;;  %v2352_v13 = vpop.f32.mrf.mxu1 }
 0x117   : > { %v2366_v37 = vadd.f32 %v1922_v12, %v1758_v49 }
 0x118   : > { %v507_v14 = vpop.f32.mrf.mxu0  ;;  %v2354_v15 = vpop.f32.mrf.mxu1 }
 0x119   : > { %v2374_v44 = vadd.f32 %v2328_v38, %v507_v14 }
 0x11a   : > { %v2356_v16 = vpop.f32.mrf.mxu0  ;;  %v1845_v17 = vpop.f32.mrf.mxu1 }
 0x11c   : > { %v520_v18 = vpop.f32.mrf.mxu0  ;;  %v1846_v19 = vpop.f32.mrf.mxu1 }
 0x11d   : > { %v2389_v50 = vadd.f32 %v1761_v54, %v520_v18 }
 0x11e   : > { %v2358_v20 = vpop.f32.mrf.mxu0  ;;  %v1848_v21 = vpop.f32.mrf.mxu1 }
 0x120   : > { %v523_v22 = vpop.f32.mrf.mxu0  ;;  %v1849_v24 = vpop.f32.mrf.mxu1 }
 0x121   : > { %v2401_v57 = vadd.f32 %v1764_v60, %v523_v22  ;;  %v1847_v22 = vadd.f32 %v1846_v19, %v1845_v17 }
 0x122   : > { %v1933_v25 = vpop.f32.mrf.mxu0  ;;  %v2360_v28 = vpop.f32.mrf.mxu1 }
 0x123   : > { %v788_v27 = vadd.f32 %v1933_v25, %v1801_v23  ;;  %2479 = vst [vmem:[#allocation2_spill] sm:$0xff] %v2401_v57 }
 0x124   : > { %v779_v29 = vpop.f32.mrf.mxu0  ;;  %v2364_v35 = vpop.f32.mrf.mxu1 }
 0x125   : > { %v812_v31 = vmax.f32 %v513_v26, %v788_v27  ;;  %v780_v33 = vadd.f32 %v1795_v34, %v779_v29  ;;  %v1841_v29 = vadd.f32 %v2350_v11, %v2348_v9  ;;  %v1405_v9 = vpop.permute.xlu1 %1404 }
 0x126   : > { %v1934_v36 = vpop.f32.mrf.mxu0  ;;  %v2371_v42 = vpop.f32.mrf.mxu1 }
 0x127   : > { %v810_v39 = vmax.f32 %v2362_v30, %v780_v33  ;;  %v2369_v41 = vadd.f32 %v1934_v36, %v1804_v0  ;;  %v1850_v33 = vadd.f32 %v1849_v24, %v1848_v21 }
 0x128   : > { %v782_v43 = vpop.f32.mrf.mxu0  ;;  %v2381_v45 = vpop.f32.mrf.mxu1 }
 0x129   : > { %v813_v32 = vmax.f32 %v2366_v37, %v2369_v41  ;;  %v2379_v34 = vadd.f32 %v2330_v40, %v782_v43  ;;  %v1395_v43 = vpop.permute.xlu0 %1394 }
 0x12a   : > { %v2383_v46 = vpop.f32.mrf.mxu0  ;;  %v2387_v48 = vpop.f32.mrf.mxu1 }
 0x12c   : > { %v795_v49 = vpop.f32.mrf.mxu0  ;;  %v2393_v51 = vpop.f32.mrf.mxu1 }
 0x12d   : > { %v2391_v38 = vadd.f32 %v1807_v56, %v795_v49 }
 0x12e   : > { %v2395_v52 = vpop.f32.mrf.mxu0  ;;  %v2399_v53 = vpop.f32.mrf.mxu1 }
 0x130   : > { %v798_v55 = vpop.f32.mrf.mxu0  ;;  %v2405_v59 = vpop.f32.mrf.mxu1 }
 0x131   : > { %v2403_v58 = vadd.f32 %v1810_v62, %v798_v55  ;;  %v1844_v55 = vadd.f32 %v2354_v15, %v2352_v13 }
 0x132   : > { %v1945_v54 = vpop.f32.mrf.mxu0  ;;  %v1885_v61 = vpop.f32.mrf.mxu1 }
 0x133   : > { %2480 = vst [vmem:[#allocation3_spill] sm:$0xff] %v2403_v58  ;;  %v1071_v0 = vadd.f32 %v1945_v54, %v1847_v22  ;;  %v1853_v22 = vadd.f32 %v2364_v35, %v2360_v28 }
 0x134   : > { %v1062_v8 = vpop.f32.mrf.mxu0  ;;  %v1886_v10 = vpop.f32.mrf.mxu1 }
 0x135   : > { %v1063_v37 = vadd.f32 %v1841_v29, %v1062_v8  ;;  %v1095_v19 = vmax.f32 %v812_v31, %v1071_v0  ;;  %v1887_v40 = vadd.f32 %v1886_v10, %v1885_v61  ;;  %v1400_v61 = vpop.permute.xlu0 %1399 }
 0x136   : > { %v1946_v12 = vpop.f32.mrf.mxu0  ;;  %v1888_v14 = vpop.f32.mrf.mxu1 }
 0x137   : > { %v1074_v56 = vadd.f32 %v1946_v12, %v1850_v33  ;;  %v1093_v54 = vmax.f32 %v810_v39, %v1063_v37  ;;  %v1767_v39 = vadd.f32 %v2336_v2, %v2332_v63  ;;  %v1856_v2 = vadd.f32 %v2381_v45, %v2371_v42 }
 0x138   : > { %v1065_v18 = vpop.f32.mrf.mxu0  ;;  %v1889_v23 = vpop.f32.mrf.mxu1  ;;  %v2482_v45 = vmax.f32 %v2389_v50, %v2391_v38 }
 0x139   : > { %v1066_v57 = vadd.f32 %v1844_v55, %v1065_v18  ;;  %v1890_v15 = vadd.f32 %v1889_v23, %v1888_v14 }
 0x13a   : > { %v2409_v25 = vpop.f32.mrf.mxu0  ;;  %v1891_v26 = vpop.f32.mrf.mxu1 }
 0x13c   : > { %v1078_v60 = vpop.f32.mrf.mxu0  ;;  %v1892_v62 = vpop.f32.mrf.mxu1 }
 0x13d   : > { %v1893_v41 = vadd.f32 %v1892_v62, %v1891_v26  ;;  %v1096_v62 = vmax.f32 %v813_v32, %v1074_v56  ;;  %v1079_v28 = vadd.f32 %v1853_v22, %v1078_v60 }
 0x13e   : > { %v2411_v27 = vpop.f32.mrf.mxu0  ;;  %v1894_v30 = vpop.f32.mrf.mxu1 }
 0x140   : > { %v1081_v36 = vpop.f32.mrf.mxu0  ;;  %v1895_v49 = vpop.f32.mrf.mxu1 }
 0x141   : > { %v1896_v21 = vadd.f32 %v1895_v49, %v1894_v30 }
 0x142   : > { %v1957_v17 = vpop.f32.mrf.mxu0  ;;  %v1897_v47 = vpop.f32.mrf.mxu1 }
 0x143   : > { %v1354_v58 = vadd.f32 %v1957_v17, %v1893_v41  ;;  %v1415_v41 = vpop.permute.xlu0 %1414 }
 0x144   : > { %v1345_v11 = vpop.f32.mrf.mxu0  ;;  %v1898_v8 = vpop.f32.mrf.mxu1 }
 0x145   : > { %v1378_v24 = vmax.f32 %v1095_v19, %v1354_v58  ;;  %v1346_v26 = vadd.f32 %v1887_v40, %v1345_v11  ;;  %v1813_v58 = vadd.f32 %v2338_v3, %v2334_v1  ;;  %v2481_v40 = vmax.f32 %v2374_v44, %v2379_v34  ;;  %v1410_v34 = vpop.permute.xlu1 %1409 }
 0x146   : > { %v1958_v13 = vpop.f32.mrf.mxu0  ;;  %v1900_v12 = vpop.f32.mrf.mxu1  ;;  %v1770_v1 = vadd.f32 %v2344_v6, %v2340_v4  ;;  %v1859_v44 = vadd.f32 %v2393_v51, %v2387_v48  ;;  %v1899_v60 = vadd.f32 %v1898_v8, %v1897_v47  ;;  %v1816_v4 = vadd.f32 %v2346_v7, %v2342_v5  ;;  %v2484_v8 = vld [vmem:[#allocation3_spill] sm:$0xff] }
 0x147   : > { %v1434_v31 = vadd.f32 %v1405_v9, %v1378_v24  ;;  %v1376_v10 = vmax.f32 %v1093_v54, %v1346_v26  ;;  %v1357_v18 = vadd.f32 %v1958_v13, %v1896_v21  ;;  %v1094_v29 = vmax.f32 %v2481_v40, %v1066_v57 }
 0x148   : > { %v1348_v35 = vpop.f32.mrf.mxu0  ;;  %v1901_v23 = vpop.f32.mrf.mxu1  ;;  %v804_v3 = vadd.f32 %v2383_v46, %v1813_v58  ;;  %v529_v6 = vadd.f32 %v2356_v16, %v1767_v39  ;;  %v1087_v42 = vadd.f32 %v2409_v25, %v1859_v44  ;;  %v1097_v46 = vmax.f32 %v2482_v45, %v1079_v28 }
 0x149   : > { %v1442_v32 = vmax.f32 %v1434_v31, 0.0  ;;  %v1432_v56 = vadd.f32 %v1395_v43, %v1376_v10  ;;  %v1379_v14 = vmax.f32 %v1096_v62, %v1357_v18  ;;  %v1349_v63 = vadd.f32 %v1890_v15, %v1348_v35 }
 0x14a   : > { %v1961_v57 = vpop.f32.mrf.mxu0  ;;  %v1903_v37 = vpop.f32.mrf.mxu1  ;;  %v1082_v51 = vadd.f32 %v1856_v2, %v1081_v36  ;;  %v816_v17 = vmax.f32 %v529_v6, %v804_v3  ;;  %v807_v5 = vadd.f32 %v2395_v52, %v1816_v4  ;;  %v1862_v7 = vadd.f32 %v2405_v59, %v2399_v53  ;;  %v2483_v52 = vld [vmem:[#allocation2_spill] sm:$0xff] }
 0x14b   : > { %1451 = vst.msk [vmem:[%s2430_s8 + $0x10] sm:$0xff] %vm1448_vm1, %v1442_v32  ;;  %v1440_v0 = vmax.f32 %v1432_v56, 0.0  ;;  %v1435_v30 = vadd.f32 %v1410_v34, %v1379_v14  ;;  %v1377_v33 = vmax.f32 %v1094_v29, %v1349_v63  ;;  %v1902_v50 = vadd.f32 %v1901_v23, %v1900_v12  ;;  %v1420_v59 = vpop.permute.xlu1 %1419 }
 0x14c   : > { %v1361_v48 = vpop.f32.mrf.mxu0  ;;  %v1904_v49 = vpop.f32.mrf.mxu1  ;;  %v532_v9 = vadd.f32 %v2358_v20, %v1770_v1  ;;  %v1099_v11 = vmax.f32 %v816_v17, %v1087_v42  ;;  %v1090_v54 = vadd.f32 %v2411_v27, %v1862_v7  ;;  %v2485_v26 = vmax.f32 %v2483_v52, %v2484_v8 }
 0x14d   : > { %1449 = vst.msk [vmem:[%s2430_s8] sm:$0xff] %vm1448_vm1, %v1440_v0  ;;  %v1443_v47 = vmax.f32 %v1435_v30, 0.0  ;;  %v1433_v43 = vadd.f32 %v1400_v61, %v1377_v33  ;;  %v1362_v55 = vadd.f32 %v1899_v60, %v1361_v48  ;;  %v1905_v16 = vadd.f32 %v1904_v49, %v1903_v37  ;;  %v1425_v61 = vpop.permute.xlu0 %1424 }
 0x14e   : > { %v1962_v25 = vpop.f32.mrf.mxu0  ;;  %v1906_v19 = vpop.f32.mrf.mxu1  ;;  %v1098_v53 = vmax.f32 %v2485_v26, %v1082_v51  ;;  %v817_v15 = vmax.f32 %v532_v9, %v807_v5 }
 0x14f   : > { %1452 = vst.msk [vmem:[%s2430_s8 + $0x18] sm:$0xff] %vm1448_vm1, %v1443_v47  ;;  %v1441_v38 = vmax.f32 %v1433_v43, 0.0  ;;  %v1380_v36 = vmax.f32 %v1097_v46, %v1362_v55  ;;  %v1370_v21 = vadd.f32 %v1961_v57, %v1905_v16  ;;  %v1430_v28 = vpop.permute.xlu1 %1429 }
 0x150   : > { %v1364_v24 = vpop.f32.mrf.mxu0  ;;  %v1907_v62 = vpop.f32.mrf.mxu1  ;;  %v1100_v12 = vmax.f32 %v817_v15, %v1090_v54 }
 0x151   : > { %1450 = vst.msk [vmem:[%s2430_s8 + $0x8] sm:$0xff] %vm1448_vm1, %v1441_v38  ;;  %v1436_v22 = vadd.f32 %v1415_v41, %v1380_v36  ;;  %v1365_v13 = vadd.f32 %v1902_v50, %v1364_v24  ;;  %v1382_v31 = vmax.f32 %v1099_v11, %v1370_v21  ;;  %v1908_v20 = vadd.f32 %v1907_v62, %v1906_v19 }
 0x153   : > { %v1444_v27 = vmax.f32 %v1436_v22, 0.0  ;;  %v1381_v10 = vmax.f32 %v1098_v53, %v1365_v13  ;;  %v1438_v18 = vadd.f32 %v1425_v61, %v1382_v31  ;;  %v1373_v39 = vadd.f32 %v1962_v25, %v1908_v20 }
 0x155   : > { %1453 = vst.msk [vmem:[%s2430_s8 + $0x20] sm:$0xff] %vm1448_vm1, %v1444_v27  ;;  %v1437_v58 = vadd.f32 %v1420_v59, %v1381_v10  ;;  %v1446_v40 = vmax.f32 %v1438_v18, 0.0  ;;  %v1383_v29 = vmax.f32 %v1100_v12, %v1373_v39 }
 0x157   : > { %v1445_v35 = vmax.f32 %v1437_v58, 0.0  ;;  %1455 = vst.msk [vmem:[%s2430_s8 + $0x30] sm:$0xff] %vm1448_vm1, %v1446_v40  ;;  %v1439_v32 = vadd.f32 %v1430_v28, %v1383_v29 }
 0x159   : > { %1454 = vst.msk [vmem:[%s2430_s8 + $0x28] sm:$0xff] %vm1448_vm1, %v1445_v35  ;;  %v1447_v56 = vmax.f32 %v1439_v32, 0.0 }
 0x15b   : > { %1456 = vst.msk [vmem:[%s2430_s8 + $0x38] sm:$0xff] %vm1448_vm1, %v1447_v56 }
 0x15c PF: > { %s13_s12 = sadd.s32 1, %s2069_s12  }
 0x15d   : > { %p10_p4 = scmp.ge.s32.totalorder %s13_s12, 4  }
 0x15f   :  { %12 = sbr.rel (!%p10_p4) target bundleno = 1 (0x1), region = 65 }

// kernel: net_forward.7
= control target key start
LH: loop header
LB: loop body
LE: loop exit
PB: predicated region body
PF: predicated region fallthrough
CT: control target
= control target key end

     0   :  { %v792_v27 = vmov 1983009808   ;;  %v120_v29 = vlaneseq  ;;  %s1123_s0 = inlined_call_operand.vmem [shape: f32[2,576], index: 0, kind: input, shape index: {}]   ;;  %s1124_s1 = inlined_call_operand.vmem [shape: f32[2,2], index: 1, kind: input, shape index: {}]   ;;  %s1125_s2 = inlined_call_operand.vmem [shape: f32[576,32], index: 2, kind: input, shape index: {}]   ;;  %s1126_s3 = inlined_call_operand.vmem [shape: f32[1,32], index: 3, kind: input, shape index: {}]   ;;  %s1127_s4 = inlined_call_operand.vmem [shape: f32[2,4], index: 4, kind: input, shape index: {}]   ;;  %s1128_s5 = inlined_call_operand.vmem [shape: f32[1,4], index: 5, kind: input, shape index: {}]   ;;  %s1129_s6 = inlined_call_operand.vmem [shape: f32[32,2], index: 6, kind: input, shape index: {}]   ;;  %s1130_s7 = inlined_call_operand.vmem [shape: f32[4,2], index: 7, kind: input, shape index: {}]   ;;  %s1131_s8 = inlined_call_operand.vmem [shape: f32[1,2], index: 8, kind: input, shape index: {}]   ;;  %s1132_s9 = inlined_call_operand.hbm [shape: f32[2,2], index: 9, kind: output, shape index: {}]  }
   0x1   :  { %v66_v0 = vld [vmem:[%s1125_s2 + $0xf8] sm:$0xff]  ;;  %v65_v2 = vld [vmem:[%s1125_s2 + $0xf0] sm:$0xff]  ;;  %v64_v6 = vld [vmem:[%s1125_s2 + $0xe8] sm:$0xff]  ;;  %v118_v28 = vunpack.c.l.s4 %v792_v27 }
   0x2   :  { %v50_v1 = vld [vmem:[%s1125_s2 + $0x78] sm:$0xff]  ;;  %637 = vmatprep.subr.mxu0 %v66_v0  ;;  %v49_v4 = vld [vmem:[%s1125_s2 + $0x70] sm:$0xff]  ;;  %v48_v8 = vld [vmem:[%s1125_s2 + $0x68] sm:$0xff]  ;;  %v121_v39 = vshrl.u32 %v120_v29, 7 }
   0x3   :  { %v98_v3 = vld [vmem:[%s1125_s2 + $0x1f8] sm:$0xff]  ;;  %638 = vmatpush3.msra.mxu0 %v50_v1  ;;  %v97_v7 = vld [vmem:[%s1125_s2 + $0x1f0] sm:$0xff]  ;;  %v96_v10 = vld [vmem:[%s1125_s2 + $0x1e8] sm:$0xff]  ;;  %v119_v38 = vunpack.c.0.s8 %v118_v28 }
   0x4   :  { %v82_v5 = vld [vmem:[%s1125_s2 + $0x178] sm:$0xff]  ;;  %672 = vmatprep.subr.mxu1 %v98_v3  ;;  %639 = vmatprep.subr.mxu0 %v65_v2  ;;  %v81_v9 = vld [vmem:[%s1125_s2 + $0x170] sm:$0xff]  ;;  %v63_v11 = vld [vmem:[%s1125_s2 + $0xe0] sm:$0xff] }
   0x5   :  { %673 = vmatpush3.msra.mxu1 %v82_v5  ;;  %640 = vmatpush3.msra.mxu0 %v49_v4  ;;  %v80_v12 = vld [vmem:[%s1125_s2 + $0x168] sm:$0xff]  ;;  %v47_v13 = vld [vmem:[%s1125_s2 + $0x60] sm:$0xff]  ;;  %v62_v15 = vld [vmem:[%s1125_s2 + $0xd8] sm:$0xff]  ;;  %v122_v48 = vsub.s32 %v119_v38, %v121_v39 }
   0x6   :  { %674 = vmatprep.subr.mxu1 %v97_v7  ;;  %641 = vmatprep.subr.mxu0 %v64_v6  ;;  %v95_v14 = vld [vmem:[%s1125_s2 + $0x1e0] sm:$0xff]  ;;  %v46_v17 = vld [vmem:[%s1125_s2 + $0x58] sm:$0xff]  ;;  %v61_v19 = vld [vmem:[%s1125_s2 + $0xd0] sm:$0xff] }
   0x7   :  { %675 = vmatpush3.msra.mxu1 %v81_v9  ;;  %642 = vmatpush3.msra.mxu0 %v48_v8  ;;  %v79_v16 = vld [vmem:[%s1125_s2 + $0x160] sm:$0xff]  ;;  %v94_v18 = vld [vmem:[%s1125_s2 + $0x1d8] sm:$0xff]  ;;  %v45_v21 = vld [vmem:[%s1125_s2 + $0x50] sm:$0xff] }
   0x8   :  { %676 = vmatprep.subr.mxu1 %v96_v10  ;;  %643 = vmatprep.subr.mxu0 %v63_v11  ;;  %v78_v20 = vld [vmem:[%s1125_s2 + $0x158] sm:$0xff]  ;;  %v93_v22 = vld [vmem:[%s1125_s2 + $0x1d0] sm:$0xff]  ;;  %v60_v23 = vld [vmem:[%s1125_s2 + $0xc8] sm:$0xff] }
   0x9   :  { %677 = vmatpush3.msra.mxu1 %v80_v12  ;;  %644 = vmatpush3.msra.mxu0 %v47_v13  ;;  %v77_v24 = vld [vmem:[%s1125_s2 + $0x150] sm:$0xff]  ;;  %v44_v25 = vld [vmem:[%s1125_s2 + $0x48] sm:$0xff]  ;;  %v59_v30 = vld [vmem:[%s1125_s2 + $0xc0] sm:$0xff] }
   0xa   :  { %678 = vmatprep.subr.mxu1 %v95_v14  ;;  %645 = vmatprep.subr.mxu0 %v62_v15  ;;  %v92_v26 = vld [vmem:[%s1125_s2 + $0x1c8] sm:$0xff]  ;;  %v43_v32 = vld [vmem:[%s1125_s2 + $0x40] sm:$0xff]  ;;  %v58_v34 = vld [vmem:[%s1125_s2 + $0xb8] sm:$0xff] }
   0xb   :  { %679 = vmatpush3.msra.mxu1 %v79_v16  ;;  %646 = vmatpush3.msra.mxu0 %v46_v17  ;;  %v76_v31 = vld [vmem:[%s1125_s2 + $0x148] sm:$0xff]  ;;  %v91_v33 = vld [vmem:[%s1125_s2 + $0x1c0] sm:$0xff]  ;;  %v42_v36 = vld [vmem:[%s1125_s2 + $0x38] sm:$0xff] }
   0xc   :  { %680 = vmatprep.subr.mxu1 %v94_v18  ;;  %647 = vmatprep.subr.mxu0 %v61_v19  ;;  %v75_v35 = vld [vmem:[%s1125_s2 + $0x140] sm:$0xff]  ;;  %v90_v37 = vld [vmem:[%s1125_s2 + $0x1b8] sm:$0xff]  ;;  %v57_v40 = vld [vmem:[%s1125_s2 + $0xb0] sm:$0xff] }
   0xd   :  { %681 = vmatpush3.msra.mxu1 %v78_v20  ;;  %648 = vmatpush3.msra.mxu0 %v45_v21  ;;  %v74_v41 = vld [vmem:[%s1125_s2 + $0x138] sm:$0xff]  ;;  %v41_v42 = vld [vmem:[%s1125_s2 + $0x30] sm:$0xff]  ;;  %v56_v44 = vld [vmem:[%s1125_s2 + $0xa8] sm:$0xff] }
   0xe   :  { %682 = vmatprep.subr.mxu1 %v93_v22  ;;  %649 = vmatprep.subr.mxu0 %v60_v23  ;;  %v89_v43 = vld [vmem:[%s1125_s2 + $0x1b0] sm:$0xff]  ;;  %v40_v46 = vld [vmem:[%s1125_s2 + $0x28] sm:$0xff]  ;;  %v55_v49 = vld [vmem:[%s1125_s2 + $0xa0] sm:$0xff] }
   0xf   :  { %683 = vmatpush3.msra.mxu1 %v77_v24  ;;  %650 = vmatpush3.msra.mxu0 %v44_v25  ;;  %v73_v45 = vld [vmem:[%s1125_s2 + $0x130] sm:$0xff]  ;;  %v88_v47 = vld [vmem:[%s1125_s2 + $0x1a8] sm:$0xff]  ;;  %v33_v51 = vld [vmem:[%s1123_s0] sm:$0xff] }
  0x10   :  { %684 = vmatprep.subr.mxu1 %v92_v26  ;;  %651 = vmatprep.subr.mxu0 %v59_v30  ;;  %v72_v50 = vld [vmem:[%s1125_s2 + $0x128] sm:$0xff]  ;;  %v39_v52 = vld [vmem:[%s1125_s2 + $0x20] sm:$0xff]  ;;  %v54_v54 = vld [vmem:[%s1125_s2 + $0x98] sm:$0xff]  ;;  %v123_v58 = vrot.slane %v33_v51, %v122_v48  ;;  %v116_v59 = vcombine.high %v33_v51, %v33_v51 }
  0x11   :  { %685 = vmatpush3.msra.mxu1 %v76_v31  ;;  %652 = vmatpush3.msra.mxu0 %v43_v32  ;;  %v87_v53 = vld [vmem:[%s1125_s2 + $0x1a0] sm:$0xff]  ;;  %v38_v56 = vld [vmem:[%s1125_s2 + $0x18] sm:$0xff]  ;;  %v53_v60 = vld [vmem:[%s1125_s2 + $0x90] sm:$0xff] }
  0x12   :  { %686 = vmatprep.subr.mxu1 %v91_v33  ;;  %653 = vmatprep.subr.mxu0 %v58_v34  ;;  %v71_v55 = vld [vmem:[%s1125_s2 + $0x120] sm:$0xff]  ;;  %v86_v57 = vld [vmem:[%s1125_s2 + $0x198] sm:$0xff]  ;;  %v37_v62 = vld [vmem:[%s1125_s2 + $0x10] sm:$0xff] }
  0x13   :  { %687 = vmatpush3.msra.mxu1 %v75_v35  ;;  %654 = vmatpush3.msra.mxu0 %v42_v36  ;;  %v70_v61 = vld [vmem:[%s1125_s2 + $0x118] sm:$0xff]  ;;  %v85_v63 = vld [vmem:[%s1125_s2 + $0x190] sm:$0xff] }
  0x14   :  { %688 = vmatprep.subr.mxu1 %v90_v37  ;;  %655 = vmatprep.subr.mxu0 %v57_v40 }
  0x15   :  { %689 = vmatpush3.msra.mxu1 %v74_v41  ;;  %656 = vmatpush3.msra.mxu0 %v41_v42 }
  0x16   :  { %690 = vmatprep.subr.mxu1 %v89_v43  ;;  %657 = vmatprep.subr.mxu0 %v56_v44 }
  0x17   :  { %691 = vmatpush3.msra.mxu1 %v73_v45  ;;  %658 = vmatpush3.msra.mxu0 %v40_v46 }
  0x18   :  { %692 = vmatprep.subr.mxu1 %v88_v47  ;;  %659 = vmatprep.subr.mxu0 %v55_v49 }
  0x19   :  { %693 = vmatpush3.msra.mxu1 %v72_v50  ;;  %660 = vmatpush3.msra.mxu0 %v39_v52 }
  0x1a   :  { %694 = vmatprep.subr.mxu1 %v87_v53  ;;  %661 = vmatprep.subr.mxu0 %v54_v54 }
  0x1b   :  { %695 = vmatpush3.msra.mxu1 %v71_v55 }
  0x1c   :  { %14 = vsyncpa [#allocation3], 0  ;;  %662 = vmatpush3.msra.mxu0 %v38_v56  ;;  %696 = vmatprep.subr.mxu1 %v86_v57  ;;  %v52_v0 = vld [vmem:[%s1125_s2 + $0x88] sm:$0xff]  ;;  %v69_v1 = vld [vmem:[%s1125_s2 + $0x110] sm:$0xff]  ;;  %v131_v4 = vcombine.high %v123_v58, %v123_v58  ;;  %v130_v5 = vrot.slane %v116_v59, %v122_v48  ;;  %v793_v13 = vmov 0.0   ;;  %vm371_vm0 = vcmask 1041408  }
  0x1d   :  { %663 = vmatprep.subr.mxu0 %v53_v60  ;;  %697 = vmatpush3.msra.mxu1 %v70_v61  ;;  %v36_v2 = vld [vmem:[%s1125_s2 + $0x8] sm:$0xff]  ;;  %v51_v6 = vld [vmem:[%s1125_s2 + $0x80] sm:$0xff]  ;;  %v106_v12 = vld [vmem:[%s1125_s2 + $0x238] sm:$0xff]  ;;  %vm367_vm1 = vcmask 15360   ;;  %vm794_vm2 = vmmov 0   ;;  %vm144_vm3 = vcmask 523264  }
  0x1e   :  { %v84_v3 = vld [vmem:[%s1125_s2 + $0x188] sm:$0xff]  ;;  %664 = vmatpush3.msra.mxu0 %v37_v62  ;;  %698 = vmatprep.subr.mxu1 %v85_v63  ;;  %v35_v7 = vld [vmem:[%s1125_s2] sm:$0xff]  ;;  %v132_v11 = vcombine.high %v130_v5, %v130_v5  ;;  %v105_v14 = vld [vmem:[%s1125_s2 + $0x230] sm:$0xff]  ;;  %vm455_vm4 = vcmask 1043456   ;;  %vm451_vm5 = vcmask 31744   ;;  %vm529_vm6 = vcmask 261120  }
  0x1f   :  { %665 = vmatprep.subr.mxu0 %v52_v0  ;;  %699 = vmatpush3.msra.mxu1 %v69_v1  ;;  %v68_v8 = vld [vmem:[%s1125_s2 + $0x108] sm:$0xff]  ;;  %v83_v9 = vld [vmem:[%s1125_s2 + $0x180] sm:$0xff]  ;;  %v102_v19 = vld [vmem:[%s1125_s2 + $0x218] sm:$0xff]  ;;  %vm611_vm7 = vcmask 9216  }
  0x20   :  { %666 = vmatpush3.msra.mxu0 %v36_v2  ;;  %700 = vmatprep.subr.mxu1 %v84_v3  ;;  %v67_v10 = vld [vmem:[%s1125_s2 + $0x100] sm:$0xff]  ;;  %v104_v16 = vld [vmem:[%s1125_s2 + $0x228] sm:$0xff]  ;;  %v101_v20 = vld [vmem:[%s1125_s2 + $0x210] sm:$0xff] }
  0x21   :  { %667 = vmatprep.subr.mxu0 %v51_v6  ;;  %211 = vmatprep.mubr.f32.mxu0 %v131_v4  ;;  %v359_v15 = vld [vmem:[%s1127_s4] sm:$0x3]  ;;  %v100_v21 = vld [vmem:[%s1125_s2 + $0x208] sm:$0xff]  ;;  %v449_v36 = vld [vmem:[%s1129_s6 + $0x18] sm:$0xff]  ;;  %s795_s4 = smov [#allocation2]  }
  0x22   :  { %668 = vmatpush3.msra.mxu0 %v35_v7  ;;  %701 = vmatpush3.msra.mxu1 %v68_v8  ;;  %v358_v17 = vld [vmem:[%s1124_s1] sm:$0x3]  ;;  %v628_v23 = vld.sshfl [vmem:[%s1123_s0 + $0x8] sm:$0x3 pattern:$0x76325410] }
  0x23   :  { %212 = vmatmul.mubr.f32.vlgmr.msra.gmra.mxu0 %v123_v58  ;;  %702 = vmatprep.subr.mxu1 %v83_v9  ;;  %v103_v18 = vld [vmem:[%s1125_s2 + $0x220] sm:$0xff]  ;;  %v448_v39 = vld [vmem:[%s1129_s6 + $0x10] sm:$0xff]  ;;  %v447_v40 = vld [vmem:[%s1129_s6 + $0x8] sm:$0xff]  ;;  %s619_s23 = sshll.u32 %s795_s4, 4  ;;  %s620_s23 = int_to_ptr.vmem [resolvable:$true] %s619_s23 }
  0x24   :  { %725 = vmatprep.subr.mxu0 %v793_v13  ;;  %703 = vmatpush3.msra.mxu1 %v67_v10  ;;  %v99_v22 = vld [vmem:[%s1125_s2 + $0x200] sm:$0xff]  ;;  %p775_p1 = scmp.lt.s32.totalorder %s620_s23, %s620_s23 }
  0x25   :  { %281 = vmatprep.mubr.f32.mxu1 %v132_v11  ;;  %726 = vmatpush3.msra.mxu0 %v106_v12  ;;  %v450_v24 = vld [vmem:[%s1130_s7] sm:$0xf] }
  0x26   :  { %282 = vmatmul.mubr.f32.vlgmr.msra.gmra.mxu1 %v130_v5  ;;  %727 = vmatprep.subr.mxu0 %v793_v13  ;;  %v630_v29 = vld [vmem:[%s1128_s5] ss:$0 sm:$0xff] }
  0x27   :  { %728 = vmatpush3.msra.mxu0 %v105_v14  ;;  %744 = vmatprep.subr.mxu1 %v793_v13  ;;  %v627_v33 = vld [vmem:[%s1126_s3] ss:$0 sm:$0xff] }
  0x28   :  { %729 = vmatprep.subr.mxu0 %v793_v13  ;;  %745 = vmatpush3.msk.msra.mxu1 %vm371_vm0, %v359_v15  ;;  %v446_v42 = vld [vmem:[%s1129_s6] sm:$0xff]  ;;  %s770_s6 = scalar_lea.vmem %s620_s23, 32 }
  0x29   :  { %730 = vmatpush3.msra.mxu0 %v104_v16  ;;  %746 = vmatprep.mubr.msk.f32.mxu1 %vm794_vm2, %v793_v13  ;;  %v636_v50 = vld [vmem:[%s1131_s8] ss:$0 sm:$0xff]  ;;  %p771_p0 = scmp.ne.s32.totalorder %s620_s23, %s770_s6  ;;  %p776_p2 = scmp.lt.s32.totalorder %s770_s6, %s770_s6 }
  0x2a   :  { %731 = vmatprep.subr.mxu0 %v793_v13  ;;  %747 = vmatmul.mubr.msk.f32.vlgmr.msra.gmra.mxu1 %vm367_vm1, %v358_v17 }
  0x2b   :  { %732 = vmatpush3.msra.mxu0 %v103_v18  ;;  %741 = vmatprep.mubr.msk.f32.mxu0 %vm794_vm2, %v793_v13  ;;  %p777_p3 = por %p776_p2, %p775_p1 }
  0x2c   :  { %733 = vmatprep.subr.mxu0 %v793_v13  ;;  %749 = vmatprep.subr.mxu1 %v793_v13 }
  0x2d   :  { %734 = vmatpush3.msra.mxu0 %v102_v19  ;;  %751 = vmatprep.mubr.msk.f32.mxu1 %vm794_vm2, %v793_v13  ;;  %p778_p4 = pnand %p777_p3, %p771_p0 }
  0x2e   :  { %735 = vmatprep.subr.mxu0 %v793_v13  ;;  %750 = vmatpush3.msk.msra.mxu1 %vm455_vm4, %v450_v24 }
  0x2f   :  { %736 = vmatpush3.msra.mxu0 %v101_v20  ;;  %754 = vmatprep.subr.mxu1 %v793_v13 }
  0x30   :  { %737 = vmatprep.subr.mxu0 %v793_v13 }
  0x31   :  { %738 = vmatpush3.msra.mxu0 %v100_v21 }
  0x32   :  { %739 = vmatprep.subr.mxu0 %v793_v13 }
  0x33   :  { %740 = vmatpush3.msra.mxu0 %v99_v22 }
  0x34   :  { %742 = vmatmul.mubr.msk.f32.vlgmr.msra.gmra.mxu0 %vm144_vm3, %v628_v23 }
  0xe3   :  { %v669_v25 = vpop.f32.mrf.mxu0 }
  0xe5   :  { %v670_v27 = vpop.f32.mrf.mxu0 }
  0xe6   :  { %v704_v26 = vpop.f32.mrf.mxu1  ;;  %v671_v31 = vadd.f32 %v670_v27, %v669_v25 }
  0xe8   :  { %v705_v28 = vpop.f32.mrf.mxu1  ;;  %v214_v37 = vadd.f32 %v671_v31, %v627_v33 }
  0xe9   :  { %v706_v38 = vadd.f32 %v705_v28, %v704_v26 }
  0xea   :  { %v441_v30 = vpop.f32.mrf.mxu1 }
  0xeb   :  { %v442_v32 = vadd.f32 %v630_v29, %v441_v30  ;;  %v284_v41 = vadd.f32 %v706_v38, %v214_v37 }
  0xec   :  { %v748_v34 = vpop.f32.mrf.mxu1 }
  0xed   :  { %v445_v35 = vmax.f32 %v442_v32, 0.0 }
  0xef   :  { %752 = vmatmul.mubr.msk.f32.vlgmr.msra.gmra.mxu1 %vm451_vm5, %v445_v35 }
  0xf0   :  { %755 = vmatpush3.msra.mxu1 %v449_v36  ;;  %762 = vmatprep.mubr.msk.f32.mxu1 %vm794_vm2, %v793_v13 }
  0xf1   :  { %756 = vmatprep.subr.mxu1 %v793_v13 }
  0xf2   :  { %757 = vmatpush3.msra.mxu1 %v448_v39 }
  0xf3   :  { %758 = vmatprep.subr.mxu1 %v793_v13 }
  0xf4   :  { %v353_v43 = vpop.f32.mrf.mxu0  ;;  %759 = vmatpush3.msra.mxu1 %v447_v40 }
  0xf5   :  { %v354_v44 = vadd.f32 %v353_v43, %v284_v41  ;;  %760 = vmatprep.subr.mxu1 %v793_v13 }
  0xf6   :  { %v743_v45 = vpop.f32.mrf.mxu0  ;;  %761 = vmatpush3.msra.mxu1 %v446_v42 }
  0xf7   :  { %v357_v46 = vmax.f32 %v354_v44, 0.0 }
  0xf9   :  { %763 = vmatmul.mubr.msk.f32.vlgmr.msra.gmra.mxu1 %vm529_vm6, %v357_v46 }
 0x1af   :  { %v525_v47 = vpop.f32.mrf.mxu1 }
 0x1b1   :  { %v753_v48 = vpop.f32.mrf.mxu1 }
 0x1b9   :  { %v599_v49 = vpop.f32.mrf.mxu1 }
 0x1ba   :  { %v600_v51 = vadd.f32 %v599_v49, %v525_v47 }
 0x1bb   :  { %v764_v52 = vpop.f32.mrf.mxu1 }
 0x1bc   :  { %v610_v53 = vadd.f32 %v636_v50, %v600_v51 }
 0x1be   :  { %612 = vst.msk [vmem:[#allocation2] sm:$0x3] %vm611_vm7, %v610_v53 }
 0x1bf   :  { %781 = shalt.err (!%p778_p4)
}
 0x1c0   :  { %622 = dma.vmem_to_hbm [thread:$0]  %s620_s23, 32, %s1132_s9, [#allocation3]  }
 0x1c1   :  { %790 = dma.done.wait [#allocation3], 32  }
 0x1c2   :  { %791 = vsyncadd [#allocation3], 4294967264 }
 0x1c3   :  { %626 = vsyncpa [#allocation3], 1 }

</bundles_post_ra>
